<compile_context>
chip_gen: v7x
topology: tpu7x:2x2x1
jax: 0.10.0
libtpu: 0.0.40
codegen_flags: <defaults>
</compile_context>

<pallas_src>
import jax
import jax.numpy as jnp
from jax import lax
from jax.experimental import pallas as pl
from jax.experimental.pallas import tpu as pltpu

HIDDEN = 32
INPUT_DIM = 1
NUM_LAYERS = 2
HP = 128        # per-gate width padded to one full 128-lane vreg
SUBLANE = 8     # f32 sublane count; batch padded to a multiple of this


def _gru_kernel(x_ref, h0_ref,
                wx0_ref, w0_ref, b0_ref,
                w1_ref, b1_ref,
                wout_ref, bout_ref,
                y_ref, hout_ref,
                h_scr, h1hist):
    c = pl.program_id(0)
    T, Bp, _ = x_ref.shape
    Hp = h0_ref.shape[2]

    @pl.when(c == 0)
    def _():
        h_scr[...] = h0_ref[...]

    # Hoist weight / bias loads (and the sublane broadcast of the biases) out
    # of the time loop — JAX does not CSE broadcast_in_dim inside the loop.
    wx0 = wx0_ref[...]                                    # (1, 4*Hp)   ih path, layer 0
    w0 = w0_ref[...]                                      # (Hp, 4*Hp)  hh path, layer 0
    w1 = w1_ref[...]                                      # (2*Hp, 4*Hp) fused layer 1
    b0 = jnp.broadcast_to(b0_ref[...], (Bp, 4 * Hp))
    b1 = jnp.broadcast_to(b1_ref[...], (Bp, 4 * Hp))

    def step(t, carry):
        h0, h1 = carry
        x_t = x_ref[t]                                    # (Bp, 1)

        # ----- layer 0: one MXU dot (hh path) + VPU rank-1 ih contribution
        # gate column blocks (each Hp wide, vreg aligned): [r | z | gi_n | gh_n]
        g0 = jnp.dot(h0, w0, preferred_element_type=jnp.float32) + b0 + x_t * wx0
        r0 = jax.nn.sigmoid(g0[:, 0:Hp])
        z0 = jax.nn.sigmoid(g0[:, Hp:2 * Hp])
        n0 = jnp.tanh(g0[:, 2 * Hp:3 * Hp] + r0 * g0[:, 3 * Hp:4 * Hp])
        h0n = (1.0 - z0) * n0 + z0 * h0

        # ----- layer 1: single fused dot over concat([layer-input, hidden])
        cat1 = jnp.concatenate([h0n, h1], axis=1)         # (Bp, 2*Hp), vreg-aligned concat
        g1 = jnp.dot(cat1, w1, preferred_element_type=jnp.float32) + b1
        r1 = jax.nn.sigmoid(g1[:, 0:Hp])
        z1 = jax.nn.sigmoid(g1[:, Hp:2 * Hp])
        n1 = jnp.tanh(g1[:, 2 * Hp:3 * Hp] + r1 * g1[:, 3 * Hp:4 * Hp])
        h1n = (1.0 - z1) * n1 + z1 * h1

        h1hist[t] = h1n                                   # full-vreg, unmasked store
        return (h0n, h1n)

    h0f, h1f = lax.fori_loop(0, T, step, (h_scr[0], h_scr[1]),
                             unroll=True if T <= 32 else 8)
    h_scr[0] = h0f
    h_scr[1] = h1f

    # per-timestep Linear(hidden -> 1), batched into one matmul per chunk
    hist = h1hist[...].reshape(T * Bp, Hp)
    y_ref[...] = (jnp.dot(hist, wout_ref[...], preferred_element_type=jnp.float32)
                  + bout_ref[...])

    # write the resident hidden-state output exactly once, at the last chunk
    @pl.when(c == pl.num_programs(0) - 1)
    def _():
        hout_ref[...] = h_scr[...]


def pack_params(params, hidden=HIDDEN, hp=HP):
    """Fuse + pad the PyTorch-style GRU params into MXU/lane-friendly blocks.

    Gate order is PyTorch's (r, z, n). Column layout of every fused weight /
    bias is 4 blocks of width `hp`: [r | z | gi_n | gh_n]; only the first
    `hidden` lanes of each block are non-zero. r/z biases are pre-added
    (bih+bhh); the n-gate ih and hh terms stay separate so r*(W_hn h + b_hn)
    is computed exactly as nn.GRU does.
    """
    (wih0_t, whh0_t, bih0, bhh0, wih1_t, whh1_t, bih1, bhh1, wout_t, bout) = params
    H = hidden
    f32 = jnp.float32
    i_dim = wih0_t.shape[0]

    def gate(w, g):  # slice gate g (0:r, 1:z, 2:n) from a (*, 3H) array
        return w[:, g * H:(g + 1) * H].astype(f32)

    # ---- layer 0 ----
    wx0 = jnp.zeros((i_dim, 4 * hp), f32)          # ih path (rank-1, since I==1)
    wx0 = wx0.at[:, 0 * hp:0 * hp + H].set(gate(wih0_t, 0))
    wx0 = wx0.at[:, 1 * hp:1 * hp + H].set(gate(wih0_t, 1))
    wx0 = wx0.at[:, 2 * hp:2 * hp + H].set(gate(wih0_t, 2))   # gh_n block stays 0
    w0 = jnp.zeros((hp, 4 * hp), f32)              # hh path
    w0 = w0.at[:H, 0 * hp:0 * hp + H].set(gate(whh0_t, 0))
    w0 = w0.at[:H, 1 * hp:1 * hp + H].set(gate(whh0_t, 1))
    w0 = w0.at[:H, 3 * hp:3 * hp + H].set(gate(whh0_t, 2))    # gi_n block stays 0
    b0 = jnp.zeros((1, 4 * hp), f32)
    b0 = b0.at[:, 0 * hp:0 * hp + H].set(gate(bih0, 0) + gate(bhh0, 0))
    b0 = b0.at[:, 1 * hp:1 * hp + H].set(gate(bih0, 1) + gate(bhh0, 1))
    b0 = b0.at[:, 2 * hp:2 * hp + H].set(gate(bih0, 2))
    b0 = b0.at[:, 3 * hp:3 * hp + H].set(gate(bhh0, 2))

    # ---- layer 1: stacked [layer-input rows ; hidden rows] ----
    w1 = jnp.zeros((2 * hp, 4 * hp), f32)
    w1 = w1.at[:H, 0 * hp:0 * hp + H].set(gate(wih1_t, 0))
    w1 = w1.at[:H, 1 * hp:1 * hp + H].set(gate(wih1_t, 1))
    w1 = w1.at[:H, 2 * hp:2 * hp + H].set(gate(wih1_t, 2))
    w1 = w1.at[hp:hp + H, 0 * hp:0 * hp + H].set(gate(whh1_t, 0))
    w1 = w1.at[hp:hp + H, 1 * hp:1 * hp + H].set(gate(whh1_t, 1))
    w1 = w1.at[hp:hp + H, 3 * hp:3 * hp + H].set(gate(whh1_t, 2))
    b1 = jnp.zeros((1, 4 * hp), f32)
    b1 = b1.at[:, 0 * hp:0 * hp + H].set(gate(bih1, 0) + gate(bhh1, 0))
    b1 = b1.at[:, 1 * hp:1 * hp + H].set(gate(bih1, 1) + gate(bhh1, 1))
    b1 = b1.at[:, 2 * hp:2 * hp + H].set(gate(bih1, 2))
    b1 = b1.at[:, 3 * hp:3 * hp + H].set(gate(bhh1, 2))

    wout_p = jnp.zeros((hp, 1), f32).at[:H, :].set(wout_t.astype(f32))
    return wx0, w0, b0, w1, b1, wout_p, bout.astype(f32)


def gru_demo_forward(x, h, params, *, t_chunk=None):
    """x: (seq, B, 1), h: (num_layers, B, hidden). Returns (y, h_state)."""
    seq, B, I = x.shape
    nl, _, H = h.shape
    assert I == INPUT_DIM and nl == NUM_LAYERS and H == HIDDEN

    Bp = max(SUBLANE, ((B + SUBLANE - 1) // SUBLANE) * SUBLANE)
    if t_chunk is None:
        t_chunk = seq if seq <= 128 else 128
    assert seq % t_chunk == 0, "seq_len must be a multiple of the time chunk"
    n_chunks = seq // t_chunk

    wx0, w0, b0, w1, b1, wout_p, bout = pack_params(params)

    # pad batch to the sublane count and hidden to the padded lane width
    x_p = jnp.pad(x.astype(jnp.float32), ((0, 0), (0, Bp - B), (0, 0)))
    h_p = jnp.pad(h.astype(jnp.float32), ((0, 0), (0, Bp - B), (0, HP - H)))

    full = lambda a: pl.BlockSpec(a.shape, lambda c: (0,) * a.ndim)

    grid_spec = pltpu.PrefetchScalarGridSpec(
        num_scalar_prefetch=0,
        grid=(n_chunks,),
        in_specs=[
            pl.BlockSpec((t_chunk, Bp, I), lambda c: (c, 0, 0)),   # x chunk
            full(h_p),                                             # h0 (resident)
            full(wx0), full(w0), full(b0),
            full(w1), full(b1),
            full(wout_p), full(bout),
        ],
        out_specs=[
            pl.BlockSpec((t_chunk * Bp, 1), lambda c: (c, 0)),     # y slab per chunk
            pl.BlockSpec((NUM_LAYERS, Bp, HP), lambda c: (0, 0, 0)),  # final hidden
        ],
        scratch_shapes=[
            pltpu.VMEM((NUM_LAYERS, Bp, HP), jnp.float32),   # hidden-state carry
            pltpu.VMEM((t_chunk, Bp, HP), jnp.float32),      # layer-1 output history
        ],
    )

    y_p, h_out = pl.pallas_call(
        _gru_kernel,
        out_shape=(jax.ShapeDtypeStruct((seq * Bp, 1), jnp.float32),
                   jax.ShapeDtypeStruct((NUM_LAYERS, Bp, HP), jnp.float32)),
        grid_spec=grid_spec,
        compiler_params=pltpu.CompilerParams(
            dimension_semantics=("arbitrary",)),
    )(x_p, h_p, wx0, w0, b0, w1, b1, wout_p, bout)

    # strip the batch / hidden padding
    y = y_p.reshape(seq, Bp, 1)[:, :B, :]
    h_state = h_out[:, :B, :H]
    return y, h_state


def gru_demo_reference(x, h, params):
    """Pure-JAX reference (same math, lax.scan) for correctness checking."""
    (wih0_t, whh0_t, bih0, bhh0, wih1_t, whh1_t, bih1, bhh1, wout_t, bout) = params
    H = HIDDEN

    def cell(inp, h_prev, wih_t, whh_t, bih, bhh):
        gi = inp @ wih_t + bih
        gh = h_prev @ whh_t + bhh
        r = jax.nn.sigmoid(gi[:, :H] + gh[:, :H])
        z = jax.nn.sigmoid(gi[:, H:2 * H] + gh[:, H:2 * H])
        n = jnp.tanh(gi[:, 2 * H:] + r * gh[:, 2 * H:])
        return (1.0 - z) * n + z * h_prev

    def step(carry, x_t):
        h0_, h1_ = carry
        h0n = cell(x_t, h0_, wih0_t, whh0_t, bih0, bhh0)
        h1n = cell(h0n, h1_, wih1_t, whh1_t, bih1, bhh1)
        y_t = h1n @ wout_t + bout
        return (h0n, h1n), y_t

    (h0f, h1f), ys = jax.lax.scan(step, (h[0], h[1]), x)
    return ys, jnp.stack([h0f, h1f])


def init_params(key, input_dim=INPUT_DIM, hidden=HIDDEN):
    """Deterministic synthetic params (PyTorch-style uniform(-1/sqrt(H), 1/sqrt(H)))."""
    k = 1.0 / jnp.sqrt(jnp.float32(hidden))
    keys = jax.random.split(key, 10)
    u = lambda kk, shape: jax.random.uniform(kk, shape, jnp.float32, -k, k)
    # layer 0: weight_ih (3H, I), weight_hh (3H, H); stored transposed for x @ W^T
    wih0_t = u(keys[0], (input_dim, 3 * hidden))
    whh0_t = u(keys[1], (hidden, 3 * hidden))
    bih0 = u(keys[2], (1, 3 * hidden))
    bhh0 = u(keys[3], (1, 3 * hidden))
    # layer 1: input size == hidden
    wih1_t = u(keys[4], (hidden, 3 * hidden))
    whh1_t = u(keys[5], (hidden, 3 * hidden))
    bih1 = u(keys[6], (1, 3 * hidden))
    bhh1 = u(keys[7], (1, 3 * hidden))
    # output Linear(hidden, 1)
    wout_t = u(keys[8], (hidden, 1))
    bout = u(keys[9], (1, 1))
    return (wih0_t, whh0_t, bih0, bhh0, wih1_t, whh1_t, bih1, bhh1, wout_t, bout)


if __name__ == "__main__":
    key = jax.random.PRNGKey(0)
    k_x, k_h, k_p = jax.random.split(key, 3)

    seq_len, batch = 8, 2
    x = jax.random.normal(k_x, (seq_len, batch, INPUT_DIM), jnp.float32)
    h = jax.random.normal(k_h, (NUM_LAYERS, batch, HIDDEN), jnp.float32)
    params = init_params(k_p)

    y, h_state = gru_demo_forward(x, h, params)
    y = jax.block_until_ready(y)
    h_state = jax.block_until_ready(h_state)

    y_ref, h_ref = gru_demo_reference(x, h, params)
    assert y.shape == (seq_len, batch, 1)
    assert h_state.shape == (NUM_LAYERS, batch, HIDDEN)
    assert jnp.allclose(y, y_ref, atol=2e-5, rtol=1e-5)
    assert jnp.allclose(h_state, h_ref, atol=2e-5, rtol=1e-5)

    print("KERNEL_OK")
</pallas_src>

<mosaic_0001>
module attributes {stable_mosaic.version = 11 : i64} {
  func.func @_gru_kernel(%arg0: i32, %arg1: memref<8x8x1xf32, #tpu.memory_space<vmem>>, %arg2: memref<2x8x128xf32, #tpu.memory_space<vmem>>, %arg3: memref<1x512xf32, #tpu.memory_space<vmem>>, %arg4: memref<128x512xf32, #tpu.memory_space<vmem>>, %arg5: memref<1x512xf32, #tpu.memory_space<vmem>>, %arg6: memref<256x512xf32, #tpu.memory_space<vmem>>, %arg7: memref<1x512xf32, #tpu.memory_space<vmem>>, %arg8: memref<128x1xf32, #tpu.memory_space<vmem>>, %arg9: memref<1x1xf32, #tpu.memory_space<vmem>>, %arg10: memref<64x1xf32, #tpu.memory_space<vmem>>, %arg11: memref<2x8x128xf32, #tpu.memory_space<vmem>>, %arg12: memref<2x8x128xf32, #tpu.memory_space<vmem>>, %arg13: memref<8x8x128xf32, #tpu.memory_space<vmem>>) attributes {dimension_semantics = [#tpu.dimension_semantics<arbitrary>], iteration_bounds = array<i64: 1>, scalar_prefetch = 0 : i64, scratch_operands = 2 : i64, tpu.core_type = #tpu.core_type<tc>, window_params = [{transform_indices = @transform_0, window_bounds = array<i64: 8, 8, 1>}, {pipeline_mode = #tpu.pipeline_mode<synchronous>, transform_indices = @transform_1, window_bounds = array<i64: 2, 8, 128>}, {pipeline_mode = #tpu.pipeline_mode<synchronous>, transform_indices = @transform_2, window_bounds = array<i64: 1, 512>}, {pipeline_mode = #tpu.pipeline_mode<synchronous>, transform_indices = @transform_3, window_bounds = array<i64: 128, 512>}, {pipeline_mode = #tpu.pipeline_mode<synchronous>, transform_indices = @transform_4, window_bounds = array<i64: 1, 512>}, {pipeline_mode = #tpu.pipeline_mode<synchronous>, transform_indices = @transform_5, window_bounds = array<i64: 256, 512>}, {pipeline_mode = #tpu.pipeline_mode<synchronous>, transform_indices = @transform_6, window_bounds = array<i64: 1, 512>}, {pipeline_mode = #tpu.pipeline_mode<synchronous>, transform_indices = @transform_7, window_bounds = array<i64: 128, 1>}, {pipeline_mode = #tpu.pipeline_mode<synchronous>, transform_indices = @transform_8, window_bounds = array<i64: 1, 1>}, {transform_indices = @transform_9, window_bounds = array<i64: 64, 1>}, {pipeline_mode = #tpu.pipeline_mode<synchronous>, transform_indices = @transform_10, window_bounds = array<i64: 2, 8, 128>}]} {
    %c0_i32 = arith.constant 0 : i32
    %0 = arith.cmpi eq, %arg0, %c0_i32 : i32
    %1 = arith.extui %0 : i1 to i32
    %c0_i32_0 = arith.constant 0 : i32
    %2 = arith.cmpi ne, %1, %c0_i32_0 : i32
    scf.if %2 {
      %c0_129 = arith.constant 0 : index
      %c0_130 = arith.constant 0 : index
      %c0_131 = arith.constant 0 : index
      %513 = vector.load %arg2[%c0_129, %c0_130, %c0_131] : memref<2x8x128xf32, #tpu.memory_space<vmem>>, vector<2x8x128xf32>
      %c0_132 = arith.constant 0 : index
      %c0_133 = arith.constant 0 : index
      %c0_134 = arith.constant 0 : index
      %514 = vector.load %arg12[%c0_132, %c0_133, %c0_134] : memref<2x8x128xf32, #tpu.memory_space<vmem>>, vector<2x8x128xf32>
      tpu.vector_store %arg12[%c0_132, %c0_133, %c0_134], %513 {strides = array<i32>} : memref<2x8x128xf32, #tpu.memory_space<vmem>>, vector<2x8x128xf32>,
    } else {
    }
    %c0 = arith.constant 0 : index
    %c0_1 = arith.constant 0 : index
    %3 = vector.load %arg3[%c0, %c0_1] : memref<1x512xf32, #tpu.memory_space<vmem>>, vector<1x512xf32>
    %c0_2 = arith.constant 0 : index
    %c0_3 = arith.constant 0 : index
    %4 = vector.load %arg4[%c0_2, %c0_3] : memref<128x512xf32, #tpu.memory_space<vmem>>, vector<128x512xf32>
    %c0_4 = arith.constant 0 : index
    %c0_5 = arith.constant 0 : index
    %5 = vector.load %arg6[%c0_4, %c0_5] : memref<256x512xf32, #tpu.memory_space<vmem>>, vector<256x512xf32>
    %c0_6 = arith.constant 0 : index
    %c0_7 = arith.constant 0 : index
    %6 = vector.load %arg5[%c0_6, %c0_7] : memref<1x512xf32, #tpu.memory_space<vmem>>, vector<1x512xf32>
    %7 = vector.shape_cast %6 : vector<1x512xf32> to vector<1x512xf32>
    %8 = vector.broadcast %7 : vector<1x512xf32> to vector<8x512xf32>
    %c0_8 = arith.constant 0 : index
    %c0_9 = arith.constant 0 : index
    %9 = vector.load %arg7[%c0_8, %c0_9] : memref<1x512xf32, #tpu.memory_space<vmem>>, vector<1x512xf32>
    %10 = vector.shape_cast %9 : vector<1x512xf32> to vector<1x512xf32>
    %11 = vector.broadcast %10 : vector<1x512xf32> to vector<8x512xf32>
    %c0_10 = arith.constant 0 : index
    %c0_11 = arith.constant 0 : index
    %c0_12 = arith.constant 0 : index
    %12 = vector.load %arg12[%c0_10, %c0_11, %c0_12] : memref<2x8x128xf32, #tpu.memory_space<vmem>>, vector<1x8x128xf32>
    %13 = vector.shape_cast %12 : vector<1x8x128xf32> to vector<8x128xf32>
    %c1 = arith.constant 1 : index
    %c0_13 = arith.constant 0 : index
    %c0_14 = arith.constant 0 : index
    %14 = vector.load %arg12[%c1, %c0_13, %c0_14] : memref<2x8x128xf32, #tpu.memory_space<vmem>>, vector<1x8x128xf32>
    %15 = vector.shape_cast %14 : vector<1x8x128xf32> to vector<8x128xf32>
    %c0_i32_15 = arith.constant 0 : i32
    %16 = arith.index_cast %c0_i32_15 : i32 to index
    %c0_16 = arith.constant 0 : index
    %c0_17 = arith.constant 0 : index
    %17 = vector.load %arg1[%16, %c0_16, %c0_17] : memref<8x8x1xf32, #tpu.memory_space<vmem>>, vector<1x8x1xf32>
    %18 = vector.shape_cast %17 : vector<1x8x1xf32> to vector<8x1xf32>
    %cst = arith.constant dense<0.000000e+00> : vector<8x512xf32>
    %19 = tpu.matmul %13, %4, %cst {dimension_numbers = #tpu.dot_dimension_numbers<[1], [0], [0], [1], [0, 0, 1, 1], [], []>} : vector<8x128xf32>, vector<128x512xf32>, vector<8x512xf32> -> vector<8x512xf32>
    %20 = arith.addf %19, %8 : vector<8x512xf32>
    %21 = vector.broadcast %18 : vector<8x1xf32> to vector<8x512xf32>
    %22 = vector.broadcast %3 : vector<1x512xf32> to vector<8x512xf32>
    %23 = arith.mulf %21, %22 : vector<8x512xf32>
    %24 = arith.addf %20, %23 : vector<8x512xf32>
    %25 = vector.extract_strided_slice %24 {offsets = [0, 0], sizes = [8, 128], strides = [1, 1]} : vector<8x512xf32> to vector<8x128xf32>
    %26 = arith.negf %25 : vector<8x128xf32>
    %27 = math.exp %26 : vector<8x128xf32>
    %cst_18 = arith.constant 1.000000e+00 : f32
    %28 = vector.broadcast %cst_18 : f32 to vector<8x128xf32>
    %29 = arith.addf %28, %27 : vector<8x128xf32>
    %30 = arith.divf %28, %29 : vector<8x128xf32>
    %31 = vector.extract_strided_slice %24 {offsets = [0, 128], sizes = [8, 128], strides = [1, 1]} : vector<8x512xf32> to vector<8x128xf32>
    %32 = arith.negf %31 : vector<8x128xf32>
    %33 = math.exp %32 : vector<8x128xf32>
    %cst_19 = arith.constant 1.000000e+00 : f32
    %34 = vector.broadcast %cst_19 : f32 to vector<8x128xf32>
    %35 = arith.addf %34, %33 : vector<8x128xf32>
    %36 = arith.divf %34, %35 : vector<8x128xf32>
    %37 = vector.extract_strided_slice %24 {offsets = [0, 256], sizes = [8, 128], strides = [1, 1]} : vector<8x512xf32> to vector<8x128xf32>
    %38 = vector.extract_strided_slice %24 {offsets = [0, 384], sizes = [8, 128], strides = [1, 1]} : vector<8x512xf32> to vector<8x128xf32>
    %39 = arith.mulf %30, %38 : vector<8x128xf32>
    %40 = arith.addf %37, %39 : vector<8x128xf32>
    %41 = math.tanh %40 : vector<8x128xf32>
    %cst_20 = arith.constant 1.000000e+00 : f32
    %42 = vector.broadcast %cst_20 : f32 to vector<8x128xf32>
    %43 = arith.subf %42, %36 : vector<8x128xf32>
    %44 = arith.mulf %43, %41 : vector<8x128xf32>
    %45 = arith.mulf %36, %13 : vector<8x128xf32>
    %46 = arith.addf %44, %45 : vector<8x128xf32>
    %47 = tpu.concatenate %46, %15 in 1 : vector<8x128xf32>, vector<8x128xf32> -> vector<8x256xf32>
    %cst_21 = arith.constant dense<0.000000e+00> : vector<8x512xf32>
    %48 = tpu.matmul %47, %5, %cst_21 {dimension_numbers = #tpu.dot_dimension_numbers<[1], [0], [0], [1], [0, 0, 1, 1], [], []>} : vector<8x256xf32>, vector<256x512xf32>, vector<8x512xf32> -> vector<8x512xf32>
    %49 = arith.addf %48, %11 : vector<8x512xf32>
    %50 = vector.extract_strided_slice %49 {offsets = [0, 0], sizes = [8, 128], strides = [1, 1]} : vector<8x512xf32> to vector<8x128xf32>
    %51 = arith.negf %50 : vector<8x128xf32>
    %52 = math.exp %51 : vector<8x128xf32>
    %cst_22 = arith.constant 1.000000e+00 : f32
    %53 = vector.broadcast %cst_22 : f32 to vector<8x128xf32>
    %54 = arith.addf %53, %52 : vector<8x128xf32>
    %55 = arith.divf %53, %54 : vector<8x128xf32>
    %56 = vector.extract_strided_slice %49 {offsets = [0, 128], sizes = [8, 128], strides = [1, 1]} : vector<8x512xf32> to vector<8x128xf32>
    %57 = arith.negf %56 : vector<8x128xf32>
    %58 = math.exp %57 : vector<8x128xf32>
    %cst_23 = arith.constant 1.000000e+00 : f32
    %59 = vector.broadcast %cst_23 : f32 to vector<8x128xf32>
    %60 = arith.addf %59, %58 : vector<8x128xf32>
    %61 = arith.divf %59, %60 : vector<8x128xf32>
    %62 = vector.extract_strided_slice %49 {offsets = [0, 256], sizes = [8, 128], strides = [1, 1]} : vector<8x512xf32> to vector<8x128xf32>
    %63 = vector.extract_strided_slice %49 {offsets = [0, 384], sizes = [8, 128], strides = [1, 1]} : vector<8x512xf32> to vector<8x128xf32>
    %64 = arith.mulf %55, %63 : vector<8x128xf32>
    %65 = arith.addf %62, %64 : vector<8x128xf32>
    %66 = math.tanh %65 : vector<8x128xf32>
    %cst_24 = arith.constant 1.000000e+00 : f32
    %67 = vector.broadcast %cst_24 : f32 to vector<8x128xf32>
    %68 = arith.subf %67, %61 : vector<8x128xf32>
    %69 = arith.mulf %68, %66 : vector<8x128xf32>
    %70 = arith.mulf %61, %15 : vector<8x128xf32>
    %71 = arith.addf %69, %70 : vector<8x128xf32>
    %72 = arith.index_cast %c0_i32_15 : i32 to index
    %c0_25 = arith.constant 0 : index
    %c0_26 = arith.constant 0 : index
    %73 = vector.load %arg13[%72, %c0_25, %c0_26] : memref<8x8x128xf32, #tpu.memory_space<vmem>>, vector<1x8x128xf32>
    %74 = vector.shape_cast %73 : vector<1x8x128xf32> to vector<8x128xf32>
    %75 = vector.shape_cast %71 : vector<8x128xf32> to vector<1x8x128xf32>
    tpu.vector_store %arg13[%72, %c0_25, %c0_26], %75 {strides = array<i32>} : memref<8x8x128xf32, #tpu.memory_space<vmem>>, vector<1x8x128xf32>,
    %c1_i32 = arith.constant 1 : i32
    %76 = arith.index_cast %c1_i32 : i32 to index
    %c0_27 = arith.constant 0 : index
    %c0_28 = arith.constant 0 : index
    %77 = vector.load %arg1[%76, %c0_27, %c0_28] : memref<8x8x1xf32, #tpu.memory_space<vmem>>, vector<1x8x1xf32>
    %78 = vector.shape_cast %77 : vector<1x8x1xf32> to vector<8x1xf32>
    %cst_29 = arith.constant dense<0.000000e+00> : vector<8x512xf32>
    %79 = tpu.matmul %46, %4, %cst_29 {dimension_numbers = #tpu.dot_dimension_numbers<[1], [0], [0], [1], [0, 0, 1, 1], [], []>} : vector<8x128xf32>, vector<128x512xf32>, vector<8x512xf32> -> vector<8x512xf32>
    %80 = arith.addf %79, %8 : vector<8x512xf32>
    %81 = vector.broadcast %78 : vector<8x1xf32> to vector<8x512xf32>
    %82 = vector.broadcast %3 : vector<1x512xf32> to vector<8x512xf32>
    %83 = arith.mulf %81, %82 : vector<8x512xf32>
    %84 = arith.addf %80, %83 : vector<8x512xf32>
    %85 = vector.extract_strided_slice %84 {offsets = [0, 0], sizes = [8, 128], strides = [1, 1]} : vector<8x512xf32> to vector<8x128xf32>
    %86 = arith.negf %85 : vector<8x128xf32>
    %87 = math.exp %86 : vector<8x128xf32>
    %cst_30 = arith.constant 1.000000e+00 : f32
    %88 = vector.broadcast %cst_30 : f32 to vector<8x128xf32>
    %89 = arith.addf %88, %87 : vector<8x128xf32>
    %90 = arith.divf %88, %89 : vector<8x128xf32>
    %91 = vector.extract_strided_slice %84 {offsets = [0, 128], sizes = [8, 128], strides = [1, 1]} : vector<8x512xf32> to vector<8x128xf32>
    %92 = arith.negf %91 : vector<8x128xf32>
    %93 = math.exp %92 : vector<8x128xf32>
    %cst_31 = arith.constant 1.000000e+00 : f32
    %94 = vector.broadcast %cst_31 : f32 to vector<8x128xf32>
    %95 = arith.addf %94, %93 : vector<8x128xf32>
    %96 = arith.divf %94, %95 : vector<8x128xf32>
    %97 = vector.extract_strided_slice %84 {offsets = [0, 256], sizes = [8, 128], strides = [1, 1]} : vector<8x512xf32> to vector<8x128xf32>
    %98 = vector.extract_strided_slice %84 {offsets = [0, 384], sizes = [8, 128], strides = [1, 1]} : vector<8x512xf32> to vector<8x128xf32>
    %99 = arith.mulf %90, %98 : vector<8x128xf32>
    %100 = arith.addf %97, %99 : vector<8x128xf32>
    %101 = math.tanh %100 : vector<8x128xf32>
    %cst_32 = arith.constant 1.000000e+00 : f32
    %102 = vector.broadcast %cst_32 : f32 to vector<8x128xf32>
    %103 = arith.subf %102, %96 : vector<8x128xf32>
    %104 = arith.mulf %103, %101 : vector<8x128xf32>
    %105 = arith.mulf %96, %46 : vector<8x128xf32>
    %106 = arith.addf %104, %105 : vector<8x128xf32>
    %107 = tpu.concatenate %106, %71 in 1 : vector<8x128xf32>, vector<8x128xf32> -> vector<8x256xf32>
    %cst_33 = arith.constant dense<0.000000e+00> : vector<8x512xf32>
    %108 = tpu.matmul %107, %5, %cst_33 {dimension_numbers = #tpu.dot_dimension_numbers<[1], [0], [0], [1], [0, 0, 1, 1], [], []>} : vector<8x256xf32>, vector<256x512xf32>, vector<8x512xf32> -> vector<8x512xf32>
    %109 = arith.addf %108, %11 : vector<8x512xf32>
    %110 = vector.extract_strided_slice %109 {offsets = [0, 0], sizes = [8, 128], strides = [1, 1]} : vector<8x512xf32> to vector<8x128xf32>
    %111 = arith.negf %110 : vector<8x128xf32>
    %112 = math.exp %111 : vector<8x128xf32>
    %cst_34 = arith.constant 1.000000e+00 : f32
    %113 = vector.broadcast %cst_34 : f32 to vector<8x128xf32>
    %114 = arith.addf %113, %112 : vector<8x128xf32>
    %115 = arith.divf %113, %114 : vector<8x128xf32>
    %116 = vector.extract_strided_slice %109 {offsets = [0, 128], sizes = [8, 128], strides = [1, 1]} : vector<8x512xf32> to vector<8x128xf32>
    %117 = arith.negf %116 : vector<8x128xf32>
    %118 = math.exp %117 : vector<8x128xf32>
    %cst_35 = arith.constant 1.000000e+00 : f32
    %119 = vector.broadcast %cst_35 : f32 to vector<8x128xf32>
    %120 = arith.addf %119, %118 : vector<8x128xf32>
    %121 = arith.divf %119, %120 : vector<8x128xf32>
    %122 = vector.extract_strided_slice %109 {offsets = [0, 256], sizes = [8, 128], strides = [1, 1]} : vector<8x512xf32> to vector<8x128xf32>
    %123 = vector.extract_strided_slice %109 {offsets = [0, 384], sizes = [8, 128], strides = [1, 1]} : vector<8x512xf32> to vector<8x128xf32>
    %124 = arith.mulf %115, %123 : vector<8x128xf32>
    %125 = arith.addf %122, %124 : vector<8x128xf32>
    %126 = math.tanh %125 : vector<8x128xf32>
    %cst_36 = arith.constant 1.000000e+00 : f32
    %127 = vector.broadcast %cst_36 : f32 to vector<8x128xf32>
    %128 = arith.subf %127, %121 : vector<8x128xf32>
    %129 = arith.mulf %128, %126 : vector<8x128xf32>
    %130 = arith.mulf %121, %71 : vector<8x128xf32>
    %131 = arith.addf %129, %130 : vector<8x128xf32>
    %132 = arith.index_cast %c1_i32 : i32 to index
    %c0_37 = arith.constant 0 : index
    %c0_38 = arith.constant 0 : index
    %133 = vector.load %arg13[%132, %c0_37, %c0_38] : memref<8x8x128xf32, #tpu.memory_space<vmem>>, vector<1x8x128xf32>
    %134 = vector.shape_cast %133 : vector<1x8x128xf32> to vector<8x128xf32>
    %135 = vector.shape_cast %131 : vector<8x128xf32> to vector<1x8x128xf32>
    tpu.vector_store %arg13[%132, %c0_37, %c0_38], %135 {strides = array<i32>} : memref<8x8x128xf32, #tpu.memory_space<vmem>>, vector<1x8x128xf32>,
    %c2_i32 = arith.constant 2 : i32
    %136 = arith.index_cast %c2_i32 : i32 to index
    %c0_39 = arith.constant 0 : index
    %c0_40 = arith.constant 0 : index
    %137 = vector.load %arg1[%136, %c0_39, %c0_40] : memref<8x8x1xf32, #tpu.memory_space<vmem>>, vector<1x8x1xf32>
    %138 = vector.shape_cast %137 : vector<1x8x1xf32> to vector<8x1xf32>
    %cst_41 = arith.constant dense<0.000000e+00> : vector<8x512xf32>
    %139 = tpu.matmul %106, %4, %cst_41 {dimension_numbers = #tpu.dot_dimension_numbers<[1], [0], [0], [1], [0, 0, 1, 1], [], []>} : vector<8x128xf32>, vector<128x512xf32>, vector<8x512xf32> -> vector<8x512xf32>
    %140 = arith.addf %139, %8 : vector<8x512xf32>
    %141 = vector.broadcast %138 : vector<8x1xf32> to vector<8x512xf32>
    %142 = vector.broadcast %3 : vector<1x512xf32> to vector<8x512xf32>
    %143 = arith.mulf %141, %142 : vector<8x512xf32>
    %144 = arith.addf %140, %143 : vector<8x512xf32>
    %145 = vector.extract_strided_slice %144 {offsets = [0, 0], sizes = [8, 128], strides = [1, 1]} : vector<8x512xf32> to vector<8x128xf32>
    %146 = arith.negf %145 : vector<8x128xf32>
    %147 = math.exp %146 : vector<8x128xf32>
    %cst_42 = arith.constant 1.000000e+00 : f32
    %148 = vector.broadcast %cst_42 : f32 to vector<8x128xf32>
    %149 = arith.addf %148, %147 : vector<8x128xf32>
    %150 = arith.divf %148, %149 : vector<8x128xf32>
    %151 = vector.extract_strided_slice %144 {offsets = [0, 128], sizes = [8, 128], strides = [1, 1]} : vector<8x512xf32> to vector<8x128xf32>
    %152 = arith.negf %151 : vector<8x128xf32>
    %153 = math.exp %152 : vector<8x128xf32>
    %cst_43 = arith.constant 1.000000e+00 : f32
    %154 = vector.broadcast %cst_43 : f32 to vector<8x128xf32>
    %155 = arith.addf %154, %153 : vector<8x128xf32>
    %156 = arith.divf %154, %155 : vector<8x128xf32>
    %157 = vector.extract_strided_slice %144 {offsets = [0, 256], sizes = [8, 128], strides = [1, 1]} : vector<8x512xf32> to vector<8x128xf32>
    %158 = vector.extract_strided_slice %144 {offsets = [0, 384], sizes = [8, 128], strides = [1, 1]} : vector<8x512xf32> to vector<8x128xf32>
    %159 = arith.mulf %150, %158 : vector<8x128xf32>
    %160 = arith.addf %157, %159 : vector<8x128xf32>
    %161 = math.tanh %160 : vector<8x128xf32>
    %cst_44 = arith.constant 1.000000e+00 : f32
    %162 = vector.broadcast %cst_44 : f32 to vector<8x128xf32>
    %163 = arith.subf %162, %156 : vector<8x128xf32>
    %164 = arith.mulf %163, %161 : vector<8x128xf32>
    %165 = arith.mulf %156, %106 : vector<8x128xf32>
    %166 = arith.addf %164, %165 : vector<8x128xf32>
    %167 = tpu.concatenate %166, %131 in 1 : vector<8x128xf32>, vector<8x128xf32> -> vector<8x256xf32>
    %cst_45 = arith.constant dense<0.000000e+00> : vector<8x512xf32>
    %168 = tpu.matmul %167, %5, %cst_45 {dimension_numbers = #tpu.dot_dimension_numbers<[1], [0], [0], [1], [0, 0, 1, 1], [], []>} : vector<8x256xf32>, vector<256x512xf32>, vector<8x512xf32> -> vector<8x512xf32>
    %169 = arith.addf %168, %11 : vector<8x512xf32>
    %170 = vector.extract_strided_slice %169 {offsets = [0, 0], sizes = [8, 128], strides = [1, 1]} : vector<8x512xf32> to vector<8x128xf32>
    %171 = arith.negf %170 : vector<8x128xf32>
    %172 = math.exp %171 : vector<8x128xf32>
    %cst_46 = arith.constant 1.000000e+00 : f32
    %173 = vector.broadcast %cst_46 : f32 to vector<8x128xf32>
    %174 = arith.addf %173, %172 : vector<8x128xf32>
    %175 = arith.divf %173, %174 : vector<8x128xf32>
    %176 = vector.extract_strided_slice %169 {offsets = [0, 128], sizes = [8, 128], strides = [1, 1]} : vector<8x512xf32> to vector<8x128xf32>
    %177 = arith.negf %176 : vector<8x128xf32>
    %178 = math.exp %177 : vector<8x128xf32>
    %cst_47 = arith.constant 1.000000e+00 : f32
    %179 = vector.broadcast %cst_47 : f32 to vector<8x128xf32>
    %180 = arith.addf %179, %178 : vector<8x128xf32>
    %181 = arith.divf %179, %180 : vector<8x128xf32>
    %182 = vector.extract_strided_slice %169 {offsets = [0, 256], sizes = [8, 128], strides = [1, 1]} : vector<8x512xf32> to vector<8x128xf32>
    %183 = vector.extract_strided_slice %169 {offsets = [0, 384], sizes = [8, 128], strides = [1, 1]} : vector<8x512xf32> to vector<8x128xf32>
    %184 = arith.mulf %175, %183 : vector<8x128xf32>
    %185 = arith.addf %182, %184 : vector<8x128xf32>
    %186 = math.tanh %185 : vector<8x128xf32>
    %cst_48 = arith.constant 1.000000e+00 : f32
    %187 = vector.broadcast %cst_48 : f32 to vector<8x128xf32>
    %188 = arith.subf %187, %181 : vector<8x128xf32>
    %189 = arith.mulf %188, %186 : vector<8x128xf32>
    %190 = arith.mulf %181, %131 : vector<8x128xf32>
    %191 = arith.addf %189, %190 : vector<8x128xf32>
    %192 = arith.index_cast %c2_i32 : i32 to index
    %c0_49 = arith.constant 0 : index
    %c0_50 = arith.constant 0 : index
    %193 = vector.load %arg13[%192, %c0_49, %c0_50] : memref<8x8x128xf32, #tpu.memory_space<vmem>>, vector<1x8x128xf32>
    %194 = vector.shape_cast %193 : vector<1x8x128xf32> to vector<8x128xf32>
    %195 = vector.shape_cast %191 : vector<8x128xf32> to vector<1x8x128xf32>
    tpu.vector_store %arg13[%192, %c0_49, %c0_50], %195 {strides = array<i32>} : memref<8x8x128xf32, #tpu.memory_space<vmem>>, vector<1x8x128xf32>,
    %c3_i32 = arith.constant 3 : i32
    %196 = arith.index_cast %c3_i32 : i32 to index
    %c0_51 = arith.constant 0 : index
    %c0_52 = arith.constant 0 : index
    %197 = vector.load %arg1[%196, %c0_51, %c0_52] : memref<8x8x1xf32, #tpu.memory_space<vmem>>, vector<1x8x1xf32>
    %198 = vector.shape_cast %197 : vector<1x8x1xf32> to vector<8x1xf32>
    %cst_53 = arith.constant dense<0.000000e+00> : vector<8x512xf32>
    %199 = tpu.matmul %166, %4, %cst_53 {dimension_numbers = #tpu.dot_dimension_numbers<[1], [0], [0], [1], [0, 0, 1, 1], [], []>} : vector<8x128xf32>, vector<128x512xf32>, vector<8x512xf32> -> vector<8x512xf32>
    %200 = arith.addf %199, %8 : vector<8x512xf32>
    %201 = vector.broadcast %198 : vector<8x1xf32> to vector<8x512xf32>
    %202 = vector.broadcast %3 : vector<1x512xf32> to vector<8x512xf32>
    %203 = arith.mulf %201, %202 : vector<8x512xf32>
    %204 = arith.addf %200, %203 : vector<8x512xf32>
    %205 = vector.extract_strided_slice %204 {offsets = [0, 0], sizes = [8, 128], strides = [1, 1]} : vector<8x512xf32> to vector<8x128xf32>
    %206 = arith.negf %205 : vector<8x128xf32>
    %207 = math.exp %206 : vector<8x128xf32>
    %cst_54 = arith.constant 1.000000e+00 : f32
    %208 = vector.broadcast %cst_54 : f32 to vector<8x128xf32>
    %209 = arith.addf %208, %207 : vector<8x128xf32>
    %210 = arith.divf %208, %209 : vector<8x128xf32>
    %211 = vector.extract_strided_slice %204 {offsets = [0, 128], sizes = [8, 128], strides = [1, 1]} : vector<8x512xf32> to vector<8x128xf32>
    %212 = arith.negf %211 : vector<8x128xf32>
    %213 = math.exp %212 : vector<8x128xf32>
    %cst_55 = arith.constant 1.000000e+00 : f32
    %214 = vector.broadcast %cst_55 : f32 to vector<8x128xf32>
    %215 = arith.addf %214, %213 : vector<8x128xf32>
    %216 = arith.divf %214, %215 : vector<8x128xf32>
    %217 = vector.extract_strided_slice %204 {offsets = [0, 256], sizes = [8, 128], strides = [1, 1]} : vector<8x512xf32> to vector<8x128xf32>
    %218 = vector.extract_strided_slice %204 {offsets = [0, 384], sizes = [8, 128], strides = [1, 1]} : vector<8x512xf32> to vector<8x128xf32>
    %219 = arith.mulf %210, %218 : vector<8x128xf32>
    %220 = arith.addf %217, %219 : vector<8x128xf32>
    %221 = math.tanh %220 : vector<8x128xf32>
    %cst_56 = arith.constant 1.000000e+00 : f32
    %222 = vector.broadcast %cst_56 : f32 to vector<8x128xf32>
    %223 = arith.subf %222, %216 : vector<8x128xf32>
    %224 = arith.mulf %223, %221 : vector<8x128xf32>
    %225 = arith.mulf %216, %166 : vector<8x128xf32>
    %226 = arith.addf %224, %225 : vector<8x128xf32>
    %227 = tpu.concatenate %226, %191 in 1 : vector<8x128xf32>, vector<8x128xf32> -> vector<8x256xf32>
    %cst_57 = arith.constant dense<0.000000e+00> : vector<8x512xf32>
    %228 = tpu.matmul %227, %5, %cst_57 {dimension_numbers = #tpu.dot_dimension_numbers<[1], [0], [0], [1], [0, 0, 1, 1], [], []>} : vector<8x256xf32>, vector<256x512xf32>, vector<8x512xf32> -> vector<8x512xf32>
    %229 = arith.addf %228, %11 : vector<8x512xf32>
    %230 = vector.extract_strided_slice %229 {offsets = [0, 0], sizes = [8, 128], strides = [1, 1]} : vector<8x512xf32> to vector<8x128xf32>
    %231 = arith.negf %230 : vector<8x128xf32>
    %232 = math.exp %231 : vector<8x128xf32>
    %cst_58 = arith.constant 1.000000e+00 : f32
    %233 = vector.broadcast %cst_58 : f32 to vector<8x128xf32>
    %234 = arith.addf %233, %232 : vector<8x128xf32>
    %235 = arith.divf %233, %234 : vector<8x128xf32>
    %236 = vector.extract_strided_slice %229 {offsets = [0, 128], sizes = [8, 128], strides = [1, 1]} : vector<8x512xf32> to vector<8x128xf32>
    %237 = arith.negf %236 : vector<8x128xf32>
    %238 = math.exp %237 : vector<8x128xf32>
    %cst_59 = arith.constant 1.000000e+00 : f32
    %239 = vector.broadcast %cst_59 : f32 to vector<8x128xf32>
    %240 = arith.addf %239, %238 : vector<8x128xf32>
    %241 = arith.divf %239, %240 : vector<8x128xf32>
    %242 = vector.extract_strided_slice %229 {offsets = [0, 256], sizes = [8, 128], strides = [1, 1]} : vector<8x512xf32> to vector<8x128xf32>
    %243 = vector.extract_strided_slice %229 {offsets = [0, 384], sizes = [8, 128], strides = [1, 1]} : vector<8x512xf32> to vector<8x128xf32>
    %244 = arith.mulf %235, %243 : vector<8x128xf32>
    %245 = arith.addf %242, %244 : vector<8x128xf32>
    %246 = math.tanh %245 : vector<8x128xf32>
    %cst_60 = arith.constant 1.000000e+00 : f32
    %247 = vector.broadcast %cst_60 : f32 to vector<8x128xf32>
    %248 = arith.subf %247, %241 : vector<8x128xf32>
    %249 = arith.mulf %248, %246 : vector<8x128xf32>
    %250 = arith.mulf %241, %191 : vector<8x128xf32>
    %251 = arith.addf %249, %250 : vector<8x128xf32>
    %252 = arith.index_cast %c3_i32 : i32 to index
    %c0_61 = arith.constant 0 : index
    %c0_62 = arith.constant 0 : index
    %253 = vector.load %arg13[%252, %c0_61, %c0_62] : memref<8x8x128xf32, #tpu.memory_space<vmem>>, vector<1x8x128xf32>
    %254 = vector.shape_cast %253 : vector<1x8x128xf32> to vector<8x128xf32>
    %255 = vector.shape_cast %251 : vector<8x128xf32> to vector<1x8x128xf32>
    tpu.vector_store %arg13[%252, %c0_61, %c0_62], %255 {strides = array<i32>} : memref<8x8x128xf32, #tpu.memory_space<vmem>>, vector<1x8x128xf32>,
    %c4_i32 = arith.constant 4 : i32
    %256 = arith.index_cast %c4_i32 : i32 to index
    %c0_63 = arith.constant 0 : index
    %c0_64 = arith.constant 0 : index
    %257 = vector.load %arg1[%256, %c0_63, %c0_64] : memref<8x8x1xf32, #tpu.memory_space<vmem>>, vector<1x8x1xf32>
    %258 = vector.shape_cast %257 : vector<1x8x1xf32> to vector<8x1xf32>
    %cst_65 = arith.constant dense<0.000000e+00> : vector<8x512xf32>
    %259 = tpu.matmul %226, %4, %cst_65 {dimension_numbers = #tpu.dot_dimension_numbers<[1], [0], [0], [1], [0, 0, 1, 1], [], []>} : vector<8x128xf32>, vector<128x512xf32>, vector<8x512xf32> -> vector<8x512xf32>
    %260 = arith.addf %259, %8 : vector<8x512xf32>
    %261 = vector.broadcast %258 : vector<8x1xf32> to vector<8x512xf32>
    %262 = vector.broadcast %3 : vector<1x512xf32> to vector<8x512xf32>
    %263 = arith.mulf %261, %262 : vector<8x512xf32>
    %264 = arith.addf %260, %263 : vector<8x512xf32>
    %265 = vector.extract_strided_slice %264 {offsets = [0, 0], sizes = [8, 128], strides = [1, 1]} : vector<8x512xf32> to vector<8x128xf32>
    %266 = arith.negf %265 : vector<8x128xf32>
    %267 = math.exp %266 : vector<8x128xf32>
    %cst_66 = arith.constant 1.000000e+00 : f32
    %268 = vector.broadcast %cst_66 : f32 to vector<8x128xf32>
    %269 = arith.addf %268, %267 : vector<8x128xf32>
    %270 = arith.divf %268, %269 : vector<8x128xf32>
    %271 = vector.extract_strided_slice %264 {offsets = [0, 128], sizes = [8, 128], strides = [1, 1]} : vector<8x512xf32> to vector<8x128xf32>
    %272 = arith.negf %271 : vector<8x128xf32>
    %273 = math.exp %272 : vector<8x128xf32>
    %cst_67 = arith.constant 1.000000e+00 : f32
    %274 = vector.broadcast %cst_67 : f32 to vector<8x128xf32>
    %275 = arith.addf %274, %273 : vector<8x128xf32>
    %276 = arith.divf %274, %275 : vector<8x128xf32>
    %277 = vector.extract_strided_slice %264 {offsets = [0, 256], sizes = [8, 128], strides = [1, 1]} : vector<8x512xf32> to vector<8x128xf32>
    %278 = vector.extract_strided_slice %264 {offsets = [0, 384], sizes = [8, 128], strides = [1, 1]} : vector<8x512xf32> to vector<8x128xf32>
    %279 = arith.mulf %270, %278 : vector<8x128xf32>
    %280 = arith.addf %277, %279 : vector<8x128xf32>
    %281 = math.tanh %280 : vector<8x128xf32>
    %cst_68 = arith.constant 1.000000e+00 : f32
    %282 = vector.broadcast %cst_68 : f32 to vector<8x128xf32>
    %283 = arith.subf %282, %276 : vector<8x128xf32>
    %284 = arith.mulf %283, %281 : vector<8x128xf32>
    %285 = arith.mulf %276, %226 : vector<8x128xf32>
    %286 = arith.addf %284, %285 : vector<8x128xf32>
    %287 = tpu.concatenate %286, %251 in 1 : vector<8x128xf32>, vector<8x128xf32> -> vector<8x256xf32>
    %cst_69 = arith.constant dense<0.000000e+00> : vector<8x512xf32>
    %288 = tpu.matmul %287, %5, %cst_69 {dimension_numbers = #tpu.dot_dimension_numbers<[1], [0], [0], [1], [0, 0, 1, 1], [], []>} : vector<8x256xf32>, vector<256x512xf32>, vector<8x512xf32> -> vector<8x512xf32>
    %289 = arith.addf %288, %11 : vector<8x512xf32>
    %290 = vector.extract_strided_slice %289 {offsets = [0, 0], sizes = [8, 128], strides = [1, 1]} : vector<8x512xf32> to vector<8x128xf32>
    %291 = arith.negf %290 : vector<8x128xf32>
    %292 = math.exp %291 : vector<8x128xf32>
    %cst_70 = arith.constant 1.000000e+00 : f32
    %293 = vector.broadcast %cst_70 : f32 to vector<8x128xf32>
    %294 = arith.addf %293, %292 : vector<8x128xf32>
    %295 = arith.divf %293, %294 : vector<8x128xf32>
    %296 = vector.extract_strided_slice %289 {offsets = [0, 128], sizes = [8, 128], strides = [1, 1]} : vector<8x512xf32> to vector<8x128xf32>
    %297 = arith.negf %296 : vector<8x128xf32>
    %298 = math.exp %297 : vector<8x128xf32>
    %cst_71 = arith.constant 1.000000e+00 : f32
    %299 = vector.broadcast %cst_71 : f32 to vector<8x128xf32>
    %300 = arith.addf %299, %298 : vector<8x128xf32>
    %301 = arith.divf %299, %300 : vector<8x128xf32>
    %302 = vector.extract_strided_slice %289 {offsets = [0, 256], sizes = [8, 128], strides = [1, 1]} : vector<8x512xf32> to vector<8x128xf32>
    %303 = vector.extract_strided_slice %289 {offsets = [0, 384], sizes = [8, 128], strides = [1, 1]} : vector<8x512xf32> to vector<8x128xf32>
    %304 = arith.mulf %295, %303 : vector<8x128xf32>
    %305 = arith.addf %302, %304 : vector<8x128xf32>
    %306 = math.tanh %305 : vector<8x128xf32>
    %cst_72 = arith.constant 1.000000e+00 : f32
    %307 = vector.broadcast %cst_72 : f32 to vector<8x128xf32>
    %308 = arith.subf %307, %301 : vector<8x128xf32>
    %309 = arith.mulf %308, %306 : vector<8x128xf32>
    %310 = arith.mulf %301, %251 : vector<8x128xf32>
    %311 = arith.addf %309, %310 : vector<8x128xf32>
    %312 = arith.index_cast %c4_i32 : i32 to index
    %c0_73 = arith.constant 0 : index
    %c0_74 = arith.constant 0 : index
    %313 = vector.load %arg13[%312, %c0_73, %c0_74] : memref<8x8x128xf32, #tpu.memory_space<vmem>>, vector<1x8x128xf32>
    %314 = vector.shape_cast %313 : vector<1x8x128xf32> to vector<8x128xf32>
    %315 = vector.shape_cast %311 : vector<8x128xf32> to vector<1x8x128xf32>
    tpu.vector_store %arg13[%312, %c0_73, %c0_74], %315 {strides = array<i32>} : memref<8x8x128xf32, #tpu.memory_space<vmem>>, vector<1x8x128xf32>,
    %c5_i32 = arith.constant 5 : i32
    %316 = arith.index_cast %c5_i32 : i32 to index
    %c0_75 = arith.constant 0 : index
    %c0_76 = arith.constant 0 : index
    %317 = vector.load %arg1[%316, %c0_75, %c0_76] : memref<8x8x1xf32, #tpu.memory_space<vmem>>, vector<1x8x1xf32>
    %318 = vector.shape_cast %317 : vector<1x8x1xf32> to vector<8x1xf32>
    %cst_77 = arith.constant dense<0.000000e+00> : vector<8x512xf32>
    %319 = tpu.matmul %286, %4, %cst_77 {dimension_numbers = #tpu.dot_dimension_numbers<[1], [0], [0], [1], [0, 0, 1, 1], [], []>} : vector<8x128xf32>, vector<128x512xf32>, vector<8x512xf32> -> vector<8x512xf32>
    %320 = arith.addf %319, %8 : vector<8x512xf32>
    %321 = vector.broadcast %318 : vector<8x1xf32> to vector<8x512xf32>
    %322 = vector.broadcast %3 : vector<1x512xf32> to vector<8x512xf32>
    %323 = arith.mulf %321, %322 : vector<8x512xf32>
    %324 = arith.addf %320, %323 : vector<8x512xf32>
    %325 = vector.extract_strided_slice %324 {offsets = [0, 0], sizes = [8, 128], strides = [1, 1]} : vector<8x512xf32> to vector<8x128xf32>
    %326 = arith.negf %325 : vector<8x128xf32>
    %327 = math.exp %326 : vector<8x128xf32>
    %cst_78 = arith.constant 1.000000e+00 : f32
    %328 = vector.broadcast %cst_78 : f32 to vector<8x128xf32>
    %329 = arith.addf %328, %327 : vector<8x128xf32>
    %330 = arith.divf %328, %329 : vector<8x128xf32>
    %331 = vector.extract_strided_slice %324 {offsets = [0, 128], sizes = [8, 128], strides = [1, 1]} : vector<8x512xf32> to vector<8x128xf32>
    %332 = arith.negf %331 : vector<8x128xf32>
    %333 = math.exp %332 : vector<8x128xf32>
    %cst_79 = arith.constant 1.000000e+00 : f32
    %334 = vector.broadcast %cst_79 : f32 to vector<8x128xf32>
    %335 = arith.addf %334, %333 : vector<8x128xf32>
    %336 = arith.divf %334, %335 : vector<8x128xf32>
    %337 = vector.extract_strided_slice %324 {offsets = [0, 256], sizes = [8, 128], strides = [1, 1]} : vector<8x512xf32> to vector<8x128xf32>
    %338 = vector.extract_strided_slice %324 {offsets = [0, 384], sizes = [8, 128], strides = [1, 1]} : vector<8x512xf32> to vector<8x128xf32>
    %339 = arith.mulf %330, %338 : vector<8x128xf32>
    %340 = arith.addf %337, %339 : vector<8x128xf32>
    %341 = math.tanh %340 : vector<8x128xf32>
    %cst_80 = arith.constant 1.000000e+00 : f32
    %342 = vector.broadcast %cst_80 : f32 to vector<8x128xf32>
    %343 = arith.subf %342, %336 : vector<8x128xf32>
    %344 = arith.mulf %343, %341 : vector<8x128xf32>
    %345 = arith.mulf %336, %286 : vector<8x128xf32>
    %346 = arith.addf %344, %345 : vector<8x128xf32>
    %347 = tpu.concatenate %346, %311 in 1 : vector<8x128xf32>, vector<8x128xf32> -> vector<8x256xf32>
    %cst_81 = arith.constant dense<0.000000e+00> : vector<8x512xf32>
    %348 = tpu.matmul %347, %5, %cst_81 {dimension_numbers = #tpu.dot_dimension_numbers<[1], [0], [0], [1], [0, 0, 1, 1], [], []>} : vector<8x256xf32>, vector<256x512xf32>, vector<8x512xf32> -> vector<8x512xf32>
    %349 = arith.addf %348, %11 : vector<8x512xf32>
    %350 = vector.extract_strided_slice %349 {offsets = [0, 0], sizes = [8, 128], strides = [1, 1]} : vector<8x512xf32> to vector<8x128xf32>
    %351 = arith.negf %350 : vector<8x128xf32>
    %352 = math.exp %351 : vector<8x128xf32>
    %cst_82 = arith.constant 1.000000e+00 : f32
    %353 = vector.broadcast %cst_82 : f32 to vector<8x128xf32>
    %354 = arith.addf %353, %352 : vector<8x128xf32>
    %355 = arith.divf %353, %354 : vector<8x128xf32>
    %356 = vector.extract_strided_slice %349 {offsets = [0, 128], sizes = [8, 128], strides = [1, 1]} : vector<8x512xf32> to vector<8x128xf32>
    %357 = arith.negf %356 : vector<8x128xf32>
    %358 = math.exp %357 : vector<8x128xf32>
    %cst_83 = arith.constant 1.000000e+00 : f32
    %359 = vector.broadcast %cst_83 : f32 to vector<8x128xf32>
    %360 = arith.addf %359, %358 : vector<8x128xf32>
    %361 = arith.divf %359, %360 : vector<8x128xf32>
    %362 = vector.extract_strided_slice %349 {offsets = [0, 256], sizes = [8, 128], strides = [1, 1]} : vector<8x512xf32> to vector<8x128xf32>
    %363 = vector.extract_strided_slice %349 {offsets = [0, 384], sizes = [8, 128], strides = [1, 1]} : vector<8x512xf32> to vector<8x128xf32>
    %364 = arith.mulf %355, %363 : vector<8x128xf32>
    %365 = arith.addf %362, %364 : vector<8x128xf32>
    %366 = math.tanh %365 : vector<8x128xf32>
    %cst_84 = arith.constant 1.000000e+00 : f32
    %367 = vector.broadcast %cst_84 : f32 to vector<8x128xf32>
    %368 = arith.subf %367, %361 : vector<8x128xf32>
    %369 = arith.mulf %368, %366 : vector<8x128xf32>
    %370 = arith.mulf %361, %311 : vector<8x128xf32>
    %371 = arith.addf %369, %370 : vector<8x128xf32>
    %372 = arith.index_cast %c5_i32 : i32 to index
    %c0_85 = arith.constant 0 : index
    %c0_86 = arith.constant 0 : index
    %373 = vector.load %arg13[%372, %c0_85, %c0_86] : memref<8x8x128xf32, #tpu.memory_space<vmem>>, vector<1x8x128xf32>
    %374 = vector.shape_cast %373 : vector<1x8x128xf32> to vector<8x128xf32>
    %375 = vector.shape_cast %371 : vector<8x128xf32> to vector<1x8x128xf32>
    tpu.vector_store %arg13[%372, %c0_85, %c0_86], %375 {strides = array<i32>} : memref<8x8x128xf32, #tpu.memory_space<vmem>>, vector<1x8x128xf32>,
    %c6_i32 = arith.constant 6 : i32
    %376 = arith.index_cast %c6_i32 : i32 to index
    %c0_87 = arith.constant 0 : index
    %c0_88 = arith.constant 0 : index
    %377 = vector.load %arg1[%376, %c0_87, %c0_88] : memref<8x8x1xf32, #tpu.memory_space<vmem>>, vector<1x8x1xf32>
    %378 = vector.shape_cast %377 : vector<1x8x1xf32> to vector<8x1xf32>
    %cst_89 = arith.constant dense<0.000000e+00> : vector<8x512xf32>
    %379 = tpu.matmul %346, %4, %cst_89 {dimension_numbers = #tpu.dot_dimension_numbers<[1], [0], [0], [1], [0, 0, 1, 1], [], []>} : vector<8x128xf32>, vector<128x512xf32>, vector<8x512xf32> -> vector<8x512xf32>
    %380 = arith.addf %379, %8 : vector<8x512xf32>
    %381 = vector.broadcast %378 : vector<8x1xf32> to vector<8x512xf32>
    %382 = vector.broadcast %3 : vector<1x512xf32> to vector<8x512xf32>
    %383 = arith.mulf %381, %382 : vector<8x512xf32>
    %384 = arith.addf %380, %383 : vector<8x512xf32>
    %385 = vector.extract_strided_slice %384 {offsets = [0, 0], sizes = [8, 128], strides = [1, 1]} : vector<8x512xf32> to vector<8x128xf32>
    %386 = arith.negf %385 : vector<8x128xf32>
    %387 = math.exp %386 : vector<8x128xf32>
    %cst_90 = arith.constant 1.000000e+00 : f32
    %388 = vector.broadcast %cst_90 : f32 to vector<8x128xf32>
    %389 = arith.addf %388, %387 : vector<8x128xf32>
    %390 = arith.divf %388, %389 : vector<8x128xf32>
    %391 = vector.extract_strided_slice %384 {offsets = [0, 128], sizes = [8, 128], strides = [1, 1]} : vector<8x512xf32> to vector<8x128xf32>
    %392 = arith.negf %391 : vector<8x128xf32>
    %393 = math.exp %392 : vector<8x128xf32>
    %cst_91 = arith.constant 1.000000e+00 : f32
    %394 = vector.broadcast %cst_91 : f32 to vector<8x128xf32>
    %395 = arith.addf %394, %393 : vector<8x128xf32>
    %396 = arith.divf %394, %395 : vector<8x128xf32>
    %397 = vector.extract_strided_slice %384 {offsets = [0, 256], sizes = [8, 128], strides = [1, 1]} : vector<8x512xf32> to vector<8x128xf32>
    %398 = vector.extract_strided_slice %384 {offsets = [0, 384], sizes = [8, 128], strides = [1, 1]} : vector<8x512xf32> to vector<8x128xf32>
    %399 = arith.mulf %390, %398 : vector<8x128xf32>
    %400 = arith.addf %397, %399 : vector<8x128xf32>
    %401 = math.tanh %400 : vector<8x128xf32>
    %cst_92 = arith.constant 1.000000e+00 : f32
    %402 = vector.broadcast %cst_92 : f32 to vector<8x128xf32>
    %403 = arith.subf %402, %396 : vector<8x128xf32>
    %404 = arith.mulf %403, %401 : vector<8x128xf32>
    %405 = arith.mulf %396, %346 : vector<8x128xf32>
    %406 = arith.addf %404, %405 : vector<8x128xf32>
    %407 = tpu.concatenate %406, %371 in 1 : vector<8x128xf32>, vector<8x128xf32> -> vector<8x256xf32>
    %cst_93 = arith.constant dense<0.000000e+00> : vector<8x512xf32>
    %408 = tpu.matmul %407, %5, %cst_93 {dimension_numbers = #tpu.dot_dimension_numbers<[1], [0], [0], [1], [0, 0, 1, 1], [], []>} : vector<8x256xf32>, vector<256x512xf32>, vector<8x512xf32> -> vector<8x512xf32>
    %409 = arith.addf %408, %11 : vector<8x512xf32>
    %410 = vector.extract_strided_slice %409 {offsets = [0, 0], sizes = [8, 128], strides = [1, 1]} : vector<8x512xf32> to vector<8x128xf32>
    %411 = arith.negf %410 : vector<8x128xf32>
    %412 = math.exp %411 : vector<8x128xf32>
    %cst_94 = arith.constant 1.000000e+00 : f32
    %413 = vector.broadcast %cst_94 : f32 to vector<8x128xf32>
    %414 = arith.addf %413, %412 : vector<8x128xf32>
    %415 = arith.divf %413, %414 : vector<8x128xf32>
    %416 = vector.extract_strided_slice %409 {offsets = [0, 128], sizes = [8, 128], strides = [1, 1]} : vector<8x512xf32> to vector<8x128xf32>
    %417 = arith.negf %416 : vector<8x128xf32>
    %418 = math.exp %417 : vector<8x128xf32>
    %cst_95 = arith.constant 1.000000e+00 : f32
    %419 = vector.broadcast %cst_95 : f32 to vector<8x128xf32>
    %420 = arith.addf %419, %418 : vector<8x128xf32>
    %421 = arith.divf %419, %420 : vector<8x128xf32>
    %422 = vector.extract_strided_slice %409 {offsets = [0, 256], sizes = [8, 128], strides = [1, 1]} : vector<8x512xf32> to vector<8x128xf32>
    %423 = vector.extract_strided_slice %409 {offsets = [0, 384], sizes = [8, 128], strides = [1, 1]} : vector<8x512xf32> to vector<8x128xf32>
    %424 = arith.mulf %415, %423 : vector<8x128xf32>
    %425 = arith.addf %422, %424 : vector<8x128xf32>
    %426 = math.tanh %425 : vector<8x128xf32>
    %cst_96 = arith.constant 1.000000e+00 : f32
    %427 = vector.broadcast %cst_96 : f32 to vector<8x128xf32>
    %428 = arith.subf %427, %421 : vector<8x128xf32>
    %429 = arith.mulf %428, %426 : vector<8x128xf32>
    %430 = arith.mulf %421, %371 : vector<8x128xf32>
    %431 = arith.addf %429, %430 : vector<8x128xf32>
    %432 = arith.index_cast %c6_i32 : i32 to index
    %c0_97 = arith.constant 0 : index
    %c0_98 = arith.constant 0 : index
    %433 = vector.load %arg13[%432, %c0_97, %c0_98] : memref<8x8x128xf32, #tpu.memory_space<vmem>>, vector<1x8x128xf32>
    %434 = vector.shape_cast %433 : vector<1x8x128xf32> to vector<8x128xf32>
    %435 = vector.shape_cast %431 : vector<8x128xf32> to vector<1x8x128xf32>
    tpu.vector_store %arg13[%432, %c0_97, %c0_98], %435 {strides = array<i32>} : memref<8x8x128xf32, #tpu.memory_space<vmem>>, vector<1x8x128xf32>,
    %c7_i32 = arith.constant 7 : i32
    %436 = arith.index_cast %c7_i32 : i32 to index
    %c0_99 = arith.constant 0 : index
    %c0_100 = arith.constant 0 : index
    %437 = vector.load %arg1[%436, %c0_99, %c0_100] : memref<8x8x1xf32, #tpu.memory_space<vmem>>, vector<1x8x1xf32>
    %438 = vector.shape_cast %437 : vector<1x8x1xf32> to vector<8x1xf32>
    %cst_101 = arith.constant dense<0.000000e+00> : vector<8x512xf32>
    %439 = tpu.matmul %406, %4, %cst_101 {dimension_numbers = #tpu.dot_dimension_numbers<[1], [0], [0], [1], [0, 0, 1, 1], [], []>} : vector<8x128xf32>, vector<128x512xf32>, vector<8x512xf32> -> vector<8x512xf32>
    %440 = arith.addf %439, %8 : vector<8x512xf32>
    %441 = vector.broadcast %438 : vector<8x1xf32> to vector<8x512xf32>
    %442 = vector.broadcast %3 : vector<1x512xf32> to vector<8x512xf32>
    %443 = arith.mulf %441, %442 : vector<8x512xf32>
    %444 = arith.addf %440, %443 : vector<8x512xf32>
    %445 = vector.extract_strided_slice %444 {offsets = [0, 0], sizes = [8, 128], strides = [1, 1]} : vector<8x512xf32> to vector<8x128xf32>
    %446 = arith.negf %445 : vector<8x128xf32>
    %447 = math.exp %446 : vector<8x128xf32>
    %cst_102 = arith.constant 1.000000e+00 : f32
    %448 = vector.broadcast %cst_102 : f32 to vector<8x128xf32>
    %449 = arith.addf %448, %447 : vector<8x128xf32>
    %450 = arith.divf %448, %449 : vector<8x128xf32>
    %451 = vector.extract_strided_slice %444 {offsets = [0, 128], sizes = [8, 128], strides = [1, 1]} : vector<8x512xf32> to vector<8x128xf32>
    %452 = arith.negf %451 : vector<8x128xf32>
    %453 = math.exp %452 : vector<8x128xf32>
    %cst_103 = arith.constant 1.000000e+00 : f32
    %454 = vector.broadcast %cst_103 : f32 to vector<8x128xf32>
    %455 = arith.addf %454, %453 : vector<8x128xf32>
    %456 = arith.divf %454, %455 : vector<8x128xf32>
    %457 = vector.extract_strided_slice %444 {offsets = [0, 256], sizes = [8, 128], strides = [1, 1]} : vector<8x512xf32> to vector<8x128xf32>
    %458 = vector.extract_strided_slice %444 {offsets = [0, 384], sizes = [8, 128], strides = [1, 1]} : vector<8x512xf32> to vector<8x128xf32>
    %459 = arith.mulf %450, %458 : vector<8x128xf32>
    %460 = arith.addf %457, %459 : vector<8x128xf32>
    %461 = math.tanh %460 : vector<8x128xf32>
    %cst_104 = arith.constant 1.000000e+00 : f32
    %462 = vector.broadcast %cst_104 : f32 to vector<8x128xf32>
    %463 = arith.subf %462, %456 : vector<8x128xf32>
    %464 = arith.mulf %463, %461 : vector<8x128xf32>
    %465 = arith.mulf %456, %406 : vector<8x128xf32>
    %466 = arith.addf %464, %465 : vector<8x128xf32>
    %467 = tpu.concatenate %466, %431 in 1 : vector<8x128xf32>, vector<8x128xf32> -> vector<8x256xf32>
    %cst_105 = arith.constant dense<0.000000e+00> : vector<8x512xf32>
    %468 = tpu.matmul %467, %5, %cst_105 {dimension_numbers = #tpu.dot_dimension_numbers<[1], [0], [0], [1], [0, 0, 1, 1], [], []>} : vector<8x256xf32>, vector<256x512xf32>, vector<8x512xf32> -> vector<8x512xf32>
    %469 = arith.addf %468, %11 : vector<8x512xf32>
    %470 = vector.extract_strided_slice %469 {offsets = [0, 0], sizes = [8, 128], strides = [1, 1]} : vector<8x512xf32> to vector<8x128xf32>
    %471 = arith.negf %470 : vector<8x128xf32>
    %472 = math.exp %471 : vector<8x128xf32>
    %cst_106 = arith.constant 1.000000e+00 : f32
    %473 = vector.broadcast %cst_106 : f32 to vector<8x128xf32>
    %474 = arith.addf %473, %472 : vector<8x128xf32>
    %475 = arith.divf %473, %474 : vector<8x128xf32>
    %476 = vector.extract_strided_slice %469 {offsets = [0, 128], sizes = [8, 128], strides = [1, 1]} : vector<8x512xf32> to vector<8x128xf32>
    %477 = arith.negf %476 : vector<8x128xf32>
    %478 = math.exp %477 : vector<8x128xf32>
    %cst_107 = arith.constant 1.000000e+00 : f32
    %479 = vector.broadcast %cst_107 : f32 to vector<8x128xf32>
    %480 = arith.addf %479, %478 : vector<8x128xf32>
    %481 = arith.divf %479, %480 : vector<8x128xf32>
    %482 = vector.extract_strided_slice %469 {offsets = [0, 256], sizes = [8, 128], strides = [1, 1]} : vector<8x512xf32> to vector<8x128xf32>
    %483 = vector.extract_strided_slice %469 {offsets = [0, 384], sizes = [8, 128], strides = [1, 1]} : vector<8x512xf32> to vector<8x128xf32>
    %484 = arith.mulf %475, %483 : vector<8x128xf32>
    %485 = arith.addf %482, %484 : vector<8x128xf32>
    %486 = math.tanh %485 : vector<8x128xf32>
    %cst_108 = arith.constant 1.000000e+00 : f32
    %487 = vector.broadcast %cst_108 : f32 to vector<8x128xf32>
    %488 = arith.subf %487, %481 : vector<8x128xf32>
    %489 = arith.mulf %488, %486 : vector<8x128xf32>
    %490 = arith.mulf %481, %431 : vector<8x128xf32>
    %491 = arith.addf %489, %490 : vector<8x128xf32>
    %492 = arith.index_cast %c7_i32 : i32 to index
    %c0_109 = arith.constant 0 : index
    %c0_110 = arith.constant 0 : index
    %493 = vector.load %arg13[%492, %c0_109, %c0_110] : memref<8x8x128xf32, #tpu.memory_space<vmem>>, vector<1x8x128xf32>
    %494 = vector.shape_cast %493 : vector<1x8x128xf32> to vector<8x128xf32>
    %495 = vector.shape_cast %491 : vector<8x128xf32> to vector<1x8x128xf32>
    tpu.vector_store %arg13[%492, %c0_109, %c0_110], %495 {strides = array<i32>} : memref<8x8x128xf32, #tpu.memory_space<vmem>>, vector<1x8x128xf32>,
    %c8_i32 = arith.constant 8 : i32
    %c0_111 = arith.constant 0 : index
    %c0_112 = arith.constant 0 : index
    %c0_113 = arith.constant 0 : index
    %496 = vector.load %arg12[%c0_111, %c0_112, %c0_113] : memref<2x8x128xf32, #tpu.memory_space<vmem>>, vector<1x8x128xf32>
    %497 = vector.shape_cast %496 : vector<1x8x128xf32> to vector<8x128xf32>
    %498 = vector.shape_cast %466 : vector<8x128xf32> to vector<1x8x128xf32>
    tpu.vector_store %arg12[%c0_111, %c0_112, %c0_113], %498 {strides = array<i32>} : memref<2x8x128xf32, #tpu.memory_space<vmem>>, vector<1x8x128xf32>,
    %c1_114 = arith.constant 1 : index
    %c0_115 = arith.constant 0 : index
    %c0_116 = arith.constant 0 : index
    %499 = vector.load %arg12[%c1_114, %c0_115, %c0_116] : memref<2x8x128xf32, #tpu.memory_space<vmem>>, vector<1x8x128xf32>
    %500 = vector.shape_cast %499 : vector<1x8x128xf32> to vector<8x128xf32>
    %501 = vector.shape_cast %491 : vector<8x128xf32> to vector<1x8x128xf32>
    tpu.vector_store %arg12[%c1_114, %c0_115, %c0_116], %501 {strides = array<i32>} : memref<2x8x128xf32, #tpu.memory_space<vmem>>, vector<1x8x128xf32>,
    %c0_117 = arith.constant 0 : index
    %c0_118 = arith.constant 0 : index
    %c0_119 = arith.constant 0 : index
    %502 = vector.load %arg13[%c0_117, %c0_118, %c0_119] : memref<8x8x128xf32, #tpu.memory_space<vmem>>, vector<8x8x128xf32>
    %503 = vector.shape_cast %502 : vector<8x8x128xf32> to vector<64x128xf32>
    %c0_120 = arith.constant 0 : index
    %c0_121 = arith.constant 0 : index
    %504 = vector.load %arg8[%c0_120, %c0_121] : memref<128x1xf32, #tpu.memory_space<vmem>>, vector<128x1xf32>
    %cst_122 = arith.constant dense<0.000000e+00> : vector<64x1xf32>
    %505 = tpu.matmul %503, %504, %cst_122 {dimension_numbers = #tpu.dot_dimension_numbers<[1], [0], [0], [1], [0, 0, 1, 1], [], []>} : vector<64x128xf32>, vector<128x1xf32>, vector<64x1xf32> -> vector<64x1xf32>
    %c0_123 = arith.constant 0 : index
    %c0_124 = arith.constant 0 : index
    %506 = vector.load %arg9[%c0_123, %c0_124] : memref<1x1xf32, #tpu.memory_space<vmem>>, vector<1x1xf32>
    %507 = vector.broadcast %506 : vector<1x1xf32> to vector<64x1xf32>
    %508 = arith.addf %505, %507 : vector<64x1xf32>
    %c0_125 = arith.constant 0 : index
    %c0_126 = arith.constant 0 : index
    %509 = vector.load %arg10[%c0_125, %c0_126] : memref<64x1xf32, #tpu.memory_space<vmem>>, vector<64x1xf32>
    tpu.vector_store %arg10[%c0_125, %c0_126], %508 {strides = array<i32>} : memref<64x1xf32, #tpu.memory_space<vmem>>, vector<64x1xf32>,
    %c0_i32_127 = arith.constant 0 : i32
    %510 = arith.cmpi eq, %arg0, %c0_i32_127 : i32
    %511 = arith.extui %510 : i1 to i32
    %c0_i32_128 = arith.constant 0 : i32
    %512 = arith.cmpi ne, %511, %c0_i32_128 : i32
    scf.if %512 {
      %c0_129 = arith.constant 0 : index
      %c0_130 = arith.constant 0 : index
      %c0_131 = arith.constant 0 : index
      %513 = vector.load %arg12[%c0_129, %c0_130, %c0_131] : memref<2x8x128xf32, #tpu.memory_space<vmem>>, vector<2x8x128xf32>
      %c0_132 = arith.constant 0 : index
      %c0_133 = arith.constant 0 : index
      %c0_134 = arith.constant 0 : index
      %514 = vector.load %arg11[%c0_132, %c0_133, %c0_134] : memref<2x8x128xf32, #tpu.memory_space<vmem>>, vector<2x8x128xf32>
      tpu.vector_store %arg11[%c0_132, %c0_133, %c0_134], %513 {strides = array<i32>} : memref<2x8x128xf32, #tpu.memory_space<vmem>>, vector<2x8x128xf32>,
    } else {
    }
    return
  }
  func.func @transform_0(%arg0: i32) -> (i32, i32, i32) {
    %c0_i32 = arith.constant 0 : i32
    %c0_i32_0 = arith.constant 0 : i32
    %c0_i32_1 = arith.constant 0 : i32
    return %arg0, %c0_i32, %c0_i32_0 : i32, i32, i32
  }
  func.func @transform_1(%arg0: i32) -> (i32, i32, i32) {
    %c0_i32 = arith.constant 0 : i32
    %c0_i32_0 = arith.constant 0 : i32
    %c0_i32_1 = arith.constant 0 : i32
    %c0_i32_2 = arith.constant 0 : i32
    return %c0_i32, %c0_i32_0, %c0_i32_1 : i32, i32, i32
  }
  func.func @transform_2(%arg0: i32) -> (i32, i32) {
    %c0_i32 = arith.constant 0 : i32
    %c0_i32_0 = arith.constant 0 : i32
    %c0_i32_1 = arith.constant 0 : i32
    return %c0_i32, %c0_i32_0 : i32, i32
  }
  func.func @transform_3(%arg0: i32) -> (i32, i32) {
    %c0_i32 = arith.constant 0 : i32
    %c0_i32_0 = arith.constant 0 : i32
    %c0_i32_1 = arith.constant 0 : i32
    return %c0_i32, %c0_i32_0 : i32, i32
  }
  func.func @transform_4(%arg0: i32) -> (i32, i32) {
    %c0_i32 = arith.constant 0 : i32
    %c0_i32_0 = arith.constant 0 : i32
    %c0_i32_1 = arith.constant 0 : i32
    return %c0_i32, %c0_i32_0 : i32, i32
  }
  func.func @transform_5(%arg0: i32) -> (i32, i32) {
    %c0_i32 = arith.constant 0 : i32
    %c0_i32_0 = arith.constant 0 : i32
    %c0_i32_1 = arith.constant 0 : i32
    return %c0_i32, %c0_i32_0 : i32, i32
  }
  func.func @transform_6(%arg0: i32) -> (i32, i32) {
    %c0_i32 = arith.constant 0 : i32
    %c0_i32_0 = arith.constant 0 : i32
    %c0_i32_1 = arith.constant 0 : i32
    return %c0_i32, %c0_i32_0 : i32, i32
  }
  func.func @transform_7(%arg0: i32) -> (i32, i32) {
    %c0_i32 = arith.constant 0 : i32
    %c0_i32_0 = arith.constant 0 : i32
    %c0_i32_1 = arith.constant 0 : i32
    return %c0_i32, %c0_i32_0 : i32, i32
  }
  func.func @transform_8(%arg0: i32) -> (i32, i32) {
    %c0_i32 = arith.constant 0 : i32
    %c0_i32_0 = arith.constant 0 : i32
    %c0_i32_1 = arith.constant 0 : i32
    return %c0_i32, %c0_i32_0 : i32, i32
  }
  func.func @transform_9(%arg0: i32) -> (i32, i32) {
    %c0_i32 = arith.constant 0 : i32
    %c0_i32_0 = arith.constant 0 : i32
    return %arg0, %c0_i32 : i32, i32
  }
  func.func @transform_10(%arg0: i32) -> (i32, i32, i32) {
    %c0_i32 = arith.constant 0 : i32
    %c0_i32_0 = arith.constant 0 : i32
    %c0_i32_1 = arith.constant 0 : i32
    %c0_i32_2 = arith.constant 0 : i32
    return %c0_i32, %c0_i32_0, %c0_i32_1 : i32, i32, i32
  }
}

</mosaic_0001>

<bundles_post_ra>
// kernel: tpu_custom_call.1
= control target key start
LH: loop header
LB: loop body
LE: loop exit
PB: predicated region body
PF: predicated region fallthrough
CT: control target
= control target key end

     0   :  { %s6582_s0 = inlined_call_operand.vmem [shape: f32[8,8,1], index: 0, kind: input, shape index: {}]   ;;  %s6583_s1 = inlined_call_operand.vmem [shape: f32[2,8,128], index: 1, kind: input, shape index: {}]   ;;  %s6584_s2 = inlined_call_operand.vmem [shape: f32[1,512], index: 2, kind: input, shape index: {}]   ;;  %s6585_s3 = inlined_call_operand.hbm [shape: f32[128,512], index: 3, kind: input, shape index: {}]   ;;  %s6586_s4 = inlined_call_operand.vmem [shape: f32[1,512], index: 4, kind: input, shape index: {}]   ;;  %s6587_s5 = inlined_call_operand.hbm [shape: f32[256,512], index: 5, kind: input, shape index: {}]   ;;  %s6588_s6 = inlined_call_operand.vmem [shape: f32[1,512], index: 6, kind: input, shape index: {}]   ;;  %s6589_s7 = inlined_call_operand.vmem [shape: f32[128,1], index: 7, kind: input, shape index: {}]   ;;  %s6590_s8 = inlined_call_operand.<no memory space> [shape: f32[1,1], index: 8, kind: input, shape index: {}]   ;;  %s6591_s9 = inlined_call_operand.vmem [shape: f32[64,1], index: 9, kind: output, shape index: {0}]   ;;  %s6592_s10 = inlined_call_operand.hbm [shape: f32[2,8,128], index: 10, kind: output, shape index: {1}]  }
   0x1   :  { %v16_v0 = vstv %s6590_s8 }
   0x2   :  { %17 = vst [vmem:[#allocation4] sm:$0x1] %v16_v0 }
   0x3   :  { %18 = vsyncpa [#allocation6], 0 }
   0x4   :  { %19 = vsyncpa [#allocation9], 0 }
   0x5   :  { %20 = vsyncpa [#allocation7], 0  ;;  %s5139_s15 = smov [#allocation5]   ;;  %s5067_s19 = scalar_lea.hbm %s6585_s3, 8192 }
   0x6   :  { %s32_s16 = sshll.u32 %s5139_s15, 4  ;;  %p5068_p0 = scmp.ne.s32.totalorder %s6585_s3, %s5067_s19  ;;  %s33_s16 = int_to_ptr.vmem [resolvable:$true] %s32_s16 }
   0x7   :  { %p5071_p1 = scmp.lt.u32.totalorder %s5067_s19, %s6585_s3 }
   0x9   :  { %p5073_p2 = pnand %p5071_p1, %p5068_p0 }
   0xb   :  { %5076 = shalt.err (!%p5073_p2)
}
   0xc   :  { %s5077_s8 = scalar_lea.vmem %s33_s16, 8192  ;;  %p5082_p4 = scmp.lt.s32.totalorder %s33_s16, %s33_s16 }
   0xd   :  { %p5078_p3 = scmp.ne.s32.totalorder %s33_s16, %s5077_s8  ;;  %p5083_p5 = scmp.lt.s32.totalorder %s5077_s8, %s5077_s8 }
   0xf   :  { %p5084_p6 = por %p5083_p5, %p5082_p4 }
  0x11   :  { %p5085_p7 = pnand %p5084_p6, %p5078_p3 }
  0x13   :  { %5088 = shalt.err (!%p5085_p7)
}
  0x14   :  { %s5140_s24 = smov 512   ;;  %s5141_s25 = smov 32  }
  0x15   :  { %38 = dma.hbm_to_vmem [thread:$0]  %s6585_s3, 8192, %s33_s16, [#allocation6], %s5140_s24, %s5140_s24, %s5141_s25  }
  0x16   :  { %s5142_s28 = smov [#allocation8]   ;;  %s5089_s12 = scalar_lea.hbm %s6587_s5, 16384 }
  0x17   :  { %s46_s29 = sshll.u32 %s5142_s28, 4  ;;  %p5090_p8 = scmp.ne.s32.totalorder %s6587_s5, %s5089_s12  ;;  %s47_s29 = int_to_ptr.vmem [resolvable:$true] %s46_s29 }
  0x18   :  { %p5093_p9 = scmp.lt.u32.totalorder %s5089_s12, %s6587_s5 }
  0x1a   :  { %p5095_p10 = pnand %p5093_p9, %p5090_p8 }
  0x1c   :  { %5098 = shalt.err (!%p5095_p10)
}
  0x1d   :  { %s5099_s18 = scalar_lea.vmem %s47_s29, 16384  ;;  %p5104_p12 = scmp.lt.s32.totalorder %s47_s29, %s47_s29 }
  0x1e   :  { %p5100_p11 = scmp.ne.s32.totalorder %s47_s29, %s5099_s18  ;;  %p5105_p13 = scmp.lt.s32.totalorder %s5099_s18, %s5099_s18 }
  0x20   :  { %p5106_p0 = por %p5105_p13, %p5104_p12 }
  0x22   :  { %p5107_p1 = pnand %p5106_p0, %p5100_p11 }
  0x24   :  { %5110 = shalt.err (!%p5107_p1)
}
  0x25   :  { %52 = dma.hbm_to_vmem [thread:$0]  %s6587_s5, 16384, %s47_s29, [#allocation9], %s5140_s24, %s5140_s24, %s5141_s25  }
  0x26   :  { %5133 = dma.done.wait [#allocation6], 8192  }
  0x27   :  { %5134 = vsyncadd [#allocation6], 4294959104 }
  0x28   :  { %5135 = dma.done.wait [#allocation9], 16384  }
  0x29   :  { %5136 = vsyncadd [#allocation9], 4294950912  ;;  %v6593_v1 = vmov 0.0   ;;  %v5144_v2 = vmov 0   ;;  %v75_v3 = vld [vmem:[#allocation5 + $0x8] sm:$0xff]  ;;  %v74_v5 = vld [vmem:[#allocation5] sm:$0xff] }
  0x2a   :  { %378 = vmatprep.mubr.f32.mxu1 %v6593_v1  ;;  %4905 = vset.pattern.permute.xlu0 %v5144_v2  ;;  %v79_v4 = vld [vmem:[#allocation5 + $0x28] sm:$0xff]  ;;  %v78_v7 = vld [vmem:[#allocation5 + $0x20] sm:$0xff]  ;;  %v77_v59 = vld [vmem:[#allocation5 + $0x18] sm:$0xff]  ;;  %vm3182_vm0 = vcmask 7168   ;;  %s5145_s29 = smov [#allocation10]  }
  0x2b   :  { %4906 = vset.pattern.permute.xlu1 %v5144_v2  ;;  %v5231_v6 = vpack.c.bf16 %v79_v4, %v75_v3  ;;  %v83_v8 = vld [vmem:[#allocation5 + $0x48] sm:$0xff]  ;;  %v5233_v10 = vpack.c.bf16 %v78_v7, %v74_v5  ;;  %v82_v12 = vld [vmem:[#allocation5 + $0x40] sm:$0xff]  ;;  %v81_v60 = vld [vmem:[#allocation5 + $0x38] sm:$0xff]  ;;  %s3205_s30 = sshll.u32 %s5145_s29, 4  ;;  %s3206_s30 = int_to_ptr.vmem [resolvable:$true] %s3205_s30 }
  0x2c   :  { %v87_v9 = vld [vmem:[#allocation5 + $0x68] sm:$0xff]  ;;  %v86_v13 = vld [vmem:[#allocation5 + $0x60] sm:$0xff]  ;;  %v5297_v5 = vpack.c.bf16 %v81_v60, %v77_v59  ;;  %v76_v7 = vld [vmem:[#allocation5 + $0x10] sm:$0xff]  ;;  %s5111_s11 = scalar_lea.vmem %s3206_s30, 256  ;;  %p5116_p3 = scmp.lt.s32.totalorder %s3206_s30, %s3206_s30 }
  0x2d   :  { %6753 = vst [vmem:[#allocation14_spill] sm:$0xff] %v5231_v6  ;;  %v5235_v11 = vpack.c.bf16 %v87_v9, %v83_v8  ;;  %v91_v14 = vld [vmem:[#allocation5 + $0x88] sm:$0xff]  ;;  %3329 = vmatprep.subr.bf16.mxu1 %v5231_v6  ;;  %v5239_v16 = vpack.c.bf16 %v86_v13, %v82_v12  ;;  %v90_v18 = vld [vmem:[#allocation5 + $0x80] sm:$0xff]  ;;  %v80_v8 = vld [vmem:[#allocation5 + $0x30] sm:$0xff]  ;;  %p5112_p2 = scmp.ne.s32.totalorder %s3206_s30, %s5111_s11  ;;  %p5117_p4 = scmp.lt.s32.totalorder %s5111_s11, %s5111_s11 }
  0x2e   :  { %v95_v15 = vld [vmem:[#allocation5 + $0xa8] sm:$0xff]  ;;  %3331 = vmatpush1.bf16.msra.mxu1 %v5233_v10  ;;  %v94_v19 = vld [vmem:[#allocation5 + $0xa0] sm:$0xff]  ;;  %6756 = vst [vmem:[#allocation17_spill] sm:$0xff] %v5297_v5  ;;  %v85_v9 = vld [vmem:[#allocation5 + $0x58] sm:$0xff] }
  0x2f   :  { %3333 = vmatprep.subr.bf16.mxu1 %v5235_v11  ;;  %v5242_v17 = vpack.c.bf16 %v95_v15, %v91_v14  ;;  %v99_v20 = vld [vmem:[#allocation5 + $0xc8] sm:$0xff]  ;;  %v5245_v22 = vpack.c.bf16 %v94_v19, %v90_v18  ;;  %v98_v24 = vld [vmem:[#allocation5 + $0xc0] sm:$0xff]  ;;  %v89_v12 = vld [vmem:[#allocation5 + $0x78] sm:$0xff]  ;;  %v5310_v15 = vpack.c.bf16 %v80_v8, %v76_v7  ;;  %p5118_p5 = por %p5117_p4, %p5116_p3 }
  0x30   :  { %v103_v21 = vld [vmem:[#allocation5 + $0xe8] sm:$0xff]  ;;  %v102_v25 = vld [vmem:[#allocation5 + $0xe0] sm:$0xff]  ;;  %v5313_v18 = vpack.c.bf16 %v89_v12, %v85_v9  ;;  %v84_v19 = vld [vmem:[#allocation5 + $0x50] sm:$0xff] }
  0x31   :  { %v5248_v23 = vpack.c.bf16 %v103_v21, %v99_v20  ;;  %v107_v26 = vld [vmem:[#allocation5 + $0x108] sm:$0xff]  ;;  %v5251_v28 = vpack.c.bf16 %v102_v25, %v98_v24  ;;  %v106_v30 = vld [vmem:[#allocation5 + $0x100] sm:$0xff]  ;;  %v88_v20 = vld [vmem:[#allocation5 + $0x70] sm:$0xff]  ;;  %p5119_p6 = pnand %p5118_p5, %p5112_p2 }
  0x32   :  { %3335 = vmatpush1.bf16.msra.mxu1 %v5239_v16  ;;  %v111_v27 = vld [vmem:[#allocation5 + $0x128] sm:$0xff]  ;;  %v110_v31 = vld [vmem:[#allocation5 + $0x120] sm:$0xff]  ;;  %v93_v21 = vld [vmem:[#allocation5 + $0x98] sm:$0xff]  ;;  %v5317_v25 = vpack.c.bf16 %v88_v20, %v84_v19 }
  0x33   :  { %3337 = vmatprep.subr.bf16.mxu1 %v5242_v17  ;;  %v5254_v29 = vpack.c.bf16 %v111_v27, %v107_v26  ;;  %v115_v32 = vld [vmem:[#allocation5 + $0x148] sm:$0xff]  ;;  %v5257_v34 = vpack.c.bf16 %v110_v31, %v106_v30  ;;  %v114_v36 = vld [vmem:[#allocation5 + $0x140] sm:$0xff]  ;;  %v97_v24 = vld [vmem:[#allocation5 + $0xb8] sm:$0xff] }
  0x34   :  { %v119_v33 = vld [vmem:[#allocation5 + $0x168] sm:$0xff]  ;;  %v118_v37 = vld [vmem:[#allocation5 + $0x160] sm:$0xff]  ;;  %v5321_v26 = vpack.c.bf16 %v97_v24, %v93_v21  ;;  %v92_v27 = vld [vmem:[#allocation5 + $0x90] sm:$0xff] }
  0x35   :  { %v5260_v35 = vpack.c.bf16 %v119_v33, %v115_v32  ;;  %v123_v38 = vld [vmem:[#allocation5 + $0x188] sm:$0xff]  ;;  %v5263_v40 = vpack.c.bf16 %v118_v37, %v114_v36  ;;  %v122_v42 = vld [vmem:[#allocation5 + $0x180] sm:$0xff]  ;;  %v96_v30 = vld [vmem:[#allocation5 + $0xb0] sm:$0xff] }
  0x36   :  { %3339 = vmatpush1.bf16.msra.mxu1 %v5245_v22  ;;  %v127_v39 = vld [vmem:[#allocation5 + $0x1a8] sm:$0xff]  ;;  %v126_v43 = vld [vmem:[#allocation5 + $0x1a0] sm:$0xff]  ;;  %v101_v31 = vld [vmem:[#allocation5 + $0xd8] sm:$0xff]  ;;  %v5324_v33 = vpack.c.bf16 %v96_v30, %v92_v27 }
  0x37   :  { %3341 = vmatprep.subr.bf16.mxu1 %v5248_v23  ;;  %v5266_v41 = vpack.c.bf16 %v127_v39, %v123_v38  ;;  %v313_v44 = vld [vmem:[%s6582_s0] sm:$0xff]  ;;  %v131_v45 = vld [vmem:[#allocation5 + $0x1c8] sm:$0xff]  ;;  %v5275_v50 = vpack.c.bf16 %v126_v43, %v122_v42  ;;  %v100_v37 = vld [vmem:[#allocation5 + $0xd0] sm:$0xff] }
  0x38   :  { %v135_v46 = vld [vmem:[#allocation5 + $0x1e8] sm:$0xff]  ;;  %458 = vperm.xlu0 %4905, %v313_v44   ;;  %v138_v52 = vld [vmem:[#allocation8] sm:$0xff]  ;;  %v105_v32 = vld [vmem:[#allocation5 + $0xf8] sm:$0xff] }
  0x39   :  { %v3224_v47 = vld [vmem:[%s6582_s0 + $0x8] sm:$0xff]  ;;  %v5280_v54 = vpack.c.bf16 %v135_v46, %v131_v45  ;;  %v3239_v62 = vld [vmem:[%s6582_s0 + $0x20] sm:$0xff]  ;;  %v3249_v13 = vld [vmem:[%s6582_s0 + $0x30] sm:$0xff]  ;;  %v5327_v36 = vpack.c.bf16 %v105_v32, %v101_v31 }
  0x3a   :  { %3343 = vmatpush1.bf16.msra.mxu1 %v5251_v28  ;;  %v139_v48 = vld [vmem:[#allocation8 + $0x8] sm:$0xff]  ;;  %v142_v53 = vld [vmem:[#allocation8 + $0x20] sm:$0xff]  ;;  %v104_v38 = vld [vmem:[#allocation5 + $0xf0] sm:$0xff] }
  0x3b   :  { %3345 = vmatprep.subr.bf16.mxu1 %v5254_v29  ;;  %v143_v49 = vld [vmem:[#allocation8 + $0x28] sm:$0xff]  ;;  %v130_v55 = vld [vmem:[#allocation5 + $0x1c0] sm:$0xff]  ;;  %v5282_v57 = vpack.c.bf16 %v142_v53, %v138_v52  ;;  %v109_v39 = vld [vmem:[#allocation5 + $0x118] sm:$0xff]  ;;  %v5330_v43 = vpack.c.bf16 %v104_v38, %v100_v37 }
  0x3c   :  { %v5277_v51 = vpack.c.bf16 %v143_v49, %v139_v48  ;;  %v134_v56 = vld [vmem:[#allocation5 + $0x1e0] sm:$0xff]  ;;  %v147_v58 = vld [vmem:[#allocation8 + $0x48] sm:$0xff]  ;;  %817 = vperm.xlu0 %4905, %v3224_v47   ;;  %v113_v42 = vld [vmem:[#allocation5 + $0x138] sm:$0xff] }
  0x3d   :  { %v151_v61 = vld [vmem:[#allocation8 + $0x68] sm:$0xff]  ;;  %v146_v0 = vld [vmem:[#allocation8 + $0x40] sm:$0xff]  ;;  %v5292_v3 = vpack.c.bf16 %v134_v56, %v130_v55  ;;  %v5333_v44 = vpack.c.bf16 %v113_v42, %v109_v39  ;;  %v108_v45 = vld [vmem:[#allocation5 + $0x110] sm:$0xff] }
  0x3e   :  { %3347 = vmatpush1.bf16.msra.mxu1 %v5257_v34  ;;  %3393 = vmatprep.subr.bf16.mxu0 %v5277_v51  ;;  %v5289_v63 = vpack.c.bf16 %v151_v61, %v147_v58  ;;  %v150_v2 = vld [vmem:[#allocation8 + $0x60] sm:$0xff]  ;;  %v112_v46 = vld [vmem:[#allocation5 + $0x130] sm:$0xff]  ;;  %v117_v47 = vld [vmem:[#allocation5 + $0x158] sm:$0xff] }
  0x3f   :  { %3349 = vmatprep.subr.bf16.mxu1 %v5260_v35  ;;  %3395 = vmatpush1.bf16.msra.mxu0 %v5282_v57  ;;  %v5294_v4 = vpack.c.bf16 %v150_v2, %v146_v0  ;;  %v5308_v14 = vld [vmem:[%s6583_s1] sm:$0xff]  ;;  %v5336_v49 = vpack.c.bf16 %v112_v46, %v108_v45  ;;  %v116_v53 = vld [vmem:[#allocation5 + $0x150] sm:$0xff]  ;;  %v155_v45 = vld [vmem:[#allocation8 + $0x88] sm:$0xff] }
  0x40   :  { %6754 = vst [vmem:[#allocation15_spill] sm:$0xff] %v5289_v63  ;;  %3397 = vmatprep.subr.bf16.mxu0 %v5289_v63  ;;  %1834 = vperm.xlu0 %4905, %v3239_v62   ;;  %v121_v48 = vld [vmem:[#allocation5 + $0x178] sm:$0xff]  ;;  %v120_v55 = vld [vmem:[#allocation5 + $0x170] sm:$0xff]  ;;  %v159_v46 = vld [vmem:[#allocation8 + $0xa8] sm:$0xff] }
  0x41   :  { %6755 = vst [vmem:[#allocation16_spill] sm:$0xff] %v5294_v4  ;;  %v5339_v52 = vpack.c.bf16 %v121_v48, %v117_v47  ;;  %v125_v56 = vld [vmem:[#allocation5 + $0x198] sm:$0xff]  ;;  %v5342_v59 = vpack.c.bf16 %v120_v55, %v116_v53  ;;  %v124_v61 = vld [vmem:[#allocation5 + $0x190] sm:$0xff]  ;;  %v5371_v48 = vpack.c.bf16 %v159_v46, %v155_v45  ;;  %v154_v55 = vld [vmem:[#allocation8 + $0x80] sm:$0xff] }
  0x42   :  { %3351 = vmatpush1.bf16.msra.mxu1 %v5263_v40  ;;  %v129_v58 = vld [vmem:[#allocation5 + $0x1b8] sm:$0xff]  ;;  %v128_v62 = vld [vmem:[#allocation5 + $0x1b0] sm:$0xff] }
  0x43   :  { %3353 = vmatprep.subr.bf16.mxu1 %v5266_v41  ;;  %3399 = vmatpush1.bf16.msra.mxu0 %v5294_v4  ;;  %v5345_v60 = vpack.c.bf16 %v129_v58, %v125_v56  ;;  %v133_v0 = vld [vmem:[#allocation5 + $0x1d8] sm:$0xff]  ;;  %v5348_v7 = vpack.c.bf16 %v128_v62, %v124_v61  ;;  %v132_v9 = vld [vmem:[#allocation5 + $0x1d0] sm:$0xff]  ;;  %6759 = vst [vmem:[#allocation20_spill] sm:$0xff] %v5371_v48  ;;  %v158_v56 = vld [vmem:[#allocation8 + $0xa0] sm:$0xff] }
  0x44   :  { %2512 = vperm.xlu0 %4905, %v3249_v13   ;;  %v137_v2 = vld [vmem:[#allocation5 + $0x1f8] sm:$0xff]  ;;  %v136_v12 = vld [vmem:[#allocation5 + $0x1f0] sm:$0xff]  ;;  %v5375_v61 = vpack.c.bf16 %v158_v56, %v154_v55  ;;  %3401 = vmatprep.subr.bf16.mxu0 %v5371_v48 }
  0x45   :  { %v5351_v8 = vpack.c.bf16 %v137_v2, %v133_v0  ;;  %v141_v13 = vld [vmem:[#allocation8 + $0x18] sm:$0xff]  ;;  %v5354_v20 = vpack.c.bf16 %v136_v12, %v132_v9  ;;  %v140_v24 = vld [vmem:[#allocation8 + $0x10] sm:$0xff]  ;;  %v163_v9 = vld [vmem:[#allocation8 + $0xc8] sm:$0xff] }
  0x46   :  { %3355 = vmatpush1.bf16.msra.mxu1 %v5275_v50  ;;  %v145_v19 = vld [vmem:[#allocation8 + $0x38] sm:$0xff]  ;;  %v144_v27 = vld [vmem:[#allocation8 + $0x30] sm:$0xff]  ;;  %6761 = vst [vmem:[#allocation22_spill] sm:$0xff] %v5375_v61  ;;  %v167_v12 = vld [vmem:[#allocation8 + $0xe8] sm:$0xff] }
  0x47   :  { %3357 = vmatprep.subr.bf16.mxu1 %v5280_v54  ;;  %v5357_v21 = vpack.c.bf16 %v145_v19, %v141_v13  ;;  %v149_v30 = vld [vmem:[#allocation8 + $0x58] sm:$0xff]  ;;  %v5360_v32 = vpack.c.bf16 %v144_v27, %v140_v24  ;;  %v148_v38 = vld [vmem:[#allocation8 + $0x50] sm:$0xff]  ;;  %3403 = vmatpush1.bf16.msra.mxu0 %v5375_v61  ;;  %v5383_v19 = vpack.c.bf16 %v167_v12, %v163_v9  ;;  %v162_v27 = vld [vmem:[#allocation8 + $0xc0] sm:$0xff] }
  0x48   :  { %v153_v31 = vld [vmem:[#allocation8 + $0x78] sm:$0xff]  ;;  %v152_v39 = vld [vmem:[#allocation8 + $0x70] sm:$0xff]  ;;  %v174_v9 = vld [vmem:[#allocation8 + $0x120] sm:$0xff] }
  0x49   :  { %v5363_v37 = vpack.c.bf16 %v153_v31, %v149_v30  ;;  %v5367_v42 = vpack.c.bf16 %v152_v39, %v148_v38  ;;  %v157_v47 = vld [vmem:[#allocation8 + $0x98] sm:$0xff]  ;;  %v156_v62 = vld [vmem:[#allocation8 + $0x90] sm:$0xff]  ;;  %6763 = vst [vmem:[#allocation24_spill] sm:$0xff] %v5383_v19  ;;  %v166_v30 = vld [vmem:[#allocation8 + $0xe0] sm:$0xff]  ;;  %3405 = vmatprep.subr.bf16.mxu0 %v5383_v19 }
  0x4a   :  { %3359 = vmatpush1.bf16.msra.mxu1 %v5292_v3  ;;  %v161_v53 = vld [vmem:[#allocation8 + $0xb8] sm:$0xff]  ;;  %v160_v0 = vld [vmem:[#allocation8 + $0xb0] sm:$0xff]  ;;  %v5387_v38 = vpack.c.bf16 %v166_v30, %v162_v27 }
  0x4b   :  { %3361 = vmatprep.subr.bf16.mxu1 %v5297_v5  ;;  %6757 = vst [vmem:[#allocation18_spill] sm:$0xff] %v5363_v37  ;;  %6758 = vst [vmem:[#allocation19_spill] sm:$0xff] %v5367_v42  ;;  %v5373_v58 = vpack.c.bf16 %v161_v53, %v157_v47  ;;  %v5378_v2 = vpack.c.bf16 %v160_v0, %v156_v62  ;;  %v165_v13 = vld [vmem:[#allocation8 + $0xd8] sm:$0xff]  ;;  %v164_v39 = vld [vmem:[#allocation8 + $0xd0] sm:$0xff] }
  0x4c   :  { %v169_v24 = vld [vmem:[#allocation8 + $0xf8] sm:$0xff]  ;;  %6765 = vst [vmem:[#allocation26_spill] sm:$0xff] %v5387_v38  ;;  %v168_v45 = vld [vmem:[#allocation8 + $0xf0] sm:$0xff]  ;;  %3407 = vmatpush1.bf16.msra.mxu0 %v5387_v38  ;;  %v171_v47 = vld [vmem:[#allocation8 + $0x108] sm:$0xff] }
  0x4d   :  { %379 = vmatmul.mubr.f32.vlgmr.msra.gmra.mrb[0].mxu1 %v5308_v14  ;;  %6760 = vst [vmem:[#allocation21_spill] sm:$0xff] %v5373_v58  ;;  %6762 = vst [vmem:[#allocation23_spill] sm:$0xff] %v5378_v2  ;;  %v5385_v31 = vpack.c.bf16 %v169_v24, %v165_v13  ;;  %v5390_v46 = vpack.c.bf16 %v168_v45, %v164_v39  ;;  %v175_v53 = vld [vmem:[#allocation8 + $0x128] sm:$0xff]  ;;  %v173_v55 = vld [vmem:[#allocation8 + $0x118] sm:$0xff] }
  0x4e   :  { %3363 = vmatpush1.bf16.msra.mxu1 %v5310_v15  ;;  %449 = vmatprep.mubr.f32.mxu1 %v6593_v1  ;;  %v5395_v56 = vpack.c.bf16 %v175_v53, %v171_v47  ;;  %v177_v62 = vld [vmem:[#allocation8 + $0x138] sm:$0xff]  ;;  %v170_v0 = vld [vmem:[#allocation8 + $0x100] sm:$0xff]  ;;  %v172_v24 = vld [vmem:[#allocation8 + $0x110] sm:$0xff] }
  0x4f   :  { %3365 = vmatprep.subr.bf16.mxu1 %v5313_v18  ;;  %6764 = vst [vmem:[#allocation25_spill] sm:$0xff] %v5385_v31  ;;  %6766 = vst [vmem:[#allocation27_spill] sm:$0xff] %v5390_v46  ;;  %v5397_v12 = vpack.c.bf16 %v177_v62, %v173_v55  ;;  %v5399_v13 = vpack.c.bf16 %v174_v9, %v170_v0  ;;  %v176_v27 = vld [vmem:[#allocation8 + $0x130] sm:$0xff]  ;;  %v179_v39 = vld [vmem:[#allocation8 + $0x148] sm:$0xff] }
  0x50   :  { %6767 = vst [vmem:[#allocation28_spill] sm:$0xff] %v5395_v56  ;;  %3409 = vmatprep.subr.bf16.mxu0 %v5395_v56  ;;  %v5402_v30 = vpack.c.bf16 %v176_v27, %v172_v24  ;;  %v183_v45 = vld [vmem:[#allocation8 + $0x168] sm:$0xff]  ;;  %v181_v47 = vld [vmem:[#allocation8 + $0x158] sm:$0xff]  ;;  %v178_v62 = vld [vmem:[#allocation8 + $0x140] sm:$0xff] }
  0x51   :  { %6768 = vst [vmem:[#allocation29_spill] sm:$0xff] %v5397_v12  ;;  %6769 = vst [vmem:[#allocation30_spill] sm:$0xff] %v5399_v13  ;;  %3411 = vmatpush1.bf16.msra.mxu0 %v5399_v13  ;;  %v5407_v53 = vpack.c.bf16 %v183_v45, %v179_v39  ;;  %v185_v55 = vld [vmem:[#allocation8 + $0x178] sm:$0xff]  ;;  %v182_v0 = vld [vmem:[#allocation8 + $0x160] sm:$0xff] }
  0x52   :  { %3367 = vmatpush1.bf16.msra.mxu1 %v5317_v25  ;;  %6770 = vst [vmem:[#allocation31_spill] sm:$0xff] %v5402_v30  ;;  %v5409_v9 = vpack.c.bf16 %v185_v55, %v181_v47  ;;  %v5411_v1 = vpack.c.bf16 %v182_v0, %v178_v62  ;;  %v180_v24 = vld [vmem:[#allocation8 + $0x150] sm:$0xff]  ;;  %v191_v39 = vld [vmem:[#allocation8 + $0x1a8] sm:$0xff]  ;;  %v189_v45 = vld [vmem:[#allocation8 + $0x198] sm:$0xff] }
  0x53   :  { %3369 = vmatprep.subr.bf16.mxu1 %v5321_v26  ;;  %6771 = vst [vmem:[#allocation32_spill] sm:$0xff] %v5407_v53  ;;  %v184_v27 = vld [vmem:[#allocation8 + $0x170] sm:$0xff]  ;;  %3413 = vmatprep.subr.bf16.mxu0 %v5407_v53  ;;  %v193_v47 = vld [vmem:[#allocation8 + $0x1b8] sm:$0xff]  ;;  %v186_v55 = vld [vmem:[#allocation8 + $0x180] sm:$0xff] }
  0x54   :  { %6772 = vst [vmem:[#allocation33_spill] sm:$0xff] %v5409_v9  ;;  %6773 = vst [vmem:[#allocation34_spill] sm:$0xff] %v5411_v1  ;;  %v190_v62 = vld [vmem:[#allocation8 + $0x1a0] sm:$0xff]  ;;  %v5421_v0 = vpack.c.bf16 %v193_v47, %v189_v45  ;;  %v201_v45 = vld [vmem:[#allocation8 + $0x1f8] sm:$0xff] }
  0x55   :  { %3415 = vmatpush1.bf16.msra.mxu0 %v5411_v1  ;;  %v5423_v56 = vpack.c.bf16 %v190_v62, %v186_v55  ;;  %v194_v47 = vld [vmem:[#allocation8 + $0x1c0] sm:$0xff]  ;;  %v217_v38 = vld [vmem:[#allocation8 + $0x278] sm:$0xff] }
  0x56   :  { %3371 = vmatpush1.bf16.msra.mxu1 %v5324_v33  ;;  %6776 = vst [vmem:[#allocation37_spill] sm:$0xff] %v5421_v0  ;;  %v198_v55 = vld [vmem:[#allocation8 + $0x1e0] sm:$0xff] }
  0x57   :  { %3373 = vmatprep.subr.bf16.mxu1 %v5327_v36  ;;  %6777 = vst [vmem:[#allocation38_spill] sm:$0xff] %v5423_v56  ;;  %v5435_v53 = vpack.c.bf16 %v198_v55, %v194_v47  ;;  %v206_v47 = vld [vmem:[#allocation8 + $0x220] sm:$0xff] }
  0x59   :  { %6781 = vst [vmem:[#allocation42_spill] sm:$0xff] %v5435_v53 }
  0x5a   :  { %3375 = vmatpush1.bf16.msra.mxu1 %v5330_v43 }
  0x5b   :  { %3377 = vmatprep.subr.bf16.mxu1 %v5333_v44 }
  0x5e   :  { %3379 = vmatpush1.bf16.msra.mxu1 %v5336_v49 }
  0x5f   :  { %3381 = vmatprep.subr.bf16.mxu1 %v5339_v52 }
  0x62   :  { %3383 = vmatpush1.bf16.msra.mxu1 %v5342_v59 }
  0x63   :  { %3385 = vmatprep.subr.bf16.mxu1 %v5345_v60 }
  0x66   :  { %3387 = vmatpush1.bf16.msra.mxu1 %v5348_v7 }
  0x67   :  { %3389 = vmatprep.subr.bf16.mxu1 %v5351_v8 }
  0x6a   :  { %3391 = vmatpush1.bf16.msra.mxu1 %v5354_v20 }
  0x6b   :  { %3457 = vmatprep.subr.bf16.mxu1 %v5357_v21 }
  0x6d   :  { %450 = vmatmul.mubr.f32.vlgmr.msra.gmra.mrb[2].mxu1 %v5308_v14 }
  0x6e   :  { %3459 = vmatpush1.bf16.msra.mxu1 %v5360_v32 }
  0x6f   :  { %3461 = vmatprep.subr.bf16.mxu1 %v5363_v37 }
  0x72   :  { %3463 = vmatpush1.bf16.msra.mxu1 %v5367_v42 }
  0x73   :  { %3465 = vmatprep.subr.bf16.mxu1 %v5373_v58 }
  0x76   :  { %3467 = vmatpush1.bf16.msra.mxu1 %v5378_v2 }
  0x77   :  { %3469 = vmatprep.subr.bf16.mxu1 %v5385_v31  ;;  %v263_v31 = vld [vmem:[#allocation8 + $0x3e8] sm:$0xff] }
  0x7a   :  { %3471 = vmatpush1.bf16.msra.mxu1 %v5390_v46  ;;  %v213_v46 = vld [vmem:[#allocation8 + $0x258] sm:$0xff] }
  0x7b   :  { %3473 = vmatprep.subr.bf16.mxu1 %v5397_v12  ;;  %v5414_v12 = vpack.c.bf16 %v184_v27, %v180_v24  ;;  %v188_v24 = vld [vmem:[#allocation8 + $0x190] sm:$0xff] }
  0x7c   :  { %v192_v27 = vld [vmem:[#allocation8 + $0x1b0] sm:$0xff] }
  0x7d   :  { %6774 = vst [vmem:[#allocation35_spill] sm:$0xff] %v5414_v12 }
  0x7e   :  { %3475 = vmatpush1.bf16.msra.mxu1 %v5402_v30  ;;  %v187_v30 = vld [vmem:[#allocation8 + $0x188] sm:$0xff] }
  0x7f   :  { %3477 = vmatprep.subr.bf16.mxu1 %v5409_v9  ;;  %v5419_v13 = vpack.c.bf16 %v191_v39, %v187_v30  ;;  %v5426_v9 = vpack.c.bf16 %v192_v27, %v188_v24  ;;  %v199_v30 = vld [vmem:[#allocation8 + $0x1e8] sm:$0xff]  ;;  %v197_v39 = vld [vmem:[#allocation8 + $0x1d8] sm:$0xff]  ;;  %v196_v24 = vld [vmem:[#allocation8 + $0x1d0] sm:$0xff] }
  0x80   :  { %v5433_v62 = vpack.c.bf16 %v201_v45, %v197_v39  ;;  %v200_v27 = vld [vmem:[#allocation8 + $0x1f0] sm:$0xff]  ;;  %v209_v39 = vld [vmem:[#allocation8 + $0x238] sm:$0xff]  ;;  %v202_v45 = vld [vmem:[#allocation8 + $0x200] sm:$0xff] }
  0x81   :  { %6775 = vst [vmem:[#allocation36_spill] sm:$0xff] %v5419_v13  ;;  %3417 = vmatprep.subr.bf16.mxu0 %v5419_v13  ;;  %6778 = vst [vmem:[#allocation39_spill] sm:$0xff] %v5426_v9  ;;  %v5447_v13 = vpack.c.bf16 %v206_v47, %v202_v45  ;;  %v212_v45 = vld [vmem:[#allocation8 + $0x250] sm:$0xff] }
  0x82   :  { %3479 = vmatpush1.bf16.msra.mxu1 %v5414_v12  ;;  %3419 = vmatpush1.bf16.msra.mxu0 %v5423_v56  ;;  %v195_v12 = vld [vmem:[#allocation8 + $0x1c8] sm:$0xff]  ;;  %6780 = vst [vmem:[#allocation41_spill] sm:$0xff] %v5433_v62 }
  0x83   :  { %3481 = vmatprep.subr.bf16.mxu1 %v5421_v0  ;;  %v5431_v1 = vpack.c.bf16 %v199_v30, %v195_v12  ;;  %v5438_v0 = vpack.c.bf16 %v200_v27, %v196_v24  ;;  %v207_v12 = vld [vmem:[#allocation8 + $0x228] sm:$0xff]  ;;  %v205_v30 = vld [vmem:[#allocation8 + $0x218] sm:$0xff]  ;;  %6785 = vst [vmem:[#allocation46_spill] sm:$0xff] %v5447_v13  ;;  %v204_v24 = vld [vmem:[#allocation8 + $0x210] sm:$0xff] }
  0x84   :  { %v5445_v55 = vpack.c.bf16 %v209_v39, %v205_v30  ;;  %v208_v27 = vld [vmem:[#allocation8 + $0x230] sm:$0xff]  ;;  %v210_v30 = vld [vmem:[#allocation8 + $0x240] sm:$0xff] }
  0x85   :  { %6779 = vst [vmem:[#allocation40_spill] sm:$0xff] %v5431_v1  ;;  %3421 = vmatprep.subr.bf16.mxu0 %v5431_v1  ;;  %6782 = vst [vmem:[#allocation43_spill] sm:$0xff] %v5438_v0  ;;  %v211_v1 = vld [vmem:[#allocation8 + $0x248] sm:$0xff]  ;;  %v214_v39 = vld [vmem:[#allocation8 + $0x260] sm:$0xff] }
  0x86   :  { %3483 = vmatpush1.bf16.msra.mxu1 %v5426_v9  ;;  %3423 = vmatpush1.bf16.msra.mxu0 %v5435_v53  ;;  %v203_v9 = vld [vmem:[#allocation8 + $0x208] sm:$0xff]  ;;  %6784 = vst [vmem:[#allocation45_spill] sm:$0xff] %v5445_v55  ;;  %v5450_v53 = vpack.c.bf16 %v208_v27, %v204_v24  ;;  %v5459_v47 = vpack.c.bf16 %v214_v39, %v210_v30  ;;  %v216_v24 = vld [vmem:[#allocation8 + $0x270] sm:$0xff]  ;;  %v222_v30 = vld [vmem:[#allocation8 + $0x2a0] sm:$0xff] }
  0x87   :  { %3485 = vmatprep.subr.bf16.mxu1 %v5433_v62  ;;  %v5443_v56 = vpack.c.bf16 %v207_v12, %v203_v9  ;;  %v215_v62 = vld [vmem:[#allocation8 + $0x268] sm:$0xff]  ;;  %v5456_v12 = vpack.c.bf16 %v217_v38, %v213_v46  ;;  %v5463_v27 = vpack.c.bf16 %v216_v24, %v212_v45  ;;  %v221_v38 = vld [vmem:[#allocation8 + $0x298] sm:$0xff] }
  0x88   :  { %6786 = vst [vmem:[#allocation47_spill] sm:$0xff] %v5450_v53  ;;  %v5454_v9 = vpack.c.bf16 %v215_v62, %v211_v1  ;;  %6789 = vst [vmem:[#allocation50_spill] sm:$0xff] %v5459_v47  ;;  %v219_v1 = vld [vmem:[#allocation8 + $0x288] sm:$0xff] }
  0x89   :  { %6783 = vst [vmem:[#allocation44_spill] sm:$0xff] %v5443_v56  ;;  %3425 = vmatprep.subr.bf16.mxu0 %v5443_v56  ;;  %6788 = vst [vmem:[#allocation49_spill] sm:$0xff] %v5456_v12  ;;  %v223_v62 = vld [vmem:[#allocation8 + $0x2a8] sm:$0xff]  ;;  %v257_v56 = vld [vmem:[#allocation8 + $0x3b8] sm:$0xff] }
  0x8a   :  { %3487 = vmatpush1.bf16.msra.mxu1 %v5438_v0  ;;  %3427 = vmatpush1.bf16.msra.mxu0 %v5447_v13  ;;  %6787 = vst [vmem:[#allocation48_spill] sm:$0xff] %v5454_v9  ;;  %6790 = vst [vmem:[#allocation51_spill] sm:$0xff] %v5463_v27  ;;  %v5467_v46 = vpack.c.bf16 %v223_v62, %v219_v1  ;;  %v225_v13 = vld [vmem:[#allocation8 + $0x2b8] sm:$0xff]  ;;  %v227_v24 = vld [vmem:[#allocation8 + $0x2c8] sm:$0xff] }
  0x8b   :  { %3489 = vmatprep.subr.bf16.mxu1 %v5445_v55  ;;  %3429 = vmatprep.subr.bf16.mxu0 %v5454_v9  ;;  %v5469_v39 = vpack.c.bf16 %v225_v13, %v221_v38  ;;  %v220_v9 = vld [vmem:[#allocation8 + $0x290] sm:$0xff]  ;;  %v231_v1 = vld [vmem:[#allocation8 + $0x2e8] sm:$0xff]  ;;  %v229_v62 = vld [vmem:[#allocation8 + $0x2d8] sm:$0xff] }
  0x8c   :  { %6791 = vst [vmem:[#allocation52_spill] sm:$0xff] %v5467_v46  ;;  %v226_v13 = vld [vmem:[#allocation8 + $0x2c0] sm:$0xff]  ;;  %v256_v0 = vld [vmem:[#allocation8 + $0x3b0] sm:$0xff] }
  0x8d   :  { %6792 = vst [vmem:[#allocation53_spill] sm:$0xff] %v5469_v39  ;;  %v230_v38 = vld [vmem:[#allocation8 + $0x2e0] sm:$0xff] }
  0x8e   :  { %3491 = vmatpush1.bf16.msra.mxu1 %v5450_v53  ;;  %3431 = vmatpush1.bf16.msra.mxu0 %v5459_v47  ;;  %v218_v53 = vld [vmem:[#allocation8 + $0x280] sm:$0xff]  ;;  %v233_v47 = vld [vmem:[#allocation8 + $0x2f8] sm:$0xff] }
  0x8f   :  { %3493 = vmatprep.subr.bf16.mxu1 %v5456_v12  ;;  %v5471_v55 = vpack.c.bf16 %v222_v30, %v218_v53  ;;  %v224_v12 = vld [vmem:[#allocation8 + $0x2b0] sm:$0xff]  ;;  %3433 = vmatprep.subr.bf16.mxu0 %v5467_v46  ;;  %v5481_v53 = vpack.c.bf16 %v233_v47, %v229_v62  ;;  %v5483_v30 = vpack.c.bf16 %v230_v38, %v226_v13  ;;  %v234_v47 = vld [vmem:[#allocation8 + $0x300] sm:$0xff] }
  0x90   :  { %v5476_v45 = vpack.c.bf16 %v224_v12, %v220_v9  ;;  %v228_v46 = vld [vmem:[#allocation8 + $0x2d0] sm:$0xff]  ;;  %v235_v12 = vld [vmem:[#allocation8 + $0x308] sm:$0xff]  ;;  %v238_v62 = vld [vmem:[#allocation8 + $0x320] sm:$0xff] }
  0x91   :  { %6793 = vst [vmem:[#allocation54_spill] sm:$0xff] %v5471_v55  ;;  %6796 = vst [vmem:[#allocation57_spill] sm:$0xff] %v5481_v53  ;;  %v5495_v38 = vpack.c.bf16 %v238_v62, %v234_v47 }
  0x92   :  { %3495 = vmatpush1.bf16.msra.mxu1 %v5463_v27  ;;  %3435 = vmatpush1.bf16.msra.mxu0 %v5471_v55  ;;  %6794 = vst [vmem:[#allocation55_spill] sm:$0xff] %v5476_v45  ;;  %v5478_v27 = vpack.c.bf16 %v231_v1, %v227_v24  ;;  %6797 = vst [vmem:[#allocation58_spill] sm:$0xff] %v5483_v30  ;;  %v239_v24 = vld [vmem:[#allocation8 + $0x328] sm:$0xff]  ;;  %v237_v1 = vld [vmem:[#allocation8 + $0x318] sm:$0xff] }
  0x93   :  { %3497 = vmatprep.subr.bf16.mxu1 %v5469_v39  ;;  %v232_v39 = vld [vmem:[#allocation8 + $0x2f0] sm:$0xff]  ;;  %v5490_v55 = vpack.c.bf16 %v239_v24, %v235_v12  ;;  %6801 = vst [vmem:[#allocation62_spill] sm:$0xff] %v5495_v38  ;;  %v243_v12 = vld [vmem:[#allocation8 + $0x348] sm:$0xff] }
  0x94   :  { %6795 = vst [vmem:[#allocation56_spill] sm:$0xff] %v5478_v27  ;;  %3437 = vmatprep.subr.bf16.mxu0 %v5478_v27  ;;  %v5486_v9 = vpack.c.bf16 %v232_v39, %v228_v46  ;;  %v236_v46 = vld [vmem:[#allocation8 + $0x310] sm:$0xff]  ;;  %v247_v24 = vld [vmem:[#allocation8 + $0x368] sm:$0xff] }
  0x95   :  { %6799 = vst [vmem:[#allocation60_spill] sm:$0xff] %v5490_v55  ;;  %v240_v39 = vld [vmem:[#allocation8 + $0x330] sm:$0xff]  ;;  %v5502_v27 = vpack.c.bf16 %v247_v24, %v243_v12 }
  0x96   :  { %3499 = vmatpush1.bf16.msra.mxu1 %v5476_v45  ;;  %6798 = vst [vmem:[#allocation59_spill] sm:$0xff] %v5486_v9  ;;  %3439 = vmatpush1.bf16.msra.mxu0 %v5483_v30  ;;  %v241_v45 = vld [vmem:[#allocation8 + $0x338] sm:$0xff] }
  0x97   :  { %3501 = vmatprep.subr.bf16.mxu1 %v5481_v53  ;;  %v5493_v13 = vpack.c.bf16 %v241_v45, %v237_v1  ;;  %3441 = vmatprep.subr.bf16.mxu0 %v5490_v55  ;;  %v5498_v53 = vpack.c.bf16 %v240_v39, %v236_v46  ;;  %v245_v30 = vld [vmem:[#allocation8 + $0x358] sm:$0xff]  ;;  %6803 = vst [vmem:[#allocation64_spill] sm:$0xff] %v5502_v27  ;;  %v242_v45 = vld [vmem:[#allocation8 + $0x340] sm:$0xff]  ;;  %v244_v46 = vld [vmem:[#allocation8 + $0x350] sm:$0xff] }
  0x98   :  { %v246_v1 = vld [vmem:[#allocation8 + $0x360] sm:$0xff]  ;;  %v248_v39 = vld [vmem:[#allocation8 + $0x370] sm:$0xff]  ;;  %v251_v55 = vld [vmem:[#allocation8 + $0x388] sm:$0xff] }
  0x99   :  { %6800 = vst [vmem:[#allocation61_spill] sm:$0xff] %v5493_v13  ;;  %6802 = vst [vmem:[#allocation63_spill] sm:$0xff] %v5498_v53  ;;  %v5507_v62 = vpack.c.bf16 %v246_v1, %v242_v45  ;;  %v5512_v12 = vpack.c.bf16 %v248_v39, %v244_v46  ;;  %v254_v45 = vld [vmem:[#allocation8 + $0x3a0] sm:$0xff]  ;;  %v252_v1 = vld [vmem:[#allocation8 + $0x390] sm:$0xff] }
  0x9a   :  { %3503 = vmatpush1.bf16.msra.mxu1 %v5486_v9  ;;  %3443 = vmatpush1.bf16.msra.mxu0 %v5495_v38  ;;  %v249_v9 = vld [vmem:[#allocation8 + $0x378] sm:$0xff]  ;;  %v255_v38 = vld [vmem:[#allocation8 + $0x3a8] sm:$0xff]  ;;  %v262_v39 = vld [vmem:[#allocation8 + $0x3e0] sm:$0xff] }
  0x9b   :  { %3505 = vmatprep.subr.bf16.mxu1 %v5493_v13  ;;  %v5505_v47 = vpack.c.bf16 %v249_v9, %v245_v30  ;;  %6805 = vst [vmem:[#allocation66_spill] sm:$0xff] %v5507_v62  ;;  %3445 = vmatprep.subr.bf16.mxu0 %v5502_v27  ;;  %v253_v13 = vld [vmem:[#allocation8 + $0x398] sm:$0xff]  ;;  %6806 = vst [vmem:[#allocation67_spill] sm:$0xff] %v5512_v12  ;;  %v5514_v24 = vpack.c.bf16 %v255_v38, %v251_v55  ;;  %v250_v9 = vld [vmem:[#allocation8 + $0x380] sm:$0xff] }
  0x9c   :  { %v5516_v30 = vpack.c.bf16 %v257_v56, %v253_v13  ;;  %v259_v27 = vld [vmem:[#allocation8 + $0x3c8] sm:$0xff]  ;;  %v261_v55 = vld [vmem:[#allocation8 + $0x3d8] sm:$0xff]  ;;  %v258_v56 = vld [vmem:[#allocation8 + $0x3c0] sm:$0xff] }
  0x9d   :  { %6804 = vst [vmem:[#allocation65_spill] sm:$0xff] %v5505_v47  ;;  %6807 = vst [vmem:[#allocation68_spill] sm:$0xff] %v5514_v24  ;;  %v5524_v46 = vpack.c.bf16 %v263_v31, %v259_v27  ;;  %v265_v38 = vld [vmem:[#allocation8 + $0x3f8] sm:$0xff]  ;;  %v268_v27 = vlaneseq }
  0x9e   :  { %3507 = vmatpush1.bf16.msra.mxu1 %v5498_v53  ;;  %3447 = vmatpush1.bf16.msra.mxu0 %v5507_v62  ;;  %6808 = vst [vmem:[#allocation69_spill] sm:$0xff] %v5516_v30  ;;  %v5518_v53 = vpack.c.bf16 %v254_v45, %v250_v9  ;;  %v5527_v13 = vpack.c.bf16 %v265_v38, %v261_v55  ;;  %v260_v9 = vld [vmem:[#allocation8 + $0x3d0] sm:$0xff]  ;;  %v73_v38 = vld [vmem:[%s6584_s2] sm:$0xf] }
  0x9f   :  { %3509 = vmatprep.subr.bf16.mxu1 %v5505_v47  ;;  %3449 = vmatprep.subr.bf16.mxu0 %v5514_v24  ;;  %v5522_v47 = vpack.c.bf16 %v256_v0, %v252_v1  ;;  %6811 = vst [vmem:[#allocation72_spill] sm:$0xff] %v5524_v46  ;;  %v264_v45 = vld [vmem:[#allocation8 + $0x3f0] sm:$0xff]  ;;  %v5530_v62 = vpack.c.bf16 %v262_v39, %v258_v56  ;;  %v5535_v0 = vld [vmem:[%s6583_s1 + $0x8] sm:$0xff]  ;;  %v269_v1 = vshrl.u32 %v268_v27, 7  ;;  %v266_v56 = vld [vmem:[%s6586_s4] sm:$0xf] }
  0xa0   :  { %6809 = vst [vmem:[#allocation70_spill] sm:$0xff] %v5518_v53  ;;  %6812 = vst [vmem:[#allocation73_spill] sm:$0xff] %v5527_v13  ;;  %573 = vmatprep.mubr.f32.mxu0 %v5535_v0  ;;  %v5540_v31 = vpack.c.bf16 %v264_v45, %v260_v9  ;;  %644 = vmatprep.mubr.f32.mxu1 %v5535_v0 }
  0xa1   :  { %6810 = vst [vmem:[#allocation71_spill] sm:$0xff] %v5522_v47  ;;  %6813 = vst [vmem:[#allocation74_spill] sm:$0xff] %v5530_v62  ;;  %v5548_v55 = vsub.s32 0, %v269_v1 }
  0xa2   :  { %3511 = vmatpush1.bf16.msra.mxu1 %v5512_v12  ;;  %3451 = vmatpush1.bf16.msra.mxu0 %v5518_v53  ;;  %6814 = vst [vmem:[#allocation75_spill] sm:$0xff] %v5535_v0  ;;  %6815 = vst [vmem:[#allocation76_spill] sm:$0xff] %v5540_v31 }
  0xa3   :  { %3513 = vmatprep.subr.bf16.mxu1 %v5516_v30  ;;  %3453 = vmatprep.subr.bf16.mxu0 %v5524_v46  ;;  %6816 = vst [vmem:[#allocation77_spill] sm:$0xff] %v5548_v55  ;;  %v5557_v39 = vrot.slane %v73_v38, %v5548_v55  ;;  %v5560_v9 = vrot.slane %v266_v56, %v5548_v55 }
  0xa5   :  { %6817 = vst [vmem:[#allocation78_spill] sm:$0xff] %v5557_v39  ;;  %6818 = vst [vmem:[#allocation79_spill] sm:$0xff] %v5560_v9 }
  0xa6   :  { %3515 = vmatpush1.bf16.msra.mxu1 %v5522_v47  ;;  %3455 = vmatpush1.bf16.msra.mxu0 %v5530_v62 }
  0xa7   :  { %3517 = vmatprep.subr.bf16.mxu1 %v5527_v13  ;;  %3521 = vmatprep.subr.bf16.mxu0 %v5231_v6  ;;  %v5564_v6 = vsub.s32 1, %v269_v1 }
  0xa9   :  { %6819 = vst [vmem:[#allocation80_spill] sm:$0xff] %v5564_v6  ;;  %v5567_v13 = vrot.slane %v266_v56, %v5564_v6  ;;  %v5570_v46 = vrot.slane %v73_v38, %v5564_v6 }
  0xaa   :  { %3519 = vmatpush1.bf16.msra.mxu1 %v5540_v31 }
  0xab   :  { %3553 = vmatprep.subr.bf16.mxu1 %v5297_v5  ;;  %6820 = vst [vmem:[#allocation81_spill] sm:$0xff] %v5567_v13  ;;  %6821 = vst [vmem:[#allocation82_spill] sm:$0xff] %v5570_v46 }
  0xb7   :  { %v459_v45 = vpop.permute.xlu0 %458 }
  0xb8   :  { %v482_v0 = vmul.f32 %v5557_v39, %v459_v45  ;;  %v483_v53 = vmul.f32 %v5570_v46, %v459_v45 }
 0x120   :  { %v380_v27 = vpop.f32.mrb[0].mxu1 }
 0x121   :  { %v381_v5 = vadd.f32 %v380_v27, %v5560_v9  ;;  %v382_v31 = vpop.f32.mrb[1].mxu1  ;;  %v5574_v9 = vsub.s32 3, %v269_v1 }
 0x122   :  { %v383_v55 = vadd.f32 %v382_v31, %v5567_v13 }
 0x123   :  { %v486_v62 = vadd.f32 %v482_v0, %v381_v5  ;;  %6822 = vst [vmem:[#allocation83_spill] sm:$0xff] %v5574_v9  ;;  %v5576_v5 = vsub.s32 2, %v269_v1  ;;  %v5579_v0 = vrot.slane %v73_v38, %v5574_v9  ;;  %v5585_v31 = vrot.slane %v266_v56, %v5574_v9 }
 0x124   :  { %v487_v39 = vadd.f32 %v483_v53, %v383_v55 }
 0x125   :  { %v3220_v47 = vmul.f32 -1.442695, %v486_v62  ;;  %6823 = vst [vmem:[#allocation84_spill] sm:$0xff] %v5576_v5  ;;  %v5582_v62 = vrot.slane %v266_v56, %v5576_v5  ;;  %6824 = vst [vmem:[#allocation85_spill] sm:$0xff] %v5585_v31  ;;  %v5588_v53 = vrot.slane %v73_v38, %v5576_v5 }
 0x126   :  { %v3221_v30 = vmul.f32 -1.442695, %v487_v39 }
 0x127   :  { %4907 = vpow2.f32 %v3220_v47  ;;  %v484_v46 = vmul.f32 %v5588_v53, %v459_v45 }
 0x128   :  { %4909 = vpow2.f32 %v3221_v30 }
 0x131   :  { %v4908_v24 = vpop.eup %4907 }
 0x132   :  { %v493_v27 = vadd.f32 1.0, %v4908_v24  ;;  %v4910_v47 = vpop.eup %4909 }
 0x133   :  { %v499_v55 = vadd.f32 1.0, %v4910_v47 }
 0x134   :  { %4911 = vrcp.f32 %v493_v27  ;;  %v485_v27 = vmul.f32 %v5579_v0, %v459_v45  ;;  %v6833_v45 = vld [vmem:[#allocation30_spill] sm:$0xff] }
 0x135   :  { %4913 = vrcp.f32 %v499_v55  ;;  %v6836_v55 = vld [vmem:[#allocation33_spill] sm:$0xff] }
 0x13e   :  { %v4912_v6 = vpop.eup %4911 }
 0x13f   :  { %v4914_v38 = vpop.eup %4913 }
 0x140   :  { %v451_v30 = vpop.f32.mrb[2].mxu1  ;;  %v505_v5 = vsub.f32 1.0, %v4914_v38  ;;  %v507_v47 = vmul.f32 %v4914_v38, %v5308_v14  ;;  %v6826_v14 = vld [vmem:[#allocation23_spill] sm:$0xff]  ;;  %v6841_v38 = vld [vmem:[#allocation38_spill] sm:$0xff] }
 0x141   :  { %v453_v24 = vpop.f32.mrb[3].mxu1  ;;  %v452_v39 = vadd.f32 %v451_v30, %v5582_v62 }
 0x142   :  { %v454_v1 = vadd.f32 %v453_v24, %v5585_v31  ;;  %v6835_v24 = vld [vmem:[#allocation32_spill] sm:$0xff] }
 0x143   :  { %v488_v56 = vadd.f32 %v484_v46, %v452_v39  ;;  %v6830_v46 = vld [vmem:[#allocation27_spill] sm:$0xff]  ;;  %v6837_v39 = vld [vmem:[#allocation34_spill] sm:$0xff] }
 0x144   :  { %v489_v13 = vadd.f32 %v485_v27, %v454_v1  ;;  %v6838_v1 = vld [vmem:[#allocation35_spill] sm:$0xff]  ;;  %v6839_v27 = vld [vmem:[#allocation36_spill] sm:$0xff] }
 0x146   :  { %v502_v9 = vmul.f32 %v4912_v6, %v489_v13  ;;  %v6825_v6 = vmov 0.0   ;;  %v6831_v13 = vld [vmem:[#allocation28_spill] sm:$0xff] }
 0x148   :  { %v503_v12 = vadd.f32 %v502_v9, %v488_v56  ;;  %v6832_v9 = vld [vmem:[#allocation29_spill] sm:$0xff] }
 0x149   :  { %v6840_v56 = vld [vmem:[#allocation37_spill] sm:$0xff] }
 0x14a   :  { %4915 = vtanh.f32 %v503_v12  ;;  %v6829_v12 = vld [vmem:[#allocation26_spill] sm:$0xff] }
 0x154   :  { %v4916_v19 = vpop.eup %4915 }
 0x155   :  { %v506_v2 = vmul.f32 %v4916_v19, %v505_v5  ;;  %v6828_v19 = vld [vmem:[#allocation25_spill] sm:$0xff]  ;;  %v6834_v5 = vld [vmem:[#allocation31_spill] sm:$0xff] }
 0x157   :  { %v5595_v30 = vadd.f32 %v507_v47, %v506_v2  ;;  %v6827_v2 = vld [vmem:[#allocation24_spill] sm:$0xff]  ;;  %v6842_v47 = vld [vmem:[#allocation39_spill] sm:$0xff] }
 0x159   :  { %574 = vmatmul.mubr.f32.vlgmr.msra.gmra.mrb[0].mxu0 %v5595_v30  ;;  %645 = vmatmul.mubr.f32.vlgmr.msra.gmra.mrb[4].mxu1 %v5595_v30 }
 0x15a   :  { %3523 = vmatpush1.bf16.msra.mxu0 %v5233_v10  ;;  %3555 = vmatpush1.bf16.msra.mxu1 %v5310_v15 }
 0x15b   :  { %3525 = vmatprep.subr.bf16.mxu0 %v5235_v11  ;;  %3557 = vmatprep.subr.bf16.mxu1 %v5313_v18 }
 0x15c   :  { %737 = vmatprep.mubr.f32.mxu0 %v6825_v6  ;;  %808 = vmatprep.mubr.f32.mxu1 %v6825_v6 }
 0x15e   :  { %3527 = vmatpush1.bf16.msra.mxu0 %v5239_v16  ;;  %3559 = vmatpush1.bf16.msra.mxu1 %v5317_v25 }
 0x15f   :  { %3529 = vmatprep.subr.bf16.mxu0 %v5242_v17  ;;  %3561 = vmatprep.subr.bf16.mxu1 %v5321_v26 }
 0x162   :  { %3531 = vmatpush1.bf16.msra.mxu0 %v5245_v22  ;;  %3563 = vmatpush1.bf16.msra.mxu1 %v5324_v33 }
 0x163   :  { %3533 = vmatprep.subr.bf16.mxu0 %v5248_v23  ;;  %3565 = vmatprep.subr.bf16.mxu1 %v5327_v36 }
 0x166   :  { %3535 = vmatpush1.bf16.msra.mxu0 %v5251_v28  ;;  %3567 = vmatpush1.bf16.msra.mxu1 %v5330_v43 }
 0x167   :  { %3537 = vmatprep.subr.bf16.mxu0 %v5254_v29  ;;  %3569 = vmatprep.subr.bf16.mxu1 %v5333_v44 }
 0x16a   :  { %3539 = vmatpush1.bf16.msra.mxu0 %v5257_v34  ;;  %3571 = vmatpush1.bf16.msra.mxu1 %v5336_v49 }
 0x16b   :  { %3541 = vmatprep.subr.bf16.mxu0 %v5260_v35  ;;  %3573 = vmatprep.subr.bf16.mxu1 %v5339_v52 }
 0x16e   :  { %3543 = vmatpush1.bf16.msra.mxu0 %v5263_v40  ;;  %3575 = vmatpush1.bf16.msra.mxu1 %v5342_v59 }
 0x16f   :  { %3545 = vmatprep.subr.bf16.mxu0 %v5266_v41  ;;  %3577 = vmatprep.subr.bf16.mxu1 %v5345_v60 }
 0x172   :  { %3547 = vmatpush1.bf16.msra.mxu0 %v5275_v50  ;;  %3579 = vmatpush1.bf16.msra.mxu1 %v5348_v7 }
 0x173   :  { %3549 = vmatprep.subr.bf16.mxu0 %v5280_v54  ;;  %3581 = vmatprep.subr.bf16.mxu1 %v5351_v8 }
 0x176   :  { %3551 = vmatpush1.bf16.msra.mxu0 %v5292_v3  ;;  %3583 = vmatpush1.bf16.msra.mxu1 %v5354_v20 }
 0x177   :  { %3585 = vmatprep.subr.bf16.mxu0 %v5277_v51  ;;  %3649 = vmatprep.subr.bf16.mxu1 %v5357_v21 }
 0x179   :  { %738 = vmatmul.mubr.f32.vlgmr.msra.gmra.mrb[2].mxu0 %v5595_v30  ;;  %809 = vmatmul.mubr.f32.vlgmr.msra.gmra.mrb[6].mxu1 %v5595_v30 }
 0x17a   :  { %3587 = vmatpush1.bf16.msra.mxu0 %v5282_v57  ;;  %3651 = vmatpush1.bf16.msra.mxu1 %v5360_v32 }
 0x17b   :  { %3589 = vmatprep.subr.bf16.mxu0 %v5289_v63  ;;  %3653 = vmatprep.subr.bf16.mxu1 %v5363_v37 }
 0x17e   :  { %3591 = vmatpush1.bf16.msra.mxu0 %v5294_v4  ;;  %3655 = vmatpush1.bf16.msra.mxu1 %v5367_v42 }
 0x17f   :  { %3593 = vmatprep.subr.bf16.mxu0 %v5371_v48  ;;  %3657 = vmatprep.subr.bf16.mxu1 %v5373_v58 }
 0x182   :  { %3595 = vmatpush1.bf16.msra.mxu0 %v5375_v61  ;;  %3659 = vmatpush1.bf16.msra.mxu1 %v6826_v14  ;;  %v6887_v61 = vld [vmem:[#allocation84_spill] sm:$0xff] }
 0x183   :  { %3597 = vmatprep.subr.bf16.mxu0 %v6827_v2  ;;  %3661 = vmatprep.subr.bf16.mxu1 %v6828_v19 }
 0x186   :  { %3599 = vmatpush1.bf16.msra.mxu0 %v6829_v12  ;;  %3663 = vmatpush1.bf16.msra.mxu1 %v6830_v46 }
 0x187   :  { %3601 = vmatprep.subr.bf16.mxu0 %v6831_v13  ;;  %3665 = vmatprep.subr.bf16.mxu1 %v6832_v9  ;;  %v6843_v9 = vld [vmem:[#allocation40_spill] sm:$0xff] }
 0x18a   :  { %3603 = vmatpush1.bf16.msra.mxu0 %v6833_v45  ;;  %3667 = vmatpush1.bf16.msra.mxu1 %v6834_v5  ;;  %v6844_v45 = vld [vmem:[#allocation41_spill] sm:$0xff]  ;;  %v6845_v5 = vld [vmem:[#allocation42_spill] sm:$0xff] }
 0x18b   :  { %3605 = vmatprep.subr.bf16.mxu0 %v6835_v24  ;;  %3669 = vmatprep.subr.bf16.mxu1 %v6836_v55  ;;  %v6846_v24 = vld [vmem:[#allocation43_spill] sm:$0xff]  ;;  %v6847_v55 = vld [vmem:[#allocation44_spill] sm:$0xff] }
 0x18e   :  { %3607 = vmatpush1.bf16.msra.mxu0 %v6837_v39  ;;  %3671 = vmatpush1.bf16.msra.mxu1 %v6838_v1  ;;  %v6848_v39 = vld [vmem:[#allocation45_spill] sm:$0xff]  ;;  %v6849_v1 = vld [vmem:[#allocation46_spill] sm:$0xff] }
 0x18f   :  { %3609 = vmatprep.subr.bf16.mxu0 %v6839_v27  ;;  %3673 = vmatprep.subr.bf16.mxu1 %v6840_v56  ;;  %v6850_v27 = vld [vmem:[#allocation47_spill] sm:$0xff]  ;;  %v6851_v56 = vld [vmem:[#allocation48_spill] sm:$0xff] }
 0x192   :  { %3611 = vmatpush1.bf16.msra.mxu0 %v6841_v38  ;;  %3675 = vmatpush1.bf16.msra.mxu1 %v6842_v47  ;;  %v6852_v38 = vld [vmem:[#allocation49_spill] sm:$0xff]  ;;  %v6853_v47 = vld [vmem:[#allocation50_spill] sm:$0xff] }
 0x193   :  { %3613 = vmatprep.subr.bf16.mxu0 %v6843_v9  ;;  %3677 = vmatprep.subr.bf16.mxu1 %v6844_v45  ;;  %v6854_v9 = vld [vmem:[#allocation51_spill] sm:$0xff]  ;;  %v6855_v45 = vld [vmem:[#allocation52_spill] sm:$0xff] }
 0x196   :  { %3615 = vmatpush1.bf16.msra.mxu0 %v6845_v5  ;;  %3679 = vmatpush1.bf16.msra.mxu1 %v6846_v24  ;;  %v6856_v5 = vld [vmem:[#allocation53_spill] sm:$0xff]  ;;  %v6857_v24 = vld [vmem:[#allocation54_spill] sm:$0xff] }
 0x197   :  { %3617 = vmatprep.subr.bf16.mxu0 %v6847_v55  ;;  %3681 = vmatprep.subr.bf16.mxu1 %v6848_v39  ;;  %v6858_v55 = vld [vmem:[#allocation55_spill] sm:$0xff]  ;;  %v6859_v39 = vld [vmem:[#allocation56_spill] sm:$0xff] }
 0x19a   :  { %3619 = vmatpush1.bf16.msra.mxu0 %v6849_v1  ;;  %3683 = vmatpush1.bf16.msra.mxu1 %v6850_v27  ;;  %v6860_v1 = vld [vmem:[#allocation57_spill] sm:$0xff]  ;;  %v6861_v27 = vld [vmem:[#allocation58_spill] sm:$0xff] }
 0x19b   :  { %3621 = vmatprep.subr.bf16.mxu0 %v6851_v56  ;;  %3685 = vmatprep.subr.bf16.mxu1 %v6852_v38  ;;  %v6862_v56 = vld [vmem:[#allocation59_spill] sm:$0xff]  ;;  %v6863_v38 = vld [vmem:[#allocation60_spill] sm:$0xff] }
 0x19e   :  { %3623 = vmatpush1.bf16.msra.mxu0 %v6853_v47  ;;  %3687 = vmatpush1.bf16.msra.mxu1 %v6854_v9  ;;  %v6864_v47 = vld [vmem:[#allocation61_spill] sm:$0xff]  ;;  %v6865_v9 = vld [vmem:[#allocation62_spill] sm:$0xff] }
 0x19f   :  { %3625 = vmatprep.subr.bf16.mxu0 %v6855_v45  ;;  %3689 = vmatprep.subr.bf16.mxu1 %v6856_v5  ;;  %v6866_v45 = vld [vmem:[#allocation63_spill] sm:$0xff]  ;;  %v6867_v5 = vld [vmem:[#allocation64_spill] sm:$0xff] }
 0x1a2   :  { %3627 = vmatpush1.bf16.msra.mxu0 %v6857_v24  ;;  %3691 = vmatpush1.bf16.msra.mxu1 %v6858_v55  ;;  %v6868_v24 = vld [vmem:[#allocation65_spill] sm:$0xff]  ;;  %v6869_v55 = vld [vmem:[#allocation66_spill] sm:$0xff] }
 0x1a3   :  { %3629 = vmatprep.subr.bf16.mxu0 %v6859_v39  ;;  %3693 = vmatprep.subr.bf16.mxu1 %v6860_v1  ;;  %v6870_v39 = vld [vmem:[#allocation67_spill] sm:$0xff]  ;;  %v6871_v1 = vld [vmem:[#allocation68_spill] sm:$0xff] }
 0x1a6   :  { %3631 = vmatpush1.bf16.msra.mxu0 %v6861_v27  ;;  %3695 = vmatpush1.bf16.msra.mxu1 %v6862_v56  ;;  %v6872_v27 = vld [vmem:[#allocation69_spill] sm:$0xff]  ;;  %v6873_v56 = vld [vmem:[#allocation70_spill] sm:$0xff] }
 0x1a7   :  { %3633 = vmatprep.subr.bf16.mxu0 %v6863_v38  ;;  %3697 = vmatprep.subr.bf16.mxu1 %v6864_v47  ;;  %v6874_v38 = vld [vmem:[#allocation71_spill] sm:$0xff]  ;;  %v6875_v47 = vld [vmem:[#allocation72_spill] sm:$0xff] }
 0x1aa   :  { %3635 = vmatpush1.bf16.msra.mxu0 %v6865_v9  ;;  %3699 = vmatpush1.bf16.msra.mxu1 %v6866_v45  ;;  %v6876_v9 = vld [vmem:[#allocation73_spill] sm:$0xff]  ;;  %v6877_v45 = vld [vmem:[#allocation74_spill] sm:$0xff] }
 0x1ab   :  { %3637 = vmatprep.subr.bf16.mxu0 %v6867_v5  ;;  %3701 = vmatprep.subr.bf16.mxu1 %v6868_v24  ;;  %v6878_v5 = vld [vmem:[#allocation76_spill] sm:$0xff]  ;;  %v6879_v24 = vld [vmem:[#allocation14_spill] sm:$0xff] }
 0x1ae   :  { %3639 = vmatpush1.bf16.msra.mxu0 %v6869_v55  ;;  %3703 = vmatpush1.bf16.msra.mxu1 %v6870_v39  ;;  %v6880_v55 = vld [vmem:[#allocation17_spill] sm:$0xff] }
 0x1af   :  { %3641 = vmatprep.subr.bf16.mxu0 %v6871_v1  ;;  %3705 = vmatprep.subr.bf16.mxu1 %v6872_v27  ;;  %v3229_v27 = vld [vmem:[%s6582_s0 + $0x10] sm:$0xff] }
 0x1b0   :  { %1156 = vperm.xlu1 %4906, %v3229_v27  }
 0x1b2   :  { %3643 = vmatpush1.bf16.msra.mxu0 %v6873_v56  ;;  %3707 = vmatpush1.bf16.msra.mxu1 %v6874_v38  ;;  %v3234_v38 = vld [vmem:[%s6582_s0 + $0x18] sm:$0xff] }
 0x1b3   :  { %3645 = vmatprep.subr.bf16.mxu0 %v6875_v47  ;;  %3709 = vmatprep.subr.bf16.mxu1 %v6876_v9 }
 0x1b4   :  { %1495 = vperm.xlu1 %4906, %v3234_v38   ;;  %v6883_v38 = vld [vmem:[#allocation80_spill] sm:$0xff] }
 0x1b6   :  { %3647 = vmatpush1.bf16.msra.mxu0 %v6877_v45  ;;  %3711 = vmatpush1.bf16.msra.mxu1 %v6878_v5  ;;  %v3244_v45 = vld [vmem:[%s6582_s0 + $0x28] sm:$0xff] }
 0x1b7   :  { %3713 = vmatprep.subr.bf16.mxu0 %v6879_v24  ;;  %3745 = vmatprep.subr.bf16.mxu1 %v6880_v55  ;;  %v288_v24 = vld [vmem:[%s6588_s6] sm:$0xf]  ;;  %v3254_v55 = vld [vmem:[%s6582_s0 + $0x38] sm:$0xff]  ;;  %v6881_v5 = vld [vmem:[#allocation77_spill] sm:$0xff] }
 0x1b8   :  { %2173 = vperm.xlu1 %4906, %v3244_v45   ;;  %v5715_v27 = vrot.slane %v288_v24, %v6881_v5  ;;  %v5718_v56 = vrot.slane %v288_v24, %v6883_v38  ;;  %v5726_v38 = vrot.slane %v288_v24, %v6887_v61 }
 0x1ba   :  { %6882 = vst [vmem:[#allocation77_spill] sm:$0xff] %v5715_v27  ;;  %6884 = vst [vmem:[#allocation80_spill] sm:$0xff] %v5718_v56 }
 0x1bb   :  { %6888 = vst [vmem:[#allocation84_spill] sm:$0xff] %v5726_v38 }
 0x1bc   :  { %2851 = vperm.xlu1 %4906, %v3254_v55   ;;  %v6885_v55 = vld [vmem:[#allocation83_spill] sm:$0xff] }
 0x1bd   :  { %v5723_v14 = vrot.slane %v288_v24, %v6885_v55  ;;  %v6890_v55 = vld [vmem:[#allocation78_spill] sm:$0xff]  ;;  %v6891_v24 = vld [vmem:[#allocation81_spill] sm:$0xff] }
 0x1bf   :  { %6886 = vst [vmem:[#allocation83_spill] sm:$0xff] %v5723_v14 }
 0x22c   :  { %v575_v9 = vpop.f32.mrb[0].mxu0  ;;  %v646_v47 = vpop.f32.mrb[4].mxu1 }
 0x22d   :  { %v576_v1 = vadd.f32 %v575_v9, %v5715_v27  ;;  %v577_v39 = vpop.f32.mrb[1].mxu0  ;;  %v648_v13 = vpop.f32.mrb[5].mxu1 }
 0x22e   :  { %v578_v45 = vadd.f32 %v577_v39, %v5718_v56  ;;  %v649_v9 = vadd.f32 %v648_v13, %v5723_v14  ;;  %v818_v39 = vpop.permute.xlu0 %817  ;;  %v6892_v13 = vld [vmem:[#allocation82_spill] sm:$0xff] }
 0x22f   :  { %v3222_v46 = vmul.f32 -1.442695, %v576_v1  ;;  %v647_v1 = vadd.f32 %v646_v47, %v5726_v38  ;;  %v820_v48 = vmul.f32 %v818_v39, %v6890_v55  ;;  %v821_v14 = vmul.f32 %v818_v39, %v6892_v13 }
 0x230   :  { %v3223_v12 = vmul.f32 -1.442695, %v578_v45 }
 0x231   :  { %4917 = vpow2.f32 %v3222_v46 }
 0x232   :  { %4919 = vpow2.f32 %v3223_v12 }
 0x23b   :  { %v4918_v19 = vpop.eup %4917 }
 0x23c   :  { %v654_v2 = vadd.f32 1.0, %v4918_v19  ;;  %v4920_v5 = vpop.eup %4919 }
 0x23d   :  { %v660_v58 = vadd.f32 1.0, %v4920_v5 }
 0x23e   :  { %4921 = vrcp.f32 %v654_v2  ;;  %v6889_v2 = vld [vmem:[#allocation79_spill] sm:$0xff] }
 0x23f   :  { %4923 = vrcp.f32 %v660_v58 }
 0x248   :  { %v4922_v27 = vpop.eup %4921 }
 0x249   :  { %v663_v46 = vmul.f32 %v4922_v27, %v649_v9  ;;  %v4924_v58 = vpop.eup %4923 }
 0x24a   :  { %v666_v9 = vsub.f32 1.0, %v4924_v58 }
 0x24b   :  { %v664_v12 = vadd.f32 %v663_v46, %v647_v1 }
 0x24c   :  { %v739_v45 = vpop.f32.mrb[2].mxu0  ;;  %v810_v19 = vpop.f32.mrb[6].mxu1 }
 0x24d   :  { %4925 = vtanh.f32 %v664_v12  ;;  %v740_v56 = vadd.f32 %v739_v45, %v6889_v2  ;;  %v741_v42 = vpop.f32.mrb[3].mxu0  ;;  %v812_v61 = vpop.f32.mrb[7].mxu1  ;;  %v6893_v12 = vld [vmem:[#allocation75_spill] sm:$0xff] }
 0x24e   :  { %v742_v5 = vadd.f32 %v741_v42, %v6891_v24  ;;  %v668_v38 = vmul.f32 %v4924_v58, %v6893_v12 }
 0x24f   :  { %v824_v4 = vadd.f32 %v820_v48, %v740_v56 }
 0x250   :  { %v825_v47 = vadd.f32 %v821_v14, %v742_v5  ;;  %v813_v14 = vadd.f32 %v812_v61, %v5585_v31  ;;  %v823_v5 = vmul.f32 %v818_v39, %v5579_v0 }
 0x251   :  { %v3225_v37 = vmul.f32 -1.442695, %v824_v4 }
 0x252   :  { %v3226_v27 = vmul.f32 -1.442695, %v825_v47  ;;  %v822_v47 = vmul.f32 %v818_v39, %v5588_v53  ;;  %v827_v58 = vadd.f32 %v823_v5, %v813_v14  ;;  %v6896_v39 = vld [vmem:[#allocation16_spill] sm:$0xff]  ;;  %v6899_v14 = vld [vmem:[#allocation21_spill] sm:$0xff] }
 0x253   :  { %4927 = vpow2.f32 %v3225_v37  ;;  %v811_v37 = vadd.f32 %v810_v19, %v5582_v62  ;;  %v6897_v19 = vld [vmem:[#allocation19_spill] sm:$0xff]  ;;  %v6902_v5 = vld [vmem:[#allocation24_spill] sm:$0xff] }
 0x254   :  { %4929 = vpow2.f32 %v3226_v27 }
 0x255   :  { %v826_v27 = vadd.f32 %v822_v47, %v811_v37  ;;  %v6900_v37 = vld [vmem:[#allocation22_spill] sm:$0xff]  ;;  %v6903_v47 = vld [vmem:[#allocation25_spill] sm:$0xff] }
 0x257   :  { %v4926_v1 = vpop.eup %4925 }
 0x258   :  { %v667_v46 = vmul.f32 %v4926_v1, %v666_v9 }
 0x25a   :  { %v5735_v45 = vadd.f32 %v668_v38, %v667_v46 }
 0x25c   :  { %6894 = vst [vmem:[#allocation79_spill] sm:$0xff] %v5735_v45  ;;  %911 = vmatprep.mubr.f32.mxu0 %v5735_v45  ;;  %982 = vmatprep.mubr.f32.mxu1 %v5735_v45 }
 0x25d   :  { %v4928_v42 = vpop.eup %4927 }
 0x25e   :  { %v831_v48 = vadd.f32 1.0, %v4928_v42  ;;  %v4930_v4 = vpop.eup %4929 }
 0x25f   :  { %v837_v56 = vadd.f32 1.0, %v4930_v4  ;;  %v6898_v4 = vld [vmem:[#allocation20_spill] sm:$0xff] }
 0x260   :  { %4931 = vrcp.f32 %v831_v48 }
 0x261   :  { %4933 = vrcp.f32 %v837_v56  ;;  %v6901_v56 = vld [vmem:[#allocation23_spill] sm:$0xff] }
 0x26a   :  { %v4932_v38 = vpop.eup %4931 }
 0x26b   :  { %v840_v9 = vmul.f32 %v4932_v38, %v827_v58  ;;  %v4934_v46 = vpop.eup %4933  ;;  %v6904_v58 = vld [vmem:[#allocation26_spill] sm:$0xff]  ;;  %v6905_v38 = vld [vmem:[#allocation27_spill] sm:$0xff] }
 0x26c   :  { %v843_v12 = vsub.f32 1.0, %v4934_v46  ;;  %v845_v61 = vmul.f32 %v4934_v46, %v5595_v30  ;;  %v6895_v30 = vld [vmem:[#allocation18_spill] sm:$0xff]  ;;  %v6909_v46 = vld [vmem:[#allocation31_spill] sm:$0xff] }
 0x26d   :  { %v841_v1 = vadd.f32 %v840_v9, %v826_v27  ;;  %v6906_v27 = vld [vmem:[#allocation28_spill] sm:$0xff]  ;;  %v6907_v9 = vld [vmem:[#allocation29_spill] sm:$0xff] }
 0x26f   :  { %4935 = vtanh.f32 %v841_v1  ;;  %v6908_v1 = vld [vmem:[#allocation30_spill] sm:$0xff] }
 0x279   :  { %v4936_v42 = vpop.eup %4935 }
 0x27a   :  { %v844_v48 = vmul.f32 %v4936_v42, %v843_v12  ;;  %v6910_v12 = vld [vmem:[#allocation32_spill] sm:$0xff]  ;;  %v6911_v42 = vld [vmem:[#allocation33_spill] sm:$0xff] }
 0x27c   :  { %v5744_v31 = vadd.f32 %v845_v61, %v844_v48  ;;  %v6912_v48 = vld [vmem:[#allocation34_spill] sm:$0xff]  ;;  %v6913_v61 = vld [vmem:[#allocation35_spill] sm:$0xff] }
 0x27e   :  { %912 = vmatmul.mubr.f32.vlgmr.msra.gmra.mrb[4].mxu0 %v5744_v31  ;;  %983 = vmatmul.mubr.f32.vlgmr.msra.gmra.mrb[8].mxu1 %v5744_v31 }
 0x27f   :  { %3715 = vmatpush1.bf16.msra.mxu0 %v5233_v10  ;;  %3747 = vmatpush1.bf16.msra.mxu1 %v5310_v15 }
 0x280   :  { %3717 = vmatprep.subr.bf16.mxu0 %v5235_v11  ;;  %3749 = vmatprep.subr.bf16.mxu1 %v5313_v18 }
 0x281   :  { %1076 = vmatprep.mubr.f32.mxu0 %v6825_v6  ;;  %1147 = vmatprep.mubr.f32.mxu1 %v6825_v6 }
 0x283   :  { %3719 = vmatpush1.bf16.msra.mxu0 %v5239_v16  ;;  %3751 = vmatpush1.bf16.msra.mxu1 %v5317_v25 }
 0x284   :  { %3721 = vmatprep.subr.bf16.mxu0 %v5242_v17  ;;  %3753 = vmatprep.subr.bf16.mxu1 %v5321_v26 }
 0x287   :  { %3723 = vmatpush1.bf16.msra.mxu0 %v5245_v22  ;;  %3755 = vmatpush1.bf16.msra.mxu1 %v5324_v33 }
 0x288   :  { %3725 = vmatprep.subr.bf16.mxu0 %v5248_v23  ;;  %3757 = vmatprep.subr.bf16.mxu1 %v5327_v36 }
 0x28b   :  { %3727 = vmatpush1.bf16.msra.mxu0 %v5251_v28  ;;  %3759 = vmatpush1.bf16.msra.mxu1 %v5330_v43 }
 0x28c   :  { %3729 = vmatprep.subr.bf16.mxu0 %v5254_v29  ;;  %3761 = vmatprep.subr.bf16.mxu1 %v5333_v44 }
 0x28f   :  { %3731 = vmatpush1.bf16.msra.mxu0 %v5257_v34  ;;  %3763 = vmatpush1.bf16.msra.mxu1 %v5336_v49 }
 0x290   :  { %3733 = vmatprep.subr.bf16.mxu0 %v5260_v35  ;;  %3765 = vmatprep.subr.bf16.mxu1 %v5339_v52 }
 0x293   :  { %3735 = vmatpush1.bf16.msra.mxu0 %v5263_v40  ;;  %3767 = vmatpush1.bf16.msra.mxu1 %v5342_v59 }
 0x294   :  { %3737 = vmatprep.subr.bf16.mxu0 %v5266_v41  ;;  %3769 = vmatprep.subr.bf16.mxu1 %v5345_v60 }
 0x297   :  { %3739 = vmatpush1.bf16.msra.mxu0 %v5275_v50  ;;  %3771 = vmatpush1.bf16.msra.mxu1 %v5348_v7 }
 0x298   :  { %3741 = vmatprep.subr.bf16.mxu0 %v5280_v54  ;;  %3773 = vmatprep.subr.bf16.mxu1 %v5351_v8 }
 0x29b   :  { %3743 = vmatpush1.bf16.msra.mxu0 %v5292_v3  ;;  %3775 = vmatpush1.bf16.msra.mxu1 %v5354_v20 }
 0x29c   :  { %3777 = vmatprep.subr.bf16.mxu0 %v5277_v51  ;;  %3841 = vmatprep.subr.bf16.mxu1 %v5357_v21 }
 0x29e   :  { %1077 = vmatmul.mubr.f32.vlgmr.msra.gmra.mrb[6].mxu0 %v5744_v31  ;;  %1148 = vmatmul.mubr.f32.vlgmr.msra.gmra.mrb[10].mxu1 %v5744_v31 }
 0x29f   :  { %3779 = vmatpush1.bf16.msra.mxu0 %v5282_v57  ;;  %3843 = vmatpush1.bf16.msra.mxu1 %v5360_v32 }
 0x2a0   :  { %3781 = vmatprep.subr.bf16.mxu0 %v5289_v63  ;;  %3845 = vmatprep.subr.bf16.mxu1 %v6895_v30 }
 0x2a3   :  { %3783 = vmatpush1.bf16.msra.mxu0 %v6896_v39  ;;  %3847 = vmatpush1.bf16.msra.mxu1 %v6897_v19  ;;  %v6959_v39 = vld [vmem:[#allocation84_spill] sm:$0xff] }
 0x2a4   :  { %3785 = vmatprep.subr.bf16.mxu0 %v6898_v4  ;;  %3849 = vmatprep.subr.bf16.mxu1 %v6899_v14 }
 0x2a7   :  { %3787 = vmatpush1.bf16.msra.mxu0 %v6900_v37  ;;  %3851 = vmatpush1.bf16.msra.mxu1 %v6901_v56 }
 0x2a8   :  { %3789 = vmatprep.subr.bf16.mxu0 %v6902_v5  ;;  %3853 = vmatprep.subr.bf16.mxu1 %v6903_v47  ;;  %v6914_v47 = vld [vmem:[#allocation36_spill] sm:$0xff]  ;;  %v6956_v5 = vld [vmem:[#allocation77_spill] sm:$0xff] }
 0x2ab   :  { %3791 = vmatpush1.bf16.msra.mxu0 %v6904_v58  ;;  %3855 = vmatpush1.bf16.msra.mxu1 %v6905_v38  ;;  %v6915_v58 = vld [vmem:[#allocation37_spill] sm:$0xff]  ;;  %v6916_v38 = vld [vmem:[#allocation38_spill] sm:$0xff] }
 0x2ac   :  { %3793 = vmatprep.subr.bf16.mxu0 %v6906_v27  ;;  %3857 = vmatprep.subr.bf16.mxu1 %v6907_v9  ;;  %v6917_v27 = vld [vmem:[#allocation39_spill] sm:$0xff]  ;;  %v6918_v9 = vld [vmem:[#allocation40_spill] sm:$0xff] }
 0x2af   :  { %3795 = vmatpush1.bf16.msra.mxu0 %v6908_v1  ;;  %3859 = vmatpush1.bf16.msra.mxu1 %v6909_v46  ;;  %v6919_v1 = vld [vmem:[#allocation41_spill] sm:$0xff]  ;;  %v6920_v46 = vld [vmem:[#allocation42_spill] sm:$0xff] }
 0x2b0   :  { %3797 = vmatprep.subr.bf16.mxu0 %v6910_v12  ;;  %3861 = vmatprep.subr.bf16.mxu1 %v6911_v42  ;;  %v6921_v12 = vld [vmem:[#allocation43_spill] sm:$0xff]  ;;  %v6922_v42 = vld [vmem:[#allocation44_spill] sm:$0xff] }
 0x2b3   :  { %3799 = vmatpush1.bf16.msra.mxu0 %v6912_v48  ;;  %3863 = vmatpush1.bf16.msra.mxu1 %v6913_v61  ;;  %v6923_v48 = vld [vmem:[#allocation45_spill] sm:$0xff]  ;;  %v6924_v61 = vld [vmem:[#allocation46_spill] sm:$0xff] }
 0x2b4   :  { %3801 = vmatprep.subr.bf16.mxu0 %v6914_v47  ;;  %3865 = vmatprep.subr.bf16.mxu1 %v6915_v58  ;;  %v6925_v47 = vld [vmem:[#allocation47_spill] sm:$0xff]  ;;  %v6926_v58 = vld [vmem:[#allocation48_spill] sm:$0xff] }
 0x2b7   :  { %3803 = vmatpush1.bf16.msra.mxu0 %v6916_v38  ;;  %3867 = vmatpush1.bf16.msra.mxu1 %v6917_v27  ;;  %v6927_v38 = vld [vmem:[#allocation49_spill] sm:$0xff]  ;;  %v6928_v27 = vld [vmem:[#allocation50_spill] sm:$0xff] }
 0x2b8   :  { %3805 = vmatprep.subr.bf16.mxu0 %v6918_v9  ;;  %3869 = vmatprep.subr.bf16.mxu1 %v6919_v1  ;;  %v6929_v9 = vld [vmem:[#allocation51_spill] sm:$0xff]  ;;  %v6930_v1 = vld [vmem:[#allocation52_spill] sm:$0xff] }
 0x2bb   :  { %3807 = vmatpush1.bf16.msra.mxu0 %v6920_v46  ;;  %3871 = vmatpush1.bf16.msra.mxu1 %v6921_v12  ;;  %v6931_v46 = vld [vmem:[#allocation53_spill] sm:$0xff]  ;;  %v6932_v12 = vld [vmem:[#allocation54_spill] sm:$0xff] }
 0x2bc   :  { %3809 = vmatprep.subr.bf16.mxu0 %v6922_v42  ;;  %3873 = vmatprep.subr.bf16.mxu1 %v6923_v48  ;;  %v6933_v42 = vld [vmem:[#allocation55_spill] sm:$0xff]  ;;  %v6934_v48 = vld [vmem:[#allocation56_spill] sm:$0xff] }
 0x2bf   :  { %3811 = vmatpush1.bf16.msra.mxu0 %v6924_v61  ;;  %3875 = vmatpush1.bf16.msra.mxu1 %v6925_v47  ;;  %v6935_v61 = vld [vmem:[#allocation57_spill] sm:$0xff]  ;;  %v6936_v47 = vld [vmem:[#allocation58_spill] sm:$0xff] }
 0x2c0   :  { %3813 = vmatprep.subr.bf16.mxu0 %v6926_v58  ;;  %3877 = vmatprep.subr.bf16.mxu1 %v6927_v38  ;;  %v6937_v58 = vld [vmem:[#allocation59_spill] sm:$0xff]  ;;  %v6938_v38 = vld [vmem:[#allocation60_spill] sm:$0xff] }
 0x2c3   :  { %3815 = vmatpush1.bf16.msra.mxu0 %v6928_v27  ;;  %3879 = vmatpush1.bf16.msra.mxu1 %v6929_v9  ;;  %v6939_v27 = vld [vmem:[#allocation61_spill] sm:$0xff]  ;;  %v6940_v9 = vld [vmem:[#allocation62_spill] sm:$0xff] }
 0x2c4   :  { %3817 = vmatprep.subr.bf16.mxu0 %v6930_v1  ;;  %3881 = vmatprep.subr.bf16.mxu1 %v6931_v46  ;;  %v6941_v1 = vld [vmem:[#allocation63_spill] sm:$0xff]  ;;  %v6942_v46 = vld [vmem:[#allocation64_spill] sm:$0xff] }
 0x2c7   :  { %3819 = vmatpush1.bf16.msra.mxu0 %v6932_v12  ;;  %3883 = vmatpush1.bf16.msra.mxu1 %v6933_v42  ;;  %v6943_v12 = vld [vmem:[#allocation65_spill] sm:$0xff]  ;;  %v6944_v42 = vld [vmem:[#allocation66_spill] sm:$0xff] }
 0x2c8   :  { %3821 = vmatprep.subr.bf16.mxu0 %v6934_v48  ;;  %3885 = vmatprep.subr.bf16.mxu1 %v6935_v61  ;;  %v6945_v48 = vld [vmem:[#allocation67_spill] sm:$0xff]  ;;  %v6946_v61 = vld [vmem:[#allocation68_spill] sm:$0xff] }
 0x2cb   :  { %3823 = vmatpush1.bf16.msra.mxu0 %v6936_v47  ;;  %3887 = vmatpush1.bf16.msra.mxu1 %v6937_v58  ;;  %v6947_v47 = vld [vmem:[#allocation69_spill] sm:$0xff]  ;;  %v6948_v58 = vld [vmem:[#allocation70_spill] sm:$0xff] }
 0x2cc   :  { %3825 = vmatprep.subr.bf16.mxu0 %v6938_v38  ;;  %3889 = vmatprep.subr.bf16.mxu1 %v6939_v27  ;;  %v6949_v38 = vld [vmem:[#allocation71_spill] sm:$0xff]  ;;  %v6950_v27 = vld [vmem:[#allocation72_spill] sm:$0xff] }
 0x2cf   :  { %3827 = vmatpush1.bf16.msra.mxu0 %v6940_v9  ;;  %3891 = vmatpush1.bf16.msra.mxu1 %v6941_v1  ;;  %v6951_v9 = vld [vmem:[#allocation73_spill] sm:$0xff]  ;;  %v6952_v1 = vld [vmem:[#allocation74_spill] sm:$0xff] }
 0x2d0   :  { %3829 = vmatprep.subr.bf16.mxu0 %v6942_v46  ;;  %3893 = vmatprep.subr.bf16.mxu1 %v6943_v12  ;;  %v6953_v46 = vld [vmem:[#allocation76_spill] sm:$0xff]  ;;  %v6954_v12 = vld [vmem:[#allocation14_spill] sm:$0xff] }
 0x2d3   :  { %3831 = vmatpush1.bf16.msra.mxu0 %v6944_v42  ;;  %3895 = vmatpush1.bf16.msra.mxu1 %v6945_v48  ;;  %v6955_v42 = vld [vmem:[#allocation17_spill] sm:$0xff] }
 0x2d4   :  { %3833 = vmatprep.subr.bf16.mxu0 %v6946_v61  ;;  %3897 = vmatprep.subr.bf16.mxu1 %v6947_v47 }
 0x2d7   :  { %3835 = vmatpush1.bf16.msra.mxu0 %v6948_v58  ;;  %3899 = vmatpush1.bf16.msra.mxu1 %v6949_v38  ;;  %v6957_v38 = vld [vmem:[#allocation80_spill] sm:$0xff] }
 0x2d8   :  { %3837 = vmatprep.subr.bf16.mxu0 %v6950_v27  ;;  %3901 = vmatprep.subr.bf16.mxu1 %v6951_v9 }
 0x2db   :  { %3839 = vmatpush1.bf16.msra.mxu0 %v6952_v1  ;;  %3903 = vmatpush1.bf16.msra.mxu1 %v6953_v46 }
 0x2dc   :  { %3905 = vmatprep.subr.bf16.mxu0 %v6954_v12  ;;  %3937 = vmatprep.subr.bf16.mxu1 %v6955_v42  ;;  %v6958_v12 = vld [vmem:[#allocation83_spill] sm:$0xff] }
 0x351   :  { %v913_v48 = vpop.f32.mrb[4].mxu0  ;;  %v984_v61 = vpop.f32.mrb[8].mxu1 }
 0x352   :  { %v914_v47 = vadd.f32 %v913_v48, %v6956_v5  ;;  %v915_v56 = vpop.f32.mrb[5].mxu0  ;;  %v986_v58 = vpop.f32.mrb[9].mxu1  ;;  %v985_v30 = vadd.f32 %v984_v61, %v6959_v39 }
 0x353   :  { %v916_v14 = vadd.f32 %v915_v56, %v6957_v38  ;;  %v987_v19 = vadd.f32 %v986_v58, %v6958_v12  ;;  %v1157_v5 = vpop.permute.xlu1 %1156 }
 0x354   :  { %v3227_v37 = vmul.f32 -1.442695, %v914_v47  ;;  %v1159_v47 = vmul.f32 %v1157_v5, %v6890_v55  ;;  %v1160_v58 = vmul.f32 %v1157_v5, %v6892_v13 }
 0x355   :  { %v3228_v27 = vmul.f32 -1.442695, %v916_v14 }
 0x356   :  { %4937 = vpow2.f32 %v3227_v37 }
 0x357   :  { %4939 = vpow2.f32 %v3228_v27 }
 0x360   :  { %v4938_v9 = vpop.eup %4937 }
 0x361   :  { %v992_v1 = vadd.f32 1.0, %v4938_v9  ;;  %v4940_v46 = vpop.eup %4939 }
 0x362   :  { %v998_v4 = vadd.f32 1.0, %v4940_v46 }
 0x363   :  { %4941 = vrcp.f32 %v992_v1 }
 0x364   :  { %4943 = vrcp.f32 %v998_v4 }
 0x36d   :  { %v4942_v42 = vpop.eup %4941 }
 0x36e   :  { %v1001_v48 = vmul.f32 %v4942_v42, %v987_v19  ;;  %v4944_v4 = vpop.eup %4943 }
 0x36f   :  { %v1006_v55 = vmul.f32 %v4944_v4, %v5735_v45 }
 0x370   :  { %v1002_v63 = vadd.f32 %v1001_v48, %v985_v30  ;;  %v1004_v30 = vsub.f32 1.0, %v4944_v4 }
 0x371   :  { %v1078_v56 = vpop.f32.mrb[6].mxu0  ;;  %v1149_v37 = vpop.f32.mrb[10].mxu1 }
 0x372   :  { %4945 = vtanh.f32 %v1002_v63  ;;  %v1079_v14 = vadd.f32 %v1078_v56, %v6889_v2  ;;  %v1080_v27 = vpop.f32.mrb[7].mxu0  ;;  %v1151_v9 = vpop.f32.mrb[11].mxu1 }
 0x373   :  { %v1081_v1 = vadd.f32 %v1080_v27, %v6891_v24 }
 0x374   :  { %v1163_v46 = vadd.f32 %v1159_v47, %v1079_v14  ;;  %v6961_v14 = vld [vmem:[#allocation85_spill] sm:$0xff] }
 0x375   :  { %v1164_v61 = vadd.f32 %v1160_v58, %v1081_v1  ;;  %v1152_v1 = vadd.f32 %v1151_v9, %v6961_v14  ;;  %v1150_v58 = vadd.f32 %v1149_v37, %v5582_v62  ;;  %v6965_v37 = vld [vmem:[#allocation19_spill] sm:$0xff] }
 0x376   :  { %v3230_v12 = vmul.f32 -1.442695, %v1163_v46  ;;  %v1161_v46 = vmul.f32 %v1157_v5, %v5588_v53 }
 0x377   :  { %v3231_v19 = vmul.f32 -1.442695, %v1164_v61 }
 0x378   :  { %4947 = vpow2.f32 %v3230_v12  ;;  %v1162_v12 = vmul.f32 %v1157_v5, %v5579_v0  ;;  %v6964_v5 = vld [vmem:[#allocation16_spill] sm:$0xff] }
 0x379   :  { %4949 = vpow2.f32 %v3231_v19  ;;  %v1165_v19 = vadd.f32 %v1161_v46, %v1150_v58  ;;  %v6969_v58 = vld [vmem:[#allocation23_spill] sm:$0xff]  ;;  %v6970_v46 = vld [vmem:[#allocation24_spill] sm:$0xff] }
 0x37a   :  { %v1166_v4 = vadd.f32 %v1162_v12, %v1152_v1  ;;  %v6967_v1 = vld [vmem:[#allocation21_spill] sm:$0xff]  ;;  %v6968_v12 = vld [vmem:[#allocation22_spill] sm:$0xff] }
 0x37c   :  { %v4946_v42 = vpop.eup %4945 }
 0x37d   :  { %v1005_v48 = vmul.f32 %v4946_v42, %v1004_v30 }
 0x37f   :  { %v5857_v63 = vadd.f32 %v1006_v55, %v1005_v48 }
 0x381   :  { %6960 = vst [vmem:[#allocation81_spill] sm:$0xff] %v5857_v63  ;;  %1250 = vmatprep.mubr.f32.mxu0 %v5857_v63  ;;  %1321 = vmatprep.mubr.f32.mxu1 %v5857_v63 }
 0x382   :  { %v4948_v56 = vpop.eup %4947 }
 0x383   :  { %v1170_v27 = vadd.f32 1.0, %v4948_v56  ;;  %v4950_v47 = vpop.eup %4949 }
 0x384   :  { %v1176_v61 = vadd.f32 1.0, %v4950_v47  ;;  %v6966_v47 = vld [vmem:[#allocation20_spill] sm:$0xff] }
 0x385   :  { %4951 = vrcp.f32 %v1170_v27 }
 0x386   :  { %4953 = vrcp.f32 %v1176_v61  ;;  %v6971_v61 = vld [vmem:[#allocation25_spill] sm:$0xff] }
 0x38f   :  { %v4952_v55 = vpop.eup %4951 }
 0x390   :  { %v1179_v30 = vmul.f32 %v4952_v55, %v1166_v4  ;;  %v4954_v48 = vpop.eup %4953  ;;  %v6972_v4 = vld [vmem:[#allocation26_spill] sm:$0xff]  ;;  %v6973_v55 = vld [vmem:[#allocation27_spill] sm:$0xff] }
 0x391   :  { %v1182_v56 = vsub.f32 1.0, %v4954_v48  ;;  %v1184_v9 = vmul.f32 %v4954_v48, %v5744_v31  ;;  %v6962_v31 = vld [vmem:[#allocation15_spill] sm:$0xff] }
 0x392   :  { %v1180_v42 = vadd.f32 %v1179_v30, %v1165_v19  ;;  %v6974_v19 = vld [vmem:[#allocation28_spill] sm:$0xff]  ;;  %v6975_v30 = vld [vmem:[#allocation29_spill] sm:$0xff]  ;;  %v6977_v48 = vld [vmem:[#allocation31_spill] sm:$0xff] }
 0x394   :  { %4955 = vtanh.f32 %v1180_v42  ;;  %v6976_v42 = vld [vmem:[#allocation30_spill] sm:$0xff] }
 0x39e   :  { %v4956_v27 = vpop.eup %4955 }
 0x39f   :  { %v1183_v45 = vmul.f32 %v4956_v27, %v1182_v56  ;;  %v6978_v56 = vld [vmem:[#allocation32_spill] sm:$0xff]  ;;  %v6979_v27 = vld [vmem:[#allocation33_spill] sm:$0xff] }
 0x3a1   :  { %v5866_v14 = vadd.f32 %v1184_v9, %v1183_v45  ;;  %v6963_v45 = vld [vmem:[#allocation18_spill] sm:$0xff] }
 0x3a2   :  { %v6980_v9 = vld [vmem:[#allocation34_spill] sm:$0xff] }
 0x3a3   :  { %1251 = vmatmul.mubr.f32.vlgmr.msra.gmra.mrb[8].mxu0 %v5866_v14  ;;  %1322 = vmatmul.mubr.f32.vlgmr.msra.gmra.mrb[12].mxu1 %v5866_v14 }
 0x3a4   :  { %3907 = vmatpush1.bf16.msra.mxu0 %v5233_v10  ;;  %3939 = vmatpush1.bf16.msra.mxu1 %v5310_v15 }
 0x3a5   :  { %3909 = vmatprep.subr.bf16.mxu0 %v5235_v11  ;;  %3941 = vmatprep.subr.bf16.mxu1 %v5313_v18 }
 0x3a6   :  { %1415 = vmatprep.mubr.f32.mxu0 %v6825_v6  ;;  %1486 = vmatprep.mubr.f32.mxu1 %v6825_v6 }
 0x3a8   :  { %3911 = vmatpush1.bf16.msra.mxu0 %v5239_v16  ;;  %3943 = vmatpush1.bf16.msra.mxu1 %v5317_v25 }
 0x3a9   :  { %3913 = vmatprep.subr.bf16.mxu0 %v5242_v17  ;;  %3945 = vmatprep.subr.bf16.mxu1 %v5321_v26 }
 0x3ac   :  { %3915 = vmatpush1.bf16.msra.mxu0 %v5245_v22  ;;  %3947 = vmatpush1.bf16.msra.mxu1 %v5324_v33 }
 0x3ad   :  { %3917 = vmatprep.subr.bf16.mxu0 %v5248_v23  ;;  %3949 = vmatprep.subr.bf16.mxu1 %v5327_v36 }
 0x3b0   :  { %3919 = vmatpush1.bf16.msra.mxu0 %v5251_v28  ;;  %3951 = vmatpush1.bf16.msra.mxu1 %v5330_v43 }
 0x3b1   :  { %3921 = vmatprep.subr.bf16.mxu0 %v5254_v29  ;;  %3953 = vmatprep.subr.bf16.mxu1 %v5333_v44 }
 0x3b4   :  { %3923 = vmatpush1.bf16.msra.mxu0 %v5257_v34  ;;  %3955 = vmatpush1.bf16.msra.mxu1 %v5336_v49 }
 0x3b5   :  { %3925 = vmatprep.subr.bf16.mxu0 %v5260_v35  ;;  %3957 = vmatprep.subr.bf16.mxu1 %v5339_v52 }
 0x3b8   :  { %3927 = vmatpush1.bf16.msra.mxu0 %v5263_v40  ;;  %3959 = vmatpush1.bf16.msra.mxu1 %v5342_v59 }
 0x3b9   :  { %3929 = vmatprep.subr.bf16.mxu0 %v5266_v41  ;;  %3961 = vmatprep.subr.bf16.mxu1 %v5345_v60 }
 0x3bc   :  { %3931 = vmatpush1.bf16.msra.mxu0 %v5275_v50  ;;  %3963 = vmatpush1.bf16.msra.mxu1 %v5348_v7 }
 0x3bd   :  { %3933 = vmatprep.subr.bf16.mxu0 %v5280_v54  ;;  %3965 = vmatprep.subr.bf16.mxu1 %v5351_v8 }
 0x3c0   :  { %3935 = vmatpush1.bf16.msra.mxu0 %v5292_v3  ;;  %3967 = vmatpush1.bf16.msra.mxu1 %v5354_v20 }
 0x3c1   :  { %3969 = vmatprep.subr.bf16.mxu0 %v5277_v51  ;;  %4033 = vmatprep.subr.bf16.mxu1 %v5357_v21 }
 0x3c3   :  { %1416 = vmatmul.mubr.f32.vlgmr.msra.gmra.mrb[10].mxu0 %v5866_v14  ;;  %1487 = vmatmul.mubr.f32.vlgmr.msra.gmra.mrb[14].mxu1 %v5866_v14 }
 0x3c4   :  { %3971 = vmatpush1.bf16.msra.mxu0 %v5282_v57  ;;  %4035 = vmatpush1.bf16.msra.mxu1 %v5360_v32 }
 0x3c5   :  { %3973 = vmatprep.subr.bf16.mxu0 %v6962_v31  ;;  %4037 = vmatprep.subr.bf16.mxu1 %v6963_v45 }
 0x3c8   :  { %3975 = vmatpush1.bf16.msra.mxu0 %v6964_v5  ;;  %4039 = vmatpush1.bf16.msra.mxu1 %v6965_v37 }
 0x3c9   :  { %3977 = vmatprep.subr.bf16.mxu0 %v6966_v47  ;;  %4041 = vmatprep.subr.bf16.mxu1 %v6967_v1 }
 0x3cc   :  { %3979 = vmatpush1.bf16.msra.mxu0 %v6968_v12  ;;  %4043 = vmatpush1.bf16.msra.mxu1 %v6969_v58  ;;  %v7024_v58 = vld [vmem:[#allocation77_spill] sm:$0xff] }
 0x3cd   :  { %3981 = vmatprep.subr.bf16.mxu0 %v6970_v46  ;;  %4045 = vmatprep.subr.bf16.mxu1 %v6971_v61  ;;  %v6981_v46 = vld [vmem:[#allocation35_spill] sm:$0xff]  ;;  %v6982_v61 = vld [vmem:[#allocation36_spill] sm:$0xff] }
 0x3d0   :  { %3983 = vmatpush1.bf16.msra.mxu0 %v6972_v4  ;;  %4047 = vmatpush1.bf16.msra.mxu1 %v6973_v55  ;;  %v6983_v4 = vld [vmem:[#allocation37_spill] sm:$0xff]  ;;  %v6984_v55 = vld [vmem:[#allocation38_spill] sm:$0xff] }
 0x3d1   :  { %3985 = vmatprep.subr.bf16.mxu0 %v6974_v19  ;;  %4049 = vmatprep.subr.bf16.mxu1 %v6975_v30  ;;  %v6985_v19 = vld [vmem:[#allocation39_spill] sm:$0xff]  ;;  %v6986_v30 = vld [vmem:[#allocation40_spill] sm:$0xff] }
 0x3d4   :  { %3987 = vmatpush1.bf16.msra.mxu0 %v6976_v42  ;;  %4051 = vmatpush1.bf16.msra.mxu1 %v6977_v48  ;;  %v6987_v42 = vld [vmem:[#allocation41_spill] sm:$0xff]  ;;  %v6988_v48 = vld [vmem:[#allocation42_spill] sm:$0xff] }
 0x3d5   :  { %3989 = vmatprep.subr.bf16.mxu0 %v6978_v56  ;;  %4053 = vmatprep.subr.bf16.mxu1 %v6979_v27  ;;  %v6989_v56 = vld [vmem:[#allocation43_spill] sm:$0xff]  ;;  %v6990_v27 = vld [vmem:[#allocation44_spill] sm:$0xff] }
 0x3d8   :  { %3991 = vmatpush1.bf16.msra.mxu0 %v6980_v9  ;;  %4055 = vmatpush1.bf16.msra.mxu1 %v6981_v46  ;;  %v6991_v9 = vld [vmem:[#allocation45_spill] sm:$0xff]  ;;  %v6992_v46 = vld [vmem:[#allocation46_spill] sm:$0xff] }
 0x3d9   :  { %3993 = vmatprep.subr.bf16.mxu0 %v6982_v61  ;;  %4057 = vmatprep.subr.bf16.mxu1 %v6983_v4  ;;  %v6993_v61 = vld [vmem:[#allocation47_spill] sm:$0xff]  ;;  %v6994_v4 = vld [vmem:[#allocation48_spill] sm:$0xff] }
 0x3dc   :  { %3995 = vmatpush1.bf16.msra.mxu0 %v6984_v55  ;;  %4059 = vmatpush1.bf16.msra.mxu1 %v6985_v19  ;;  %v6995_v55 = vld [vmem:[#allocation49_spill] sm:$0xff]  ;;  %v6996_v19 = vld [vmem:[#allocation50_spill] sm:$0xff] }
 0x3dd   :  { %3997 = vmatprep.subr.bf16.mxu0 %v6986_v30  ;;  %4061 = vmatprep.subr.bf16.mxu1 %v6987_v42  ;;  %v6997_v30 = vld [vmem:[#allocation51_spill] sm:$0xff]  ;;  %v6998_v42 = vld [vmem:[#allocation52_spill] sm:$0xff] }
 0x3e0   :  { %3999 = vmatpush1.bf16.msra.mxu0 %v6988_v48  ;;  %4063 = vmatpush1.bf16.msra.mxu1 %v6989_v56  ;;  %v6999_v48 = vld [vmem:[#allocation53_spill] sm:$0xff]  ;;  %v7000_v56 = vld [vmem:[#allocation54_spill] sm:$0xff] }
 0x3e1   :  { %4001 = vmatprep.subr.bf16.mxu0 %v6990_v27  ;;  %4065 = vmatprep.subr.bf16.mxu1 %v6991_v9  ;;  %v7001_v27 = vld [vmem:[#allocation55_spill] sm:$0xff]  ;;  %v7002_v9 = vld [vmem:[#allocation56_spill] sm:$0xff] }
 0x3e4   :  { %4003 = vmatpush1.bf16.msra.mxu0 %v6992_v46  ;;  %4067 = vmatpush1.bf16.msra.mxu1 %v6993_v61  ;;  %v7003_v46 = vld [vmem:[#allocation57_spill] sm:$0xff]  ;;  %v7004_v61 = vld [vmem:[#allocation58_spill] sm:$0xff] }
 0x3e5   :  { %4005 = vmatprep.subr.bf16.mxu0 %v6994_v4  ;;  %4069 = vmatprep.subr.bf16.mxu1 %v6995_v55  ;;  %v7005_v4 = vld [vmem:[#allocation59_spill] sm:$0xff]  ;;  %v7006_v55 = vld [vmem:[#allocation60_spill] sm:$0xff] }
 0x3e8   :  { %4007 = vmatpush1.bf16.msra.mxu0 %v6996_v19  ;;  %4071 = vmatpush1.bf16.msra.mxu1 %v6997_v30  ;;  %v7007_v19 = vld [vmem:[#allocation61_spill] sm:$0xff]  ;;  %v7008_v30 = vld [vmem:[#allocation62_spill] sm:$0xff] }
 0x3e9   :  { %4009 = vmatprep.subr.bf16.mxu0 %v6998_v42  ;;  %4073 = vmatprep.subr.bf16.mxu1 %v6999_v48  ;;  %v7009_v42 = vld [vmem:[#allocation63_spill] sm:$0xff]  ;;  %v7010_v48 = vld [vmem:[#allocation64_spill] sm:$0xff] }
 0x3ec   :  { %4011 = vmatpush1.bf16.msra.mxu0 %v7000_v56  ;;  %4075 = vmatpush1.bf16.msra.mxu1 %v7001_v27  ;;  %v7011_v56 = vld [vmem:[#allocation65_spill] sm:$0xff]  ;;  %v7012_v27 = vld [vmem:[#allocation66_spill] sm:$0xff] }
 0x3ed   :  { %4013 = vmatprep.subr.bf16.mxu0 %v7002_v9  ;;  %4077 = vmatprep.subr.bf16.mxu1 %v7003_v46  ;;  %v7013_v9 = vld [vmem:[#allocation67_spill] sm:$0xff]  ;;  %v7014_v46 = vld [vmem:[#allocation68_spill] sm:$0xff] }
 0x3f0   :  { %4015 = vmatpush1.bf16.msra.mxu0 %v7004_v61  ;;  %4079 = vmatpush1.bf16.msra.mxu1 %v7005_v4  ;;  %v7015_v61 = vld [vmem:[#allocation69_spill] sm:$0xff]  ;;  %v7016_v4 = vld [vmem:[#allocation70_spill] sm:$0xff] }
 0x3f1   :  { %4017 = vmatprep.subr.bf16.mxu0 %v7006_v55  ;;  %4081 = vmatprep.subr.bf16.mxu1 %v7007_v19  ;;  %v7017_v55 = vld [vmem:[#allocation71_spill] sm:$0xff]  ;;  %v7018_v19 = vld [vmem:[#allocation72_spill] sm:$0xff] }
 0x3f4   :  { %4019 = vmatpush1.bf16.msra.mxu0 %v7008_v30  ;;  %4083 = vmatpush1.bf16.msra.mxu1 %v7009_v42  ;;  %v7019_v30 = vld [vmem:[#allocation73_spill] sm:$0xff]  ;;  %v7020_v42 = vld [vmem:[#allocation74_spill] sm:$0xff] }
 0x3f5   :  { %4021 = vmatprep.subr.bf16.mxu0 %v7010_v48  ;;  %4085 = vmatprep.subr.bf16.mxu1 %v7011_v56  ;;  %v7021_v48 = vld [vmem:[#allocation76_spill] sm:$0xff]  ;;  %v7022_v56 = vld [vmem:[#allocation14_spill] sm:$0xff] }
 0x3f8   :  { %4023 = vmatpush1.bf16.msra.mxu0 %v7012_v27  ;;  %4087 = vmatpush1.bf16.msra.mxu1 %v7013_v9  ;;  %v7023_v27 = vld [vmem:[#allocation17_spill] sm:$0xff] }
 0x3f9   :  { %4025 = vmatprep.subr.bf16.mxu0 %v7014_v46  ;;  %4089 = vmatprep.subr.bf16.mxu1 %v7015_v61 }
 0x3fc   :  { %4027 = vmatpush1.bf16.msra.mxu0 %v7016_v4  ;;  %4091 = vmatpush1.bf16.msra.mxu1 %v7017_v55 }
 0x3fd   :  { %4029 = vmatprep.subr.bf16.mxu0 %v7018_v19  ;;  %4093 = vmatprep.subr.bf16.mxu1 %v7019_v30 }
 0x400   :  { %4031 = vmatpush1.bf16.msra.mxu0 %v7020_v42  ;;  %4095 = vmatpush1.bf16.msra.mxu1 %v7021_v48 }
 0x401   :  { %4097 = vmatprep.subr.bf16.mxu0 %v7022_v56  ;;  %4129 = vmatprep.subr.bf16.mxu1 %v7023_v27  ;;  %v7025_v56 = vld [vmem:[#allocation83_spill] sm:$0xff] }
 0x476   :  { %v1252_v9 = vpop.f32.mrb[8].mxu0  ;;  %v1323_v46 = vpop.f32.mrb[12].mxu1 }
 0x477   :  { %v1253_v61 = vadd.f32 %v1252_v9, %v7024_v58  ;;  %v1254_v12 = vpop.f32.mrb[9].mxu0  ;;  %v1325_v4 = vpop.f32.mrb[13].mxu1  ;;  %v1324_v5 = vadd.f32 %v1323_v46, %v6959_v39 }
 0x478   :  { %v1255_v55 = vadd.f32 %v1254_v12, %v6957_v38  ;;  %v1326_v37 = vadd.f32 %v1325_v4, %v7025_v56  ;;  %v1496_v58 = vpop.permute.xlu1 %1495  ;;  %v7026_v12 = vld [vmem:[#allocation78_spill] sm:$0xff] }
 0x479   :  { %v3232_v1 = vmul.f32 -1.442695, %v1253_v61  ;;  %v1499_v4 = vmul.f32 %v1496_v58, %v6892_v13 }
 0x47a   :  { %v3233_v19 = vmul.f32 -1.442695, %v1255_v55  ;;  %v1498_v55 = vmul.f32 %v1496_v58, %v7026_v12 }
 0x47b   :  { %4957 = vpow2.f32 %v3232_v1 }
 0x47c   :  { %4959 = vpow2.f32 %v3233_v19 }
 0x485   :  { %v4958_v30 = vpop.eup %4957 }
 0x486   :  { %v1331_v42 = vadd.f32 1.0, %v4958_v30  ;;  %v4960_v48 = vpop.eup %4959 }
 0x487   :  { %v1337_v47 = vadd.f32 1.0, %v4960_v48 }
 0x488   :  { %4961 = vrcp.f32 %v1331_v42 }
 0x489   :  { %4963 = vrcp.f32 %v1337_v47 }
 0x492   :  { %v4962_v27 = vpop.eup %4961 }
 0x493   :  { %v1340_v9 = vmul.f32 %v4962_v27, %v1326_v37  ;;  %v4964_v47 = vpop.eup %4963 }
 0x495   :  { %v1341_v45 = vadd.f32 %v1340_v9, %v1324_v5  ;;  %v1343_v5 = vsub.f32 1.0, %v4964_v47 }
 0x496   :  { %v1417_v61 = vpop.f32.mrb[10].mxu0  ;;  %v1488_v31 = vpop.f32.mrb[14].mxu1 }
 0x497   :  { %4965 = vtanh.f32 %v1341_v45  ;;  %v1418_v1 = vadd.f32 %v1417_v61, %v6889_v2  ;;  %v1419_v19 = vpop.f32.mrb[11].mxu0  ;;  %v1490_v30 = vpop.f32.mrb[15].mxu1  ;;  %v1345_v45 = vmul.f32 %v4964_v47, %v5857_v63  ;;  %v1500_v47 = vmul.f32 %v1496_v58, %v5588_v53 }
 0x498   :  { %v1420_v42 = vadd.f32 %v1419_v19, %v6891_v24 }
 0x499   :  { %v1502_v48 = vadd.f32 %v1498_v55, %v1418_v1 }
 0x49a   :  { %v1503_v46 = vadd.f32 %v1499_v4, %v1420_v42  ;;  %v7028_v42 = vld [vmem:[#allocation85_spill] sm:$0xff] }
 0x49b   :  { %v3235_v56 = vmul.f32 -1.442695, %v1502_v48  ;;  %v1491_v48 = vadd.f32 %v1490_v30, %v7028_v42 }
 0x49c   :  { %v3236_v37 = vmul.f32 -1.442695, %v1503_v46  ;;  %v1501_v46 = vmul.f32 %v1496_v58, %v5579_v0  ;;  %v7032_v58 = vld [vmem:[#allocation19_spill] sm:$0xff] }
 0x49d   :  { %4967 = vpow2.f32 %v3235_v56  ;;  %v1489_v56 = vadd.f32 %v1488_v31, %v5582_v62  ;;  %v7031_v31 = vld [vmem:[#allocation16_spill] sm:$0xff] }
 0x49e   :  { %4969 = vpow2.f32 %v3236_v37  ;;  %v1505_v37 = vadd.f32 %v1501_v46, %v1491_v48  ;;  %v7035_v48 = vld [vmem:[#allocation22_spill] sm:$0xff]  ;;  %v7038_v46 = vld [vmem:[#allocation25_spill] sm:$0xff] }
 0x4a1   :  { %v4966_v27 = vpop.eup %4965 }
 0x4a2   :  { %v1344_v9 = vmul.f32 %v4966_v27, %v1343_v5  ;;  %v1504_v27 = vadd.f32 %v1500_v47, %v1489_v56  ;;  %v7036_v56 = vld [vmem:[#allocation23_spill] sm:$0xff]  ;;  %v7039_v47 = vld [vmem:[#allocation26_spill] sm:$0xff] }
 0x4a4   :  { %v5979_v61 = vadd.f32 %v1345_v45, %v1344_v9 }
 0x4a6   :  { %7027 = vst [vmem:[#allocation82_spill] sm:$0xff] %v5979_v61  ;;  %1589 = vmatprep.mubr.f32.mxu0 %v5979_v61  ;;  %1660 = vmatprep.mubr.f32.mxu1 %v5979_v61 }
 0x4a7   :  { %v4968_v1 = vpop.eup %4967 }
 0x4a8   :  { %v1509_v55 = vadd.f32 1.0, %v4968_v1  ;;  %v4970_v19 = vpop.eup %4969 }
 0x4a9   :  { %v1515_v4 = vadd.f32 1.0, %v4970_v19  ;;  %v7034_v19 = vld [vmem:[#allocation21_spill] sm:$0xff] }
 0x4aa   :  { %4971 = vrcp.f32 %v1509_v55 }
 0x4ab   :  { %4973 = vrcp.f32 %v1515_v4  ;;  %v7037_v4 = vld [vmem:[#allocation24_spill] sm:$0xff] }
 0x4b4   :  { %v4972_v5 = vpop.eup %4971 }
 0x4b5   :  { %v1518_v9 = vmul.f32 %v4972_v5, %v1505_v37  ;;  %v4974_v63 = vpop.eup %4973  ;;  %v7040_v37 = vld [vmem:[#allocation27_spill] sm:$0xff]  ;;  %v7041_v5 = vld [vmem:[#allocation28_spill] sm:$0xff] }
 0x4b6   :  { %v1521_v1 = vsub.f32 1.0, %v4974_v63  ;;  %v1523_v30 = vmul.f32 %v4974_v63, %v5866_v14  ;;  %v7029_v63 = vld [vmem:[#allocation15_spill] sm:$0xff]  ;;  %v7030_v14 = vld [vmem:[#allocation18_spill] sm:$0xff] }
 0x4b7   :  { %v1519_v45 = vadd.f32 %v1518_v9, %v1504_v27  ;;  %v7042_v27 = vld [vmem:[#allocation29_spill] sm:$0xff]  ;;  %v7043_v9 = vld [vmem:[#allocation30_spill] sm:$0xff] }
 0x4b9   :  { %4975 = vtanh.f32 %v1519_v45  ;;  %v7044_v45 = vld [vmem:[#allocation31_spill] sm:$0xff] }
 0x4c3   :  { %v4976_v55 = vpop.eup %4975 }
 0x4c4   :  { %v1522_v61 = vmul.f32 %v4976_v55, %v1521_v1  ;;  %v7045_v1 = vld [vmem:[#allocation32_spill] sm:$0xff]  ;;  %v7046_v55 = vld [vmem:[#allocation33_spill] sm:$0xff] }
 0x4c6   :  { %v5988_v42 = vadd.f32 %v1523_v30, %v1522_v61  ;;  %v7033_v61 = vld [vmem:[#allocation20_spill] sm:$0xff]  ;;  %v7047_v30 = vld [vmem:[#allocation34_spill] sm:$0xff] }
 0x4c8   :  { %1590 = vmatmul.mubr.f32.vlgmr.msra.gmra.mrb[12].mxu0 %v5988_v42  ;;  %1661 = vmatmul.mubr.f32.vlgmr.msra.gmra.mrb[16].mxu1 %v5988_v42 }
 0x4c9   :  { %4099 = vmatpush1.bf16.msra.mxu0 %v5233_v10  ;;  %4131 = vmatpush1.bf16.msra.mxu1 %v5310_v15 }
 0x4ca   :  { %4101 = vmatprep.subr.bf16.mxu0 %v5235_v11  ;;  %4133 = vmatprep.subr.bf16.mxu1 %v5313_v18 }
 0x4cb   :  { %1754 = vmatprep.mubr.f32.mxu0 %v6825_v6  ;;  %1825 = vmatprep.mubr.f32.mxu1 %v6825_v6 }
 0x4cd   :  { %4103 = vmatpush1.bf16.msra.mxu0 %v5239_v16  ;;  %4135 = vmatpush1.bf16.msra.mxu1 %v5317_v25 }
 0x4ce   :  { %4105 = vmatprep.subr.bf16.mxu0 %v5242_v17  ;;  %4137 = vmatprep.subr.bf16.mxu1 %v5321_v26 }
 0x4d1   :  { %4107 = vmatpush1.bf16.msra.mxu0 %v5245_v22  ;;  %4139 = vmatpush1.bf16.msra.mxu1 %v5324_v33 }
 0x4d2   :  { %4109 = vmatprep.subr.bf16.mxu0 %v5248_v23  ;;  %4141 = vmatprep.subr.bf16.mxu1 %v5327_v36 }
 0x4d5   :  { %4111 = vmatpush1.bf16.msra.mxu0 %v5251_v28  ;;  %4143 = vmatpush1.bf16.msra.mxu1 %v5330_v43 }
 0x4d6   :  { %4113 = vmatprep.subr.bf16.mxu0 %v5254_v29  ;;  %4145 = vmatprep.subr.bf16.mxu1 %v5333_v44 }
 0x4d9   :  { %4115 = vmatpush1.bf16.msra.mxu0 %v5257_v34  ;;  %4147 = vmatpush1.bf16.msra.mxu1 %v5336_v49 }
 0x4da   :  { %4117 = vmatprep.subr.bf16.mxu0 %v5260_v35  ;;  %4149 = vmatprep.subr.bf16.mxu1 %v5339_v52 }
 0x4dd   :  { %4119 = vmatpush1.bf16.msra.mxu0 %v5263_v40  ;;  %4151 = vmatpush1.bf16.msra.mxu1 %v5342_v59 }
 0x4de   :  { %4121 = vmatprep.subr.bf16.mxu0 %v5266_v41  ;;  %4153 = vmatprep.subr.bf16.mxu1 %v5345_v60 }
 0x4e1   :  { %4123 = vmatpush1.bf16.msra.mxu0 %v5275_v50  ;;  %4155 = vmatpush1.bf16.msra.mxu1 %v5348_v7 }
 0x4e2   :  { %4125 = vmatprep.subr.bf16.mxu0 %v5280_v54  ;;  %4157 = vmatprep.subr.bf16.mxu1 %v5351_v8 }
 0x4e5   :  { %4127 = vmatpush1.bf16.msra.mxu0 %v5292_v3  ;;  %4159 = vmatpush1.bf16.msra.mxu1 %v5354_v20 }
 0x4e6   :  { %4161 = vmatprep.subr.bf16.mxu0 %v5277_v51  ;;  %4225 = vmatprep.subr.bf16.mxu1 %v5357_v21 }
 0x4e8   :  { %1755 = vmatmul.mubr.f32.vlgmr.msra.gmra.mrb[14].mxu0 %v5988_v42  ;;  %1826 = vmatmul.mubr.f32.vlgmr.msra.gmra.mrb[18].mxu1 %v5988_v42 }
 0x4e9   :  { %4163 = vmatpush1.bf16.msra.mxu0 %v5282_v57  ;;  %4227 = vmatpush1.bf16.msra.mxu1 %v5360_v32 }
 0x4ea   :  { %4165 = vmatprep.subr.bf16.mxu0 %v7029_v63  ;;  %4229 = vmatprep.subr.bf16.mxu1 %v7030_v14 }
 0x4ed   :  { %4167 = vmatpush1.bf16.msra.mxu0 %v7031_v31  ;;  %4231 = vmatpush1.bf16.msra.mxu1 %v7032_v58 }
 0x4ee   :  { %4169 = vmatprep.subr.bf16.mxu0 %v7033_v61  ;;  %4233 = vmatprep.subr.bf16.mxu1 %v7034_v19 }
 0x4f1   :  { %4171 = vmatpush1.bf16.msra.mxu0 %v7035_v48  ;;  %4235 = vmatpush1.bf16.msra.mxu1 %v7036_v56  ;;  %v7091_v56 = vld [vmem:[#allocation77_spill] sm:$0xff] }
 0x4f2   :  { %4173 = vmatprep.subr.bf16.mxu0 %v7037_v4  ;;  %4237 = vmatprep.subr.bf16.mxu1 %v7038_v46  ;;  %v7048_v4 = vld [vmem:[#allocation35_spill] sm:$0xff]  ;;  %v7049_v46 = vld [vmem:[#allocation36_spill] sm:$0xff] }
 0x4f5   :  { %4175 = vmatpush1.bf16.msra.mxu0 %v7039_v47  ;;  %4239 = vmatpush1.bf16.msra.mxu1 %v7040_v37  ;;  %v7050_v47 = vld [vmem:[#allocation37_spill] sm:$0xff]  ;;  %v7051_v37 = vld [vmem:[#allocation38_spill] sm:$0xff] }
 0x4f6   :  { %4177 = vmatprep.subr.bf16.mxu0 %v7041_v5  ;;  %4241 = vmatprep.subr.bf16.mxu1 %v7042_v27  ;;  %v7052_v5 = vld [vmem:[#allocation39_spill] sm:$0xff]  ;;  %v7053_v27 = vld [vmem:[#allocation40_spill] sm:$0xff] }
 0x4f9   :  { %4179 = vmatpush1.bf16.msra.mxu0 %v7043_v9  ;;  %4243 = vmatpush1.bf16.msra.mxu1 %v7044_v45  ;;  %v7054_v9 = vld [vmem:[#allocation41_spill] sm:$0xff]  ;;  %v7055_v45 = vld [vmem:[#allocation42_spill] sm:$0xff] }
 0x4fa   :  { %4181 = vmatprep.subr.bf16.mxu0 %v7045_v1  ;;  %4245 = vmatprep.subr.bf16.mxu1 %v7046_v55  ;;  %v7056_v1 = vld [vmem:[#allocation43_spill] sm:$0xff]  ;;  %v7057_v55 = vld [vmem:[#allocation44_spill] sm:$0xff] }
 0x4fd   :  { %4183 = vmatpush1.bf16.msra.mxu0 %v7047_v30  ;;  %4247 = vmatpush1.bf16.msra.mxu1 %v7048_v4  ;;  %v7058_v30 = vld [vmem:[#allocation45_spill] sm:$0xff]  ;;  %v7059_v4 = vld [vmem:[#allocation46_spill] sm:$0xff] }
 0x4fe   :  { %4185 = vmatprep.subr.bf16.mxu0 %v7049_v46  ;;  %4249 = vmatprep.subr.bf16.mxu1 %v7050_v47  ;;  %v7060_v46 = vld [vmem:[#allocation47_spill] sm:$0xff]  ;;  %v7061_v47 = vld [vmem:[#allocation48_spill] sm:$0xff] }
 0x501   :  { %4187 = vmatpush1.bf16.msra.mxu0 %v7051_v37  ;;  %4251 = vmatpush1.bf16.msra.mxu1 %v7052_v5  ;;  %v7062_v37 = vld [vmem:[#allocation49_spill] sm:$0xff]  ;;  %v7063_v5 = vld [vmem:[#allocation50_spill] sm:$0xff] }
 0x502   :  { %4189 = vmatprep.subr.bf16.mxu0 %v7053_v27  ;;  %4253 = vmatprep.subr.bf16.mxu1 %v7054_v9  ;;  %v7064_v27 = vld [vmem:[#allocation51_spill] sm:$0xff]  ;;  %v7065_v9 = vld [vmem:[#allocation52_spill] sm:$0xff] }
 0x505   :  { %4191 = vmatpush1.bf16.msra.mxu0 %v7055_v45  ;;  %4255 = vmatpush1.bf16.msra.mxu1 %v7056_v1  ;;  %v7066_v45 = vld [vmem:[#allocation53_spill] sm:$0xff]  ;;  %v7067_v1 = vld [vmem:[#allocation54_spill] sm:$0xff] }
 0x506   :  { %4193 = vmatprep.subr.bf16.mxu0 %v7057_v55  ;;  %4257 = vmatprep.subr.bf16.mxu1 %v7058_v30  ;;  %v7068_v55 = vld [vmem:[#allocation55_spill] sm:$0xff]  ;;  %v7069_v30 = vld [vmem:[#allocation56_spill] sm:$0xff] }
 0x509   :  { %4195 = vmatpush1.bf16.msra.mxu0 %v7059_v4  ;;  %4259 = vmatpush1.bf16.msra.mxu1 %v7060_v46  ;;  %v7070_v4 = vld [vmem:[#allocation57_spill] sm:$0xff]  ;;  %v7071_v46 = vld [vmem:[#allocation58_spill] sm:$0xff] }
 0x50a   :  { %4197 = vmatprep.subr.bf16.mxu0 %v7061_v47  ;;  %4261 = vmatprep.subr.bf16.mxu1 %v7062_v37  ;;  %v7072_v47 = vld [vmem:[#allocation59_spill] sm:$0xff]  ;;  %v7073_v37 = vld [vmem:[#allocation60_spill] sm:$0xff] }
 0x50d   :  { %4199 = vmatpush1.bf16.msra.mxu0 %v7063_v5  ;;  %4263 = vmatpush1.bf16.msra.mxu1 %v7064_v27  ;;  %v7074_v5 = vld [vmem:[#allocation61_spill] sm:$0xff]  ;;  %v7075_v27 = vld [vmem:[#allocation62_spill] sm:$0xff] }
 0x50e   :  { %4201 = vmatprep.subr.bf16.mxu0 %v7065_v9  ;;  %4265 = vmatprep.subr.bf16.mxu1 %v7066_v45  ;;  %v7076_v9 = vld [vmem:[#allocation63_spill] sm:$0xff]  ;;  %v7077_v45 = vld [vmem:[#allocation64_spill] sm:$0xff] }
 0x511   :  { %4203 = vmatpush1.bf16.msra.mxu0 %v7067_v1  ;;  %4267 = vmatpush1.bf16.msra.mxu1 %v7068_v55  ;;  %v7078_v1 = vld [vmem:[#allocation65_spill] sm:$0xff]  ;;  %v7079_v55 = vld [vmem:[#allocation66_spill] sm:$0xff] }
 0x512   :  { %4205 = vmatprep.subr.bf16.mxu0 %v7069_v30  ;;  %4269 = vmatprep.subr.bf16.mxu1 %v7070_v4  ;;  %v7080_v30 = vld [vmem:[#allocation67_spill] sm:$0xff]  ;;  %v7081_v4 = vld [vmem:[#allocation68_spill] sm:$0xff] }
 0x515   :  { %4207 = vmatpush1.bf16.msra.mxu0 %v7071_v46  ;;  %4271 = vmatpush1.bf16.msra.mxu1 %v7072_v47  ;;  %v7082_v46 = vld [vmem:[#allocation69_spill] sm:$0xff]  ;;  %v7083_v47 = vld [vmem:[#allocation70_spill] sm:$0xff] }
 0x516   :  { %4209 = vmatprep.subr.bf16.mxu0 %v7073_v37  ;;  %4273 = vmatprep.subr.bf16.mxu1 %v7074_v5  ;;  %v7084_v37 = vld [vmem:[#allocation71_spill] sm:$0xff]  ;;  %v7085_v5 = vld [vmem:[#allocation72_spill] sm:$0xff] }
 0x519   :  { %4211 = vmatpush1.bf16.msra.mxu0 %v7075_v27  ;;  %4275 = vmatpush1.bf16.msra.mxu1 %v7076_v9  ;;  %v7086_v27 = vld [vmem:[#allocation73_spill] sm:$0xff]  ;;  %v7087_v9 = vld [vmem:[#allocation74_spill] sm:$0xff] }
 0x51a   :  { %4213 = vmatprep.subr.bf16.mxu0 %v7077_v45  ;;  %4277 = vmatprep.subr.bf16.mxu1 %v7078_v1  ;;  %v7088_v45 = vld [vmem:[#allocation76_spill] sm:$0xff]  ;;  %v7089_v1 = vld [vmem:[#allocation14_spill] sm:$0xff] }
 0x51d   :  { %4215 = vmatpush1.bf16.msra.mxu0 %v7079_v55  ;;  %4279 = vmatpush1.bf16.msra.mxu1 %v7080_v30  ;;  %v7090_v55 = vld [vmem:[#allocation17_spill] sm:$0xff] }
 0x51e   :  { %4217 = vmatprep.subr.bf16.mxu0 %v7081_v4  ;;  %4281 = vmatprep.subr.bf16.mxu1 %v7082_v46 }
 0x521   :  { %4219 = vmatpush1.bf16.msra.mxu0 %v7083_v47  ;;  %4283 = vmatpush1.bf16.msra.mxu1 %v7084_v37 }
 0x522   :  { %4221 = vmatprep.subr.bf16.mxu0 %v7085_v5  ;;  %4285 = vmatprep.subr.bf16.mxu1 %v7086_v27 }
 0x525   :  { %4223 = vmatpush1.bf16.msra.mxu0 %v7087_v9  ;;  %4287 = vmatpush1.bf16.msra.mxu1 %v7088_v45 }
 0x526   :  { %4289 = vmatprep.subr.bf16.mxu0 %v7089_v1  ;;  %4321 = vmatprep.subr.bf16.mxu1 %v7090_v55  ;;  %v7092_v1 = vld [vmem:[#allocation83_spill] sm:$0xff] }
 0x59b   :  { %v1591_v30 = vpop.f32.mrb[12].mxu0  ;;  %v1662_v4 = vpop.f32.mrb[16].mxu1 }
 0x59c   :  { %v1592_v46 = vadd.f32 %v1591_v30, %v7091_v56  ;;  %v1593_v48 = vpop.f32.mrb[13].mxu0  ;;  %v1664_v47 = vpop.f32.mrb[17].mxu1  ;;  %v1663_v31 = vadd.f32 %v1662_v4, %v6959_v39 }
 0x59d   :  { %v1594_v37 = vadd.f32 %v1593_v48, %v6957_v38  ;;  %v1665_v58 = vadd.f32 %v1664_v47, %v7092_v1  ;;  %v1835_v56 = vpop.permute.xlu0 %1834 }
 0x59e   :  { %v3237_v19 = vmul.f32 -1.442695, %v1592_v46  ;;  %v1837_v48 = vmul.f32 %v1835_v56, %v7026_v12  ;;  %v1838_v47 = vmul.f32 %v1835_v56, %v6892_v13 }
 0x59f   :  { %v3238_v5 = vmul.f32 -1.442695, %v1594_v37 }
 0x5a0   :  { %4977 = vpow2.f32 %v3237_v19 }
 0x5a1   :  { %4979 = vpow2.f32 %v3238_v5 }
 0x5aa   :  { %v4978_v27 = vpop.eup %4977 }
 0x5ab   :  { %v1670_v9 = vadd.f32 1.0, %v4978_v27  ;;  %v4980_v45 = vpop.eup %4979 }
 0x5ac   :  { %v1676_v61 = vadd.f32 1.0, %v4980_v45 }
 0x5ad   :  { %4981 = vrcp.f32 %v1670_v9 }
 0x5ae   :  { %4983 = vrcp.f32 %v1676_v61 }
 0x5b7   :  { %v4982_v55 = vpop.eup %4981 }
 0x5b8   :  { %v1679_v30 = vmul.f32 %v4982_v55, %v1665_v58  ;;  %v4984_v61 = vpop.eup %4983 }
 0x5ba   :  { %v1680_v14 = vadd.f32 %v1679_v30, %v1663_v31  ;;  %v1682_v31 = vsub.f32 1.0, %v4984_v61 }
 0x5bb   :  { %v1756_v46 = vpop.f32.mrb[14].mxu0  ;;  %v1827_v63 = vpop.f32.mrb[18].mxu1 }
 0x5bc   :  { %4985 = vtanh.f32 %v1680_v14  ;;  %v1757_v19 = vadd.f32 %v1756_v46, %v6889_v2  ;;  %v1758_v37 = vpop.f32.mrb[15].mxu0  ;;  %v1829_v5 = vpop.f32.mrb[19].mxu1  ;;  %v7093_v14 = vld [vmem:[#allocation82_spill] sm:$0xff] }
 0x5bd   :  { %v1759_v27 = vadd.f32 %v1758_v37, %v6891_v24  ;;  %v1684_v39 = vmul.f32 %v4984_v61, %v7093_v14  ;;  %v1839_v61 = vmul.f32 %v1835_v56, %v5588_v53 }
 0x5be   :  { %v1841_v9 = vadd.f32 %v1837_v48, %v1757_v19 }
 0x5bf   :  { %v1842_v4 = vadd.f32 %v1838_v47, %v1759_v27  ;;  %v7095_v27 = vld [vmem:[#allocation85_spill] sm:$0xff]  ;;  %v1828_v47 = vadd.f32 %v1827_v63, %v5582_v62  ;;  %v7097_v63 = vld [vmem:[#allocation18_spill] sm:$0xff] }
 0x5c0   :  { %v3240_v45 = vmul.f32 -1.442695, %v1841_v9  ;;  %v1830_v9 = vadd.f32 %v1829_v5, %v7095_v27 }
 0x5c1   :  { %v3241_v58 = vmul.f32 -1.442695, %v1842_v4  ;;  %v1840_v4 = vmul.f32 %v1835_v56, %v5579_v0  ;;  %v7098_v56 = vld [vmem:[#allocation16_spill] sm:$0xff] }
 0x5c2   :  { %4987 = vpow2.f32 %v3240_v45 }
 0x5c3   :  { %4989 = vpow2.f32 %v3241_v58  ;;  %v1844_v58 = vadd.f32 %v1840_v4, %v1830_v9  ;;  %v7102_v9 = vld [vmem:[#allocation22_spill] sm:$0xff]  ;;  %v7105_v4 = vld [vmem:[#allocation25_spill] sm:$0xff] }
 0x5c6   :  { %v4986_v55 = vpop.eup %4985 }
 0x5c7   :  { %v1683_v30 = vmul.f32 %v4986_v55, %v1682_v31  ;;  %v1843_v31 = vadd.f32 %v1839_v61, %v1828_v47  ;;  %v7103_v47 = vld [vmem:[#allocation23_spill] sm:$0xff]  ;;  %v7106_v61 = vld [vmem:[#allocation26_spill] sm:$0xff] }
 0x5c9   :  { %v6101_v46 = vadd.f32 %v1684_v39, %v1683_v30 }
 0x5cb   :  { %7094 = vst [vmem:[#allocation75_spill] sm:$0xff] %v6101_v46  ;;  %1928 = vmatprep.mubr.f32.mxu0 %v6101_v46  ;;  %1999 = vmatprep.mubr.f32.mxu1 %v6101_v46 }
 0x5cc   :  { %v4988_v19 = vpop.eup %4987 }
 0x5cd   :  { %v1848_v48 = vadd.f32 1.0, %v4988_v19  ;;  %v4990_v37 = vpop.eup %4989 }
 0x5ce   :  { %v1854_v45 = vadd.f32 1.0, %v4990_v37  ;;  %v7101_v37 = vld [vmem:[#allocation21_spill] sm:$0xff] }
 0x5cf   :  { %4991 = vrcp.f32 %v1848_v48 }
 0x5d0   :  { %4993 = vrcp.f32 %v1854_v45  ;;  %v7104_v45 = vld [vmem:[#allocation24_spill] sm:$0xff] }
 0x5d9   :  { %v4992_v39 = vpop.eup %4991 }
 0x5da   :  { %v1857_v55 = vmul.f32 %v4992_v39, %v1844_v58  ;;  %v4994_v14 = vpop.eup %4993  ;;  %v7107_v58 = vld [vmem:[#allocation27_spill] sm:$0xff]  ;;  %v7108_v39 = vld [vmem:[#allocation28_spill] sm:$0xff] }
 0x5db   :  { %v1860_v19 = vsub.f32 1.0, %v4994_v14  ;;  %v1862_v5 = vmul.f32 %v4994_v14, %v5988_v42  ;;  %v7096_v42 = vld [vmem:[#allocation15_spill] sm:$0xff] }
 0x5dc   :  { %v1858_v30 = vadd.f32 %v1857_v55, %v1843_v31  ;;  %v7099_v14 = vld [vmem:[#allocation19_spill] sm:$0xff]  ;;  %v7109_v31 = vld [vmem:[#allocation29_spill] sm:$0xff]  ;;  %v7110_v55 = vld [vmem:[#allocation30_spill] sm:$0xff] }
 0x5de   :  { %4995 = vtanh.f32 %v1858_v30  ;;  %v7111_v30 = vld [vmem:[#allocation31_spill] sm:$0xff] }
 0x5e8   :  { %v4996_v48 = vpop.eup %4995 }
 0x5e9   :  { %v1861_v46 = vmul.f32 %v4996_v48, %v1860_v19  ;;  %v7112_v19 = vld [vmem:[#allocation32_spill] sm:$0xff]  ;;  %v7113_v48 = vld [vmem:[#allocation33_spill] sm:$0xff] }
 0x5eb   :  { %v6110_v27 = vadd.f32 %v1862_v5, %v1861_v46  ;;  %v7100_v46 = vld [vmem:[#allocation20_spill] sm:$0xff]  ;;  %v7114_v5 = vld [vmem:[#allocation34_spill] sm:$0xff] }
 0x5ed   :  { %1929 = vmatmul.mubr.f32.vlgmr.msra.gmra.mrb[16].mxu0 %v6110_v27  ;;  %2000 = vmatmul.mubr.f32.vlgmr.msra.gmra.mrb[20].mxu1 %v6110_v27 }
 0x5ee   :  { %4291 = vmatpush1.bf16.msra.mxu0 %v5233_v10  ;;  %4323 = vmatpush1.bf16.msra.mxu1 %v5310_v15 }
 0x5ef   :  { %4293 = vmatprep.subr.bf16.mxu0 %v5235_v11  ;;  %4325 = vmatprep.subr.bf16.mxu1 %v5313_v18 }
 0x5f0   :  { %2093 = vmatprep.mubr.f32.mxu0 %v6825_v6  ;;  %2164 = vmatprep.mubr.f32.mxu1 %v6825_v6 }
 0x5f2   :  { %4295 = vmatpush1.bf16.msra.mxu0 %v5239_v16  ;;  %4327 = vmatpush1.bf16.msra.mxu1 %v5317_v25 }
 0x5f3   :  { %4297 = vmatprep.subr.bf16.mxu0 %v5242_v17  ;;  %4329 = vmatprep.subr.bf16.mxu1 %v5321_v26 }
 0x5f6   :  { %4299 = vmatpush1.bf16.msra.mxu0 %v5245_v22  ;;  %4331 = vmatpush1.bf16.msra.mxu1 %v5324_v33 }
 0x5f7   :  { %4301 = vmatprep.subr.bf16.mxu0 %v5248_v23  ;;  %4333 = vmatprep.subr.bf16.mxu1 %v5327_v36 }
 0x5fa   :  { %4303 = vmatpush1.bf16.msra.mxu0 %v5251_v28  ;;  %4335 = vmatpush1.bf16.msra.mxu1 %v5330_v43 }
 0x5fb   :  { %4305 = vmatprep.subr.bf16.mxu0 %v5254_v29  ;;  %4337 = vmatprep.subr.bf16.mxu1 %v5333_v44 }
 0x5fe   :  { %4307 = vmatpush1.bf16.msra.mxu0 %v5257_v34  ;;  %4339 = vmatpush1.bf16.msra.mxu1 %v5336_v49 }
 0x5ff   :  { %4309 = vmatprep.subr.bf16.mxu0 %v5260_v35  ;;  %4341 = vmatprep.subr.bf16.mxu1 %v5339_v52 }
 0x602   :  { %4311 = vmatpush1.bf16.msra.mxu0 %v5263_v40  ;;  %4343 = vmatpush1.bf16.msra.mxu1 %v5342_v59 }
 0x603   :  { %4313 = vmatprep.subr.bf16.mxu0 %v5266_v41  ;;  %4345 = vmatprep.subr.bf16.mxu1 %v5345_v60 }
 0x606   :  { %4315 = vmatpush1.bf16.msra.mxu0 %v5275_v50  ;;  %4347 = vmatpush1.bf16.msra.mxu1 %v5348_v7 }
 0x607   :  { %4317 = vmatprep.subr.bf16.mxu0 %v5280_v54  ;;  %4349 = vmatprep.subr.bf16.mxu1 %v5351_v8 }
 0x60a   :  { %4319 = vmatpush1.bf16.msra.mxu0 %v5292_v3  ;;  %4351 = vmatpush1.bf16.msra.mxu1 %v5354_v20 }
 0x60b   :  { %4353 = vmatprep.subr.bf16.mxu0 %v5277_v51  ;;  %4417 = vmatprep.subr.bf16.mxu1 %v5357_v21 }
 0x60d   :  { %2094 = vmatmul.mubr.f32.vlgmr.msra.gmra.mrb[18].mxu0 %v6110_v27  ;;  %2165 = vmatmul.mubr.f32.vlgmr.msra.gmra.mrb[22].mxu1 %v6110_v27 }
 0x60e   :  { %4355 = vmatpush1.bf16.msra.mxu0 %v5282_v57  ;;  %4419 = vmatpush1.bf16.msra.mxu1 %v5360_v32 }
 0x60f   :  { %4357 = vmatprep.subr.bf16.mxu0 %v7096_v42  ;;  %4421 = vmatprep.subr.bf16.mxu1 %v7097_v63 }
 0x612   :  { %4359 = vmatpush1.bf16.msra.mxu0 %v7098_v56  ;;  %4423 = vmatpush1.bf16.msra.mxu1 %v7099_v14  ;;  %v7159_v14 = vld [vmem:[#allocation84_spill] sm:$0xff] }
 0x613   :  { %4361 = vmatprep.subr.bf16.mxu0 %v7100_v46  ;;  %4425 = vmatprep.subr.bf16.mxu1 %v7101_v37 }
 0x616   :  { %4363 = vmatpush1.bf16.msra.mxu0 %v7102_v9  ;;  %4427 = vmatpush1.bf16.msra.mxu1 %v7103_v47  ;;  %v7158_v47 = vld [vmem:[#allocation77_spill] sm:$0xff] }
 0x617   :  { %4365 = vmatprep.subr.bf16.mxu0 %v7104_v45  ;;  %4429 = vmatprep.subr.bf16.mxu1 %v7105_v4  ;;  %v7115_v45 = vld [vmem:[#allocation35_spill] sm:$0xff]  ;;  %v7116_v4 = vld [vmem:[#allocation36_spill] sm:$0xff] }
 0x61a   :  { %4367 = vmatpush1.bf16.msra.mxu0 %v7106_v61  ;;  %4431 = vmatpush1.bf16.msra.mxu1 %v7107_v58  ;;  %v7117_v61 = vld [vmem:[#allocation37_spill] sm:$0xff]  ;;  %v7118_v58 = vld [vmem:[#allocation38_spill] sm:$0xff] }
 0x61b   :  { %4369 = vmatprep.subr.bf16.mxu0 %v7108_v39  ;;  %4433 = vmatprep.subr.bf16.mxu1 %v7109_v31  ;;  %v7119_v39 = vld [vmem:[#allocation39_spill] sm:$0xff]  ;;  %v7120_v31 = vld [vmem:[#allocation40_spill] sm:$0xff] }
 0x61e   :  { %4371 = vmatpush1.bf16.msra.mxu0 %v7110_v55  ;;  %4435 = vmatpush1.bf16.msra.mxu1 %v7111_v30  ;;  %v7121_v55 = vld [vmem:[#allocation41_spill] sm:$0xff]  ;;  %v7122_v30 = vld [vmem:[#allocation42_spill] sm:$0xff] }
 0x61f   :  { %4373 = vmatprep.subr.bf16.mxu0 %v7112_v19  ;;  %4437 = vmatprep.subr.bf16.mxu1 %v7113_v48  ;;  %v7123_v19 = vld [vmem:[#allocation43_spill] sm:$0xff]  ;;  %v7124_v48 = vld [vmem:[#allocation44_spill] sm:$0xff] }
 0x622   :  { %4375 = vmatpush1.bf16.msra.mxu0 %v7114_v5  ;;  %4439 = vmatpush1.bf16.msra.mxu1 %v7115_v45  ;;  %v7125_v5 = vld [vmem:[#allocation45_spill] sm:$0xff]  ;;  %v7126_v45 = vld [vmem:[#allocation46_spill] sm:$0xff] }
 0x623   :  { %4377 = vmatprep.subr.bf16.mxu0 %v7116_v4  ;;  %4441 = vmatprep.subr.bf16.mxu1 %v7117_v61  ;;  %v7127_v4 = vld [vmem:[#allocation47_spill] sm:$0xff]  ;;  %v7128_v61 = vld [vmem:[#allocation48_spill] sm:$0xff] }
 0x626   :  { %4379 = vmatpush1.bf16.msra.mxu0 %v7118_v58  ;;  %4443 = vmatpush1.bf16.msra.mxu1 %v7119_v39  ;;  %v7129_v58 = vld [vmem:[#allocation49_spill] sm:$0xff]  ;;  %v7130_v39 = vld [vmem:[#allocation50_spill] sm:$0xff] }
 0x627   :  { %4381 = vmatprep.subr.bf16.mxu0 %v7120_v31  ;;  %4445 = vmatprep.subr.bf16.mxu1 %v7121_v55  ;;  %v7131_v31 = vld [vmem:[#allocation51_spill] sm:$0xff]  ;;  %v7132_v55 = vld [vmem:[#allocation52_spill] sm:$0xff] }
 0x62a   :  { %4383 = vmatpush1.bf16.msra.mxu0 %v7122_v30  ;;  %4447 = vmatpush1.bf16.msra.mxu1 %v7123_v19  ;;  %v7133_v30 = vld [vmem:[#allocation53_spill] sm:$0xff]  ;;  %v7134_v19 = vld [vmem:[#allocation54_spill] sm:$0xff] }
 0x62b   :  { %4385 = vmatprep.subr.bf16.mxu0 %v7124_v48  ;;  %4449 = vmatprep.subr.bf16.mxu1 %v7125_v5  ;;  %v7135_v48 = vld [vmem:[#allocation55_spill] sm:$0xff]  ;;  %v7136_v5 = vld [vmem:[#allocation56_spill] sm:$0xff] }
 0x62e   :  { %4387 = vmatpush1.bf16.msra.mxu0 %v7126_v45  ;;  %4451 = vmatpush1.bf16.msra.mxu1 %v7127_v4  ;;  %v7137_v45 = vld [vmem:[#allocation57_spill] sm:$0xff]  ;;  %v7138_v4 = vld [vmem:[#allocation58_spill] sm:$0xff] }
 0x62f   :  { %4389 = vmatprep.subr.bf16.mxu0 %v7128_v61  ;;  %4453 = vmatprep.subr.bf16.mxu1 %v7129_v58  ;;  %v7139_v61 = vld [vmem:[#allocation59_spill] sm:$0xff]  ;;  %v7140_v58 = vld [vmem:[#allocation60_spill] sm:$0xff] }
 0x632   :  { %4391 = vmatpush1.bf16.msra.mxu0 %v7130_v39  ;;  %4455 = vmatpush1.bf16.msra.mxu1 %v7131_v31  ;;  %v7141_v39 = vld [vmem:[#allocation61_spill] sm:$0xff]  ;;  %v7142_v31 = vld [vmem:[#allocation62_spill] sm:$0xff] }
 0x633   :  { %4393 = vmatprep.subr.bf16.mxu0 %v7132_v55  ;;  %4457 = vmatprep.subr.bf16.mxu1 %v7133_v30  ;;  %v7143_v55 = vld [vmem:[#allocation63_spill] sm:$0xff]  ;;  %v7144_v30 = vld [vmem:[#allocation64_spill] sm:$0xff] }
 0x636   :  { %4395 = vmatpush1.bf16.msra.mxu0 %v7134_v19  ;;  %4459 = vmatpush1.bf16.msra.mxu1 %v7135_v48  ;;  %v7145_v19 = vld [vmem:[#allocation65_spill] sm:$0xff]  ;;  %v7146_v48 = vld [vmem:[#allocation66_spill] sm:$0xff] }
 0x637   :  { %4397 = vmatprep.subr.bf16.mxu0 %v7136_v5  ;;  %4461 = vmatprep.subr.bf16.mxu1 %v7137_v45  ;;  %v7147_v5 = vld [vmem:[#allocation67_spill] sm:$0xff]  ;;  %v7148_v45 = vld [vmem:[#allocation68_spill] sm:$0xff] }
 0x63a   :  { %4399 = vmatpush1.bf16.msra.mxu0 %v7138_v4  ;;  %4463 = vmatpush1.bf16.msra.mxu1 %v7139_v61  ;;  %v7149_v4 = vld [vmem:[#allocation69_spill] sm:$0xff]  ;;  %v7150_v61 = vld [vmem:[#allocation70_spill] sm:$0xff] }
 0x63b   :  { %4401 = vmatprep.subr.bf16.mxu0 %v7140_v58  ;;  %4465 = vmatprep.subr.bf16.mxu1 %v7141_v39  ;;  %v7151_v58 = vld [vmem:[#allocation71_spill] sm:$0xff]  ;;  %v7152_v39 = vld [vmem:[#allocation72_spill] sm:$0xff] }
 0x63e   :  { %4403 = vmatpush1.bf16.msra.mxu0 %v7142_v31  ;;  %4467 = vmatpush1.bf16.msra.mxu1 %v7143_v55  ;;  %v7153_v31 = vld [vmem:[#allocation73_spill] sm:$0xff]  ;;  %v7154_v55 = vld [vmem:[#allocation74_spill] sm:$0xff] }
 0x63f   :  { %4405 = vmatprep.subr.bf16.mxu0 %v7144_v30  ;;  %4469 = vmatprep.subr.bf16.mxu1 %v7145_v19  ;;  %v7155_v30 = vld [vmem:[#allocation76_spill] sm:$0xff]  ;;  %v7156_v19 = vld [vmem:[#allocation14_spill] sm:$0xff] }
 0x642   :  { %4407 = vmatpush1.bf16.msra.mxu0 %v7146_v48  ;;  %4471 = vmatpush1.bf16.msra.mxu1 %v7147_v5  ;;  %v7157_v48 = vld [vmem:[#allocation17_spill] sm:$0xff] }
 0x643   :  { %4409 = vmatprep.subr.bf16.mxu0 %v7148_v45  ;;  %4473 = vmatprep.subr.bf16.mxu1 %v7149_v4 }
 0x646   :  { %4411 = vmatpush1.bf16.msra.mxu0 %v7150_v61  ;;  %4475 = vmatpush1.bf16.msra.mxu1 %v7151_v58 }
 0x647   :  { %4413 = vmatprep.subr.bf16.mxu0 %v7152_v39  ;;  %4477 = vmatprep.subr.bf16.mxu1 %v7153_v31 }
 0x64a   :  { %4415 = vmatpush1.bf16.msra.mxu0 %v7154_v55  ;;  %4479 = vmatpush1.bf16.msra.mxu1 %v7155_v30 }
 0x64b   :  { %4481 = vmatprep.subr.bf16.mxu0 %v7156_v19  ;;  %4513 = vmatprep.subr.bf16.mxu1 %v7157_v48 }
 0x6c0   :  { %v1930_v5 = vpop.f32.mrb[16].mxu0  ;;  %v2001_v45 = vpop.f32.mrb[20].mxu1 }
 0x6c1   :  { %v1931_v4 = vadd.f32 %v1930_v5, %v7158_v47  ;;  %v1932_v9 = vpop.f32.mrb[17].mxu0  ;;  %v2003_v61 = vpop.f32.mrb[21].mxu1  ;;  %v2002_v56 = vadd.f32 %v2001_v45, %v7159_v14 }
 0x6c2   :  { %v1933_v58 = vadd.f32 %v1932_v9, %v6957_v38  ;;  %v2004_v19 = vadd.f32 %v2003_v61, %v7092_v1  ;;  %v2174_v47 = vpop.permute.xlu1 %2173 }
 0x6c3   :  { %v3242_v37 = vmul.f32 -1.442695, %v1931_v4  ;;  %v2176_v9 = vmul.f32 %v2174_v47, %v7026_v12  ;;  %v2177_v61 = vmul.f32 %v2174_v47, %v6892_v13 }
 0x6c4   :  { %v3243_v39 = vmul.f32 -1.442695, %v1933_v58 }
 0x6c5   :  { %4997 = vpow2.f32 %v3242_v37 }
 0x6c6   :  { %4999 = vpow2.f32 %v3243_v39 }
 0x6cf   :  { %v4998_v31 = vpop.eup %4997 }
 0x6d0   :  { %v2009_v55 = vadd.f32 1.0, %v4998_v31  ;;  %v5000_v30 = vpop.eup %4999 }
 0x6d1   :  { %v2015_v46 = vadd.f32 1.0, %v5000_v30 }
 0x6d2   :  { %5001 = vrcp.f32 %v2009_v55 }
 0x6d3   :  { %5003 = vrcp.f32 %v2015_v46 }
 0x6dc   :  { %v5002_v48 = vpop.eup %5001 }
 0x6dd   :  { %v2018_v5 = vmul.f32 %v5002_v48, %v2004_v19  ;;  %v5004_v46 = vpop.eup %5003 }
 0x6df   :  { %v2019_v63 = vadd.f32 %v2018_v5, %v2002_v56  ;;  %v2021_v56 = vsub.f32 1.0, %v5004_v46 }
 0x6e0   :  { %v2095_v4 = vpop.f32.mrb[18].mxu0  ;;  %v2166_v42 = vpop.f32.mrb[22].mxu1 }
 0x6e1   :  { %5005 = vtanh.f32 %v2019_v63  ;;  %v2096_v37 = vadd.f32 %v2095_v4, %v6889_v2  ;;  %v2097_v58 = vpop.f32.mrb[19].mxu0  ;;  %v2168_v39 = vpop.f32.mrb[23].mxu1  ;;  %v7160_v63 = vld [vmem:[#allocation75_spill] sm:$0xff] }
 0x6e2   :  { %v2098_v31 = vadd.f32 %v2097_v58, %v6891_v24  ;;  %v2023_v14 = vmul.f32 %v5004_v46, %v7160_v63  ;;  %v2178_v46 = vmul.f32 %v2174_v47, %v5588_v53 }
 0x6e3   :  { %v2180_v55 = vadd.f32 %v2176_v9, %v2096_v37 }
 0x6e4   :  { %v2181_v45 = vadd.f32 %v2177_v61, %v2098_v31  ;;  %v7162_v31 = vld [vmem:[#allocation85_spill] sm:$0xff]  ;;  %v2167_v61 = vadd.f32 %v2166_v42, %v5582_v62  ;;  %v7164_v42 = vld [vmem:[#allocation18_spill] sm:$0xff] }
 0x6e5   :  { %v3245_v30 = vmul.f32 -1.442695, %v2180_v55  ;;  %v2169_v55 = vadd.f32 %v2168_v39, %v7162_v31 }
 0x6e6   :  { %v3246_v19 = vmul.f32 -1.442695, %v2181_v45  ;;  %v2179_v45 = vmul.f32 %v2174_v47, %v5579_v0  ;;  %v7165_v47 = vld [vmem:[#allocation16_spill] sm:$0xff] }
 0x6e7   :  { %5007 = vpow2.f32 %v3245_v30 }
 0x6e8   :  { %5009 = vpow2.f32 %v3246_v19  ;;  %v2183_v19 = vadd.f32 %v2179_v45, %v2169_v55  ;;  %v7169_v55 = vld [vmem:[#allocation22_spill] sm:$0xff]  ;;  %v7172_v45 = vld [vmem:[#allocation25_spill] sm:$0xff] }
 0x6eb   :  { %v5006_v48 = vpop.eup %5005 }
 0x6ec   :  { %v2022_v5 = vmul.f32 %v5006_v48, %v2021_v56  ;;  %v2182_v56 = vadd.f32 %v2178_v46, %v2167_v61  ;;  %v7170_v61 = vld [vmem:[#allocation23_spill] sm:$0xff]  ;;  %v7173_v46 = vld [vmem:[#allocation26_spill] sm:$0xff] }
 0x6ee   :  { %v6223_v4 = vadd.f32 %v2023_v14, %v2022_v5 }
 0x6f0   :  { %7161 = vst [vmem:[#allocation80_spill] sm:$0xff] %v6223_v4  ;;  %2267 = vmatprep.mubr.f32.mxu0 %v6223_v4  ;;  %2338 = vmatprep.mubr.f32.mxu1 %v6223_v4 }
 0x6f1   :  { %v5008_v37 = vpop.eup %5007 }
 0x6f2   :  { %v2187_v9 = vadd.f32 1.0, %v5008_v37  ;;  %v5010_v58 = vpop.eup %5009 }
 0x6f3   :  { %v2193_v30 = vadd.f32 1.0, %v5010_v58  ;;  %v7168_v58 = vld [vmem:[#allocation21_spill] sm:$0xff] }
 0x6f4   :  { %5011 = vrcp.f32 %v2187_v9 }
 0x6f5   :  { %5013 = vrcp.f32 %v2193_v30  ;;  %v7171_v30 = vld [vmem:[#allocation24_spill] sm:$0xff] }
 0x6fe   :  { %v5012_v14 = vpop.eup %5011 }
 0x6ff   :  { %v2196_v48 = vmul.f32 %v5012_v14, %v2183_v19  ;;  %v5014_v63 = vpop.eup %5013  ;;  %v7174_v19 = vld [vmem:[#allocation27_spill] sm:$0xff]  ;;  %v7175_v14 = vld [vmem:[#allocation28_spill] sm:$0xff] }
 0x700   :  { %v2199_v37 = vsub.f32 1.0, %v5014_v63  ;;  %v2201_v39 = vmul.f32 %v5014_v63, %v6110_v27  ;;  %v7163_v27 = vld [vmem:[#allocation15_spill] sm:$0xff] }
 0x701   :  { %v2197_v5 = vadd.f32 %v2196_v48, %v2182_v56  ;;  %v7166_v63 = vld [vmem:[#allocation19_spill] sm:$0xff]  ;;  %v7176_v56 = vld [vmem:[#allocation29_spill] sm:$0xff]  ;;  %v7177_v48 = vld [vmem:[#allocation30_spill] sm:$0xff] }
 0x703   :  { %5015 = vtanh.f32 %v2197_v5  ;;  %v7178_v5 = vld [vmem:[#allocation31_spill] sm:$0xff] }
 0x70d   :  { %v5016_v9 = vpop.eup %5015 }
 0x70e   :  { %v2200_v4 = vmul.f32 %v5016_v9, %v2199_v37  ;;  %v7179_v37 = vld [vmem:[#allocation32_spill] sm:$0xff]  ;;  %v7180_v9 = vld [vmem:[#allocation33_spill] sm:$0xff] }
 0x710   :  { %v6232_v31 = vadd.f32 %v2201_v39, %v2200_v4  ;;  %v7167_v4 = vld [vmem:[#allocation20_spill] sm:$0xff]  ;;  %v7181_v39 = vld [vmem:[#allocation34_spill] sm:$0xff] }
 0x712   :  { %2268 = vmatmul.mubr.f32.vlgmr.msra.gmra.mrb[20].mxu0 %v6232_v31  ;;  %2339 = vmatmul.mubr.f32.vlgmr.msra.gmra.mrb[24].mxu1 %v6232_v31 }
 0x713   :  { %4483 = vmatpush1.bf16.msra.mxu0 %v5233_v10  ;;  %4515 = vmatpush1.bf16.msra.mxu1 %v5310_v15 }
 0x714   :  { %4485 = vmatprep.subr.bf16.mxu0 %v5235_v11  ;;  %4517 = vmatprep.subr.bf16.mxu1 %v5313_v18 }
 0x715   :  { %2432 = vmatprep.mubr.f32.mxu0 %v6825_v6  ;;  %2503 = vmatprep.mubr.f32.mxu1 %v6825_v6 }
 0x717   :  { %4487 = vmatpush1.bf16.msra.mxu0 %v5239_v16  ;;  %4519 = vmatpush1.bf16.msra.mxu1 %v5317_v25 }
 0x718   :  { %4489 = vmatprep.subr.bf16.mxu0 %v5242_v17  ;;  %4521 = vmatprep.subr.bf16.mxu1 %v5321_v26 }
 0x71b   :  { %4491 = vmatpush1.bf16.msra.mxu0 %v5245_v22  ;;  %4523 = vmatpush1.bf16.msra.mxu1 %v5324_v33 }
 0x71c   :  { %4493 = vmatprep.subr.bf16.mxu0 %v5248_v23  ;;  %4525 = vmatprep.subr.bf16.mxu1 %v5327_v36 }
 0x71f   :  { %4495 = vmatpush1.bf16.msra.mxu0 %v5251_v28  ;;  %4527 = vmatpush1.bf16.msra.mxu1 %v5330_v43 }
 0x720   :  { %4497 = vmatprep.subr.bf16.mxu0 %v5254_v29  ;;  %4529 = vmatprep.subr.bf16.mxu1 %v5333_v44 }
 0x723   :  { %4499 = vmatpush1.bf16.msra.mxu0 %v5257_v34  ;;  %4531 = vmatpush1.bf16.msra.mxu1 %v5336_v49 }
 0x724   :  { %4501 = vmatprep.subr.bf16.mxu0 %v5260_v35  ;;  %4533 = vmatprep.subr.bf16.mxu1 %v5339_v52 }
 0x727   :  { %4503 = vmatpush1.bf16.msra.mxu0 %v5263_v40  ;;  %4535 = vmatpush1.bf16.msra.mxu1 %v5342_v59 }
 0x728   :  { %4505 = vmatprep.subr.bf16.mxu0 %v5266_v41  ;;  %4537 = vmatprep.subr.bf16.mxu1 %v5345_v60 }
 0x72b   :  { %4507 = vmatpush1.bf16.msra.mxu0 %v5275_v50  ;;  %4539 = vmatpush1.bf16.msra.mxu1 %v5348_v7 }
 0x72c   :  { %4509 = vmatprep.subr.bf16.mxu0 %v5280_v54  ;;  %4541 = vmatprep.subr.bf16.mxu1 %v5351_v8 }
 0x72f   :  { %4511 = vmatpush1.bf16.msra.mxu0 %v5292_v3  ;;  %4543 = vmatpush1.bf16.msra.mxu1 %v5354_v20 }
 0x730   :  { %4545 = vmatprep.subr.bf16.mxu0 %v5277_v51  ;;  %4609 = vmatprep.subr.bf16.mxu1 %v5357_v21 }
 0x732   :  { %2433 = vmatmul.mubr.f32.vlgmr.msra.gmra.mrb[22].mxu0 %v6232_v31  ;;  %2504 = vmatmul.mubr.f32.vlgmr.msra.gmra.mrb[26].mxu1 %v6232_v31 }
 0x733   :  { %4547 = vmatpush1.bf16.msra.mxu0 %v5282_v57  ;;  %4611 = vmatpush1.bf16.msra.mxu1 %v5360_v32 }
 0x734   :  { %4549 = vmatprep.subr.bf16.mxu0 %v7163_v27  ;;  %4613 = vmatprep.subr.bf16.mxu1 %v7164_v42 }
 0x737   :  { %4551 = vmatpush1.bf16.msra.mxu0 %v7165_v47  ;;  %4615 = vmatpush1.bf16.msra.mxu1 %v7166_v63  ;;  %v7226_v63 = vld [vmem:[#allocation84_spill] sm:$0xff] }
 0x738   :  { %4553 = vmatprep.subr.bf16.mxu0 %v7167_v4  ;;  %4617 = vmatprep.subr.bf16.mxu1 %v7168_v58 }
 0x73b   :  { %4555 = vmatpush1.bf16.msra.mxu0 %v7169_v55  ;;  %4619 = vmatpush1.bf16.msra.mxu1 %v7170_v61  ;;  %v7225_v61 = vld [vmem:[#allocation77_spill] sm:$0xff] }
 0x73c   :  { %4557 = vmatprep.subr.bf16.mxu0 %v7171_v30  ;;  %4621 = vmatprep.subr.bf16.mxu1 %v7172_v45  ;;  %v7182_v30 = vld [vmem:[#allocation35_spill] sm:$0xff]  ;;  %v7183_v45 = vld [vmem:[#allocation36_spill] sm:$0xff] }
 0x73f   :  { %4559 = vmatpush1.bf16.msra.mxu0 %v7173_v46  ;;  %4623 = vmatpush1.bf16.msra.mxu1 %v7174_v19  ;;  %v7184_v46 = vld [vmem:[#allocation37_spill] sm:$0xff]  ;;  %v7185_v19 = vld [vmem:[#allocation38_spill] sm:$0xff] }
 0x740   :  { %4561 = vmatprep.subr.bf16.mxu0 %v7175_v14  ;;  %4625 = vmatprep.subr.bf16.mxu1 %v7176_v56  ;;  %v7186_v14 = vld [vmem:[#allocation39_spill] sm:$0xff]  ;;  %v7187_v56 = vld [vmem:[#allocation40_spill] sm:$0xff] }
 0x743   :  { %4563 = vmatpush1.bf16.msra.mxu0 %v7177_v48  ;;  %4627 = vmatpush1.bf16.msra.mxu1 %v7178_v5  ;;  %v7188_v48 = vld [vmem:[#allocation41_spill] sm:$0xff]  ;;  %v7189_v5 = vld [vmem:[#allocation42_spill] sm:$0xff] }
 0x744   :  { %4565 = vmatprep.subr.bf16.mxu0 %v7179_v37  ;;  %4629 = vmatprep.subr.bf16.mxu1 %v7180_v9  ;;  %v7190_v37 = vld [vmem:[#allocation43_spill] sm:$0xff]  ;;  %v7191_v9 = vld [vmem:[#allocation44_spill] sm:$0xff] }
 0x747   :  { %4567 = vmatpush1.bf16.msra.mxu0 %v7181_v39  ;;  %4631 = vmatpush1.bf16.msra.mxu1 %v7182_v30  ;;  %v7192_v39 = vld [vmem:[#allocation45_spill] sm:$0xff]  ;;  %v7193_v30 = vld [vmem:[#allocation46_spill] sm:$0xff] }
 0x748   :  { %4569 = vmatprep.subr.bf16.mxu0 %v7183_v45  ;;  %4633 = vmatprep.subr.bf16.mxu1 %v7184_v46  ;;  %v7194_v45 = vld [vmem:[#allocation47_spill] sm:$0xff]  ;;  %v7195_v46 = vld [vmem:[#allocation48_spill] sm:$0xff] }
 0x74b   :  { %4571 = vmatpush1.bf16.msra.mxu0 %v7185_v19  ;;  %4635 = vmatpush1.bf16.msra.mxu1 %v7186_v14  ;;  %v7196_v19 = vld [vmem:[#allocation49_spill] sm:$0xff]  ;;  %v7197_v14 = vld [vmem:[#allocation50_spill] sm:$0xff] }
 0x74c   :  { %4573 = vmatprep.subr.bf16.mxu0 %v7187_v56  ;;  %4637 = vmatprep.subr.bf16.mxu1 %v7188_v48  ;;  %v7198_v56 = vld [vmem:[#allocation51_spill] sm:$0xff]  ;;  %v7199_v48 = vld [vmem:[#allocation52_spill] sm:$0xff] }
 0x74f   :  { %4575 = vmatpush1.bf16.msra.mxu0 %v7189_v5  ;;  %4639 = vmatpush1.bf16.msra.mxu1 %v7190_v37  ;;  %v7200_v5 = vld [vmem:[#allocation53_spill] sm:$0xff]  ;;  %v7201_v37 = vld [vmem:[#allocation54_spill] sm:$0xff] }
 0x750   :  { %4577 = vmatprep.subr.bf16.mxu0 %v7191_v9  ;;  %4641 = vmatprep.subr.bf16.mxu1 %v7192_v39  ;;  %v7202_v9 = vld [vmem:[#allocation55_spill] sm:$0xff]  ;;  %v7203_v39 = vld [vmem:[#allocation56_spill] sm:$0xff] }
 0x753   :  { %4579 = vmatpush1.bf16.msra.mxu0 %v7193_v30  ;;  %4643 = vmatpush1.bf16.msra.mxu1 %v7194_v45  ;;  %v7204_v30 = vld [vmem:[#allocation57_spill] sm:$0xff]  ;;  %v7205_v45 = vld [vmem:[#allocation58_spill] sm:$0xff] }
 0x754   :  { %4581 = vmatprep.subr.bf16.mxu0 %v7195_v46  ;;  %4645 = vmatprep.subr.bf16.mxu1 %v7196_v19  ;;  %v7206_v46 = vld [vmem:[#allocation59_spill] sm:$0xff]  ;;  %v7207_v19 = vld [vmem:[#allocation60_spill] sm:$0xff] }
 0x757   :  { %4583 = vmatpush1.bf16.msra.mxu0 %v7197_v14  ;;  %4647 = vmatpush1.bf16.msra.mxu1 %v7198_v56  ;;  %v7208_v14 = vld [vmem:[#allocation61_spill] sm:$0xff]  ;;  %v7209_v56 = vld [vmem:[#allocation62_spill] sm:$0xff] }
 0x758   :  { %4585 = vmatprep.subr.bf16.mxu0 %v7199_v48  ;;  %4649 = vmatprep.subr.bf16.mxu1 %v7200_v5  ;;  %v7210_v48 = vld [vmem:[#allocation63_spill] sm:$0xff]  ;;  %v7211_v5 = vld [vmem:[#allocation64_spill] sm:$0xff] }
 0x75b   :  { %4587 = vmatpush1.bf16.msra.mxu0 %v7201_v37  ;;  %4651 = vmatpush1.bf16.msra.mxu1 %v7202_v9  ;;  %v7212_v37 = vld [vmem:[#allocation65_spill] sm:$0xff]  ;;  %v7213_v9 = vld [vmem:[#allocation66_spill] sm:$0xff] }
 0x75c   :  { %4589 = vmatprep.subr.bf16.mxu0 %v7203_v39  ;;  %4653 = vmatprep.subr.bf16.mxu1 %v7204_v30  ;;  %v7214_v39 = vld [vmem:[#allocation67_spill] sm:$0xff]  ;;  %v7215_v30 = vld [vmem:[#allocation68_spill] sm:$0xff] }
 0x75f   :  { %4591 = vmatpush1.bf16.msra.mxu0 %v7205_v45  ;;  %4655 = vmatpush1.bf16.msra.mxu1 %v7206_v46  ;;  %v7216_v45 = vld [vmem:[#allocation69_spill] sm:$0xff]  ;;  %v7217_v46 = vld [vmem:[#allocation70_spill] sm:$0xff] }
 0x760   :  { %4593 = vmatprep.subr.bf16.mxu0 %v7207_v19  ;;  %4657 = vmatprep.subr.bf16.mxu1 %v7208_v14  ;;  %v7218_v19 = vld [vmem:[#allocation71_spill] sm:$0xff]  ;;  %v7219_v14 = vld [vmem:[#allocation72_spill] sm:$0xff] }
 0x763   :  { %4595 = vmatpush1.bf16.msra.mxu0 %v7209_v56  ;;  %4659 = vmatpush1.bf16.msra.mxu1 %v7210_v48  ;;  %v7220_v56 = vld [vmem:[#allocation73_spill] sm:$0xff]  ;;  %v7221_v48 = vld [vmem:[#allocation74_spill] sm:$0xff] }
 0x764   :  { %4597 = vmatprep.subr.bf16.mxu0 %v7211_v5  ;;  %4661 = vmatprep.subr.bf16.mxu1 %v7212_v37  ;;  %v7222_v5 = vld [vmem:[#allocation76_spill] sm:$0xff]  ;;  %v7223_v37 = vld [vmem:[#allocation14_spill] sm:$0xff] }
 0x767   :  { %4599 = vmatpush1.bf16.msra.mxu0 %v7213_v9  ;;  %4663 = vmatpush1.bf16.msra.mxu1 %v7214_v39  ;;  %v7224_v9 = vld [vmem:[#allocation17_spill] sm:$0xff] }
 0x768   :  { %4601 = vmatprep.subr.bf16.mxu0 %v7215_v30  ;;  %4665 = vmatprep.subr.bf16.mxu1 %v7216_v45 }
 0x76b   :  { %4603 = vmatpush1.bf16.msra.mxu0 %v7217_v46  ;;  %4667 = vmatpush1.bf16.msra.mxu1 %v7218_v19 }
 0x76c   :  { %4605 = vmatprep.subr.bf16.mxu0 %v7219_v14  ;;  %4669 = vmatprep.subr.bf16.mxu1 %v7220_v56 }
 0x76f   :  { %4607 = vmatpush1.bf16.msra.mxu0 %v7221_v48  ;;  %4671 = vmatpush1.bf16.msra.mxu1 %v7222_v5 }
 0x770   :  { %4673 = vmatprep.subr.bf16.mxu0 %v7223_v37  ;;  %4705 = vmatprep.subr.bf16.mxu1 %v7224_v9 }
 0x7e5   :  { %v2269_v39 = vpop.f32.mrb[20].mxu0  ;;  %v2340_v30 = vpop.f32.mrb[24].mxu1 }
 0x7e6   :  { %v2270_v45 = vadd.f32 %v2269_v39, %v7225_v61  ;;  %v2271_v55 = vpop.f32.mrb[21].mxu0  ;;  %v2342_v46 = vpop.f32.mrb[25].mxu1  ;;  %v2341_v47 = vadd.f32 %v2340_v30, %v7226_v63  ;;  %v7227_v63 = vld [vmem:[#allocation80_spill] sm:$0xff] }
 0x7e7   :  { %v2272_v19 = vadd.f32 %v2271_v55, %v6957_v38  ;;  %v2343_v37 = vadd.f32 %v2342_v46, %v7092_v1  ;;  %v2513_v61 = vpop.permute.xlu0 %2512 }
 0x7e8   :  { %v3247_v58 = vmul.f32 -1.442695, %v2270_v45  ;;  %v2516_v46 = vmul.f32 %v2513_v61, %v6892_v13 }
 0x7e9   :  { %v3248_v14 = vmul.f32 -1.442695, %v2272_v19 }
 0x7ea   :  { %5017 = vpow2.f32 %v3247_v58  ;;  %v2515_v58 = vmul.f32 %v2513_v61, %v7026_v12 }
 0x7eb   :  { %5019 = vpow2.f32 %v3248_v14 }
 0x7f4   :  { %v5018_v56 = vpop.eup %5017 }
 0x7f5   :  { %v2348_v48 = vadd.f32 1.0, %v5018_v56  ;;  %v5020_v5 = vpop.eup %5019 }
 0x7f6   :  { %v2354_v4 = vadd.f32 1.0, %v5020_v5 }
 0x7f7   :  { %5021 = vrcp.f32 %v2348_v48 }
 0x7f8   :  { %5023 = vrcp.f32 %v2354_v4 }
 0x801   :  { %v5022_v9 = vpop.eup %5021 }
 0x802   :  { %v2357_v39 = vmul.f32 %v5022_v9, %v2343_v37  ;;  %v5024_v4 = vpop.eup %5023 }
 0x803   :  { %v2362_v12 = vmul.f32 %v5024_v4, %v7227_v63 }
 0x804   :  { %v2358_v42 = vadd.f32 %v2357_v39, %v2341_v47  ;;  %v2360_v47 = vsub.f32 1.0, %v5024_v4 }
 0x805   :  { %v2434_v45 = vpop.f32.mrb[22].mxu0  ;;  %v2505_v27 = vpop.f32.mrb[26].mxu1 }
 0x806   :  { %5025 = vtanh.f32 %v2358_v42  ;;  %v2435_v55 = vadd.f32 %v2434_v45, %v6889_v2  ;;  %v2436_v19 = vpop.f32.mrb[23].mxu0  ;;  %v2507_v14 = vpop.f32.mrb[27].mxu1 }
 0x807   :  { %v2437_v56 = vadd.f32 %v2436_v19, %v6891_v24  ;;  %v7228_v19 = vld [vmem:[#allocation85_spill] sm:$0xff] }
 0x808   :  { %v2519_v48 = vadd.f32 %v2515_v58, %v2435_v55 }
 0x809   :  { %v2520_v30 = vadd.f32 %v2516_v46, %v2437_v56  ;;  %v2508_v56 = vadd.f32 %v2507_v14, %v7228_v19  ;;  %v2506_v46 = vadd.f32 %v2505_v27, %v5582_v62  ;;  %v7265_v27 = vld [vmem:[#allocation52_spill] sm:$0xff] }
 0x80a   :  { %v3250_v5 = vmul.f32 -1.442695, %v2519_v48  ;;  %v2518_v48 = vmul.f32 %v2513_v61, %v5579_v0 }
 0x80b   :  { %v3251_v37 = vmul.f32 -1.442695, %v2520_v30  ;;  %v2517_v30 = vmul.f32 %v2513_v61, %v5588_v53  ;;  %v7267_v61 = vld [vmem:[#allocation54_spill] sm:$0xff] }
 0x80c   :  { %5027 = vpow2.f32 %v3250_v5  ;;  %v2522_v4 = vadd.f32 %v2518_v48, %v2508_v56  ;;  %v7269_v56 = vld [vmem:[#allocation56_spill] sm:$0xff]  ;;  %v7270_v48 = vld [vmem:[#allocation57_spill] sm:$0xff] }
 0x80d   :  { %5029 = vpow2.f32 %v3251_v37  ;;  %v2521_v37 = vadd.f32 %v2517_v30, %v2506_v46  ;;  %v7271_v46 = vld [vmem:[#allocation58_spill] sm:$0xff]  ;;  %v7273_v30 = vld [vmem:[#allocation60_spill] sm:$0xff] }
 0x810   :  { %v5026_v9 = vpop.eup %5025 }
 0x811   :  { %v2361_v39 = vmul.f32 %v5026_v9, %v2360_v47 }
 0x813   :  { %v6345_v42 = vadd.f32 %v2362_v12, %v2361_v39 }
 0x815   :  { %2606 = vmatprep.mubr.f32.mxu0 %v6345_v42  ;;  %2677 = vmatprep.mubr.f32.mxu1 %v6345_v42 }
 0x816   :  { %v5028_v45 = vpop.eup %5027 }
 0x817   :  { %v2526_v58 = vadd.f32 1.0, %v5028_v45  ;;  %v5030_v55 = vpop.eup %5029 }
 0x818   :  { %v2532_v5 = vadd.f32 1.0, %v5030_v55  ;;  %v7268_v55 = vld [vmem:[#allocation55_spill] sm:$0xff] }
 0x819   :  { %5031 = vrcp.f32 %v2526_v58 }
 0x81a   :  { %5033 = vrcp.f32 %v2532_v5  ;;  %v7272_v5 = vld [vmem:[#allocation59_spill] sm:$0xff] }
 0x823   :  { %v5032_v12 = vpop.eup %5031 }
 0x824   :  { %v2535_v47 = vmul.f32 %v5032_v12, %v2522_v4  ;;  %v5034_v39 = vpop.eup %5033  ;;  %v7274_v4 = vld [vmem:[#allocation61_spill] sm:$0xff]  ;;  %v7275_v12 = vld [vmem:[#allocation62_spill] sm:$0xff] }
 0x825   :  { %v2538_v45 = vsub.f32 1.0, %v5034_v39  ;;  %v2540_v14 = vmul.f32 %v5034_v39, %v6232_v31  ;;  %v7264_v31 = vld [vmem:[#allocation51_spill] sm:$0xff]  ;;  %v7279_v39 = vld [vmem:[#allocation66_spill] sm:$0xff] }
 0x826   :  { %v2536_v9 = vadd.f32 %v2535_v47, %v2521_v37  ;;  %v7276_v37 = vld [vmem:[#allocation63_spill] sm:$0xff]  ;;  %v7277_v47 = vld [vmem:[#allocation64_spill] sm:$0xff] }
 0x828   :  { %5035 = vtanh.f32 %v2536_v9  ;;  %v7278_v9 = vld [vmem:[#allocation65_spill] sm:$0xff] }
 0x832   :  { %v5036_v58 = vpop.eup %5035 }
 0x833   :  { %v2539_v63 = vmul.f32 %v5036_v58, %v2538_v45  ;;  %v7280_v45 = vld [vmem:[#allocation67_spill] sm:$0xff]  ;;  %v7281_v58 = vld [vmem:[#allocation68_spill] sm:$0xff] }
 0x835   :  { %v6354_v19 = vadd.f32 %v2540_v14, %v2539_v63  ;;  %v7266_v63 = vld [vmem:[#allocation53_spill] sm:$0xff] }
 0x836   :  { %v7282_v14 = vld [vmem:[#allocation69_spill] sm:$0xff] }
 0x837   :  { %2607 = vmatmul.mubr.f32.vlgmr.msra.gmra.mrb[24].mxu0 %v6354_v19  ;;  %2678 = vmatmul.mubr.f32.vlgmr.msra.gmra.mrb[28].mxu1 %v6354_v19 }
 0x838   :  { %4675 = vmatpush1.bf16.msra.mxu0 %v5233_v10  ;;  %4707 = vmatpush1.bf16.msra.mxu1 %v5310_v15  ;;  %v7229_v10 = vld [vmem:[#allocation15_spill] sm:$0xff]  ;;  %v7246_v15 = vld [vmem:[#allocation33_spill] sm:$0xff] }
 0x839   :  { %4677 = vmatprep.subr.bf16.mxu0 %v5235_v11  ;;  %4709 = vmatprep.subr.bf16.mxu1 %v5313_v18  ;;  %v7230_v11 = vld [vmem:[#allocation18_spill] sm:$0xff] }
 0x83a   :  { %2771 = vmatprep.mubr.f32.mxu0 %v6825_v6  ;;  %2842 = vmatprep.mubr.f32.mxu1 %v6825_v6  ;;  %v7247_v18 = vld [vmem:[#allocation34_spill] sm:$0xff] }
 0x83b   :  { %v7263_v6 = vld [vmem:[#allocation50_spill] sm:$0xff] }
 0x83c   :  { %4679 = vmatpush1.bf16.msra.mxu0 %v5239_v16  ;;  %4711 = vmatpush1.bf16.msra.mxu1 %v5317_v25  ;;  %v7231_v16 = vld [vmem:[#allocation16_spill] sm:$0xff]  ;;  %v7248_v25 = vld [vmem:[#allocation35_spill] sm:$0xff] }
 0x83d   :  { %4681 = vmatprep.subr.bf16.mxu0 %v5242_v17  ;;  %4713 = vmatprep.subr.bf16.mxu1 %v5321_v26  ;;  %v7232_v17 = vld [vmem:[#allocation19_spill] sm:$0xff]  ;;  %v7249_v26 = vld [vmem:[#allocation36_spill] sm:$0xff] }
 0x840   :  { %4683 = vmatpush1.bf16.msra.mxu0 %v5245_v22  ;;  %4715 = vmatpush1.bf16.msra.mxu1 %v5324_v33  ;;  %v7233_v22 = vld [vmem:[#allocation20_spill] sm:$0xff]  ;;  %v7250_v33 = vld [vmem:[#allocation37_spill] sm:$0xff] }
 0x841   :  { %4685 = vmatprep.subr.bf16.mxu0 %v5248_v23  ;;  %4717 = vmatprep.subr.bf16.mxu1 %v5327_v36  ;;  %v7234_v23 = vld [vmem:[#allocation21_spill] sm:$0xff]  ;;  %v7251_v36 = vld [vmem:[#allocation38_spill] sm:$0xff] }
 0x844   :  { %4687 = vmatpush1.bf16.msra.mxu0 %v5251_v28  ;;  %4719 = vmatpush1.bf16.msra.mxu1 %v5330_v43  ;;  %v7235_v28 = vld [vmem:[#allocation22_spill] sm:$0xff]  ;;  %v7252_v43 = vld [vmem:[#allocation39_spill] sm:$0xff] }
 0x845   :  { %4689 = vmatprep.subr.bf16.mxu0 %v5254_v29  ;;  %4721 = vmatprep.subr.bf16.mxu1 %v5333_v44  ;;  %v7236_v29 = vld [vmem:[#allocation23_spill] sm:$0xff]  ;;  %v7253_v44 = vld [vmem:[#allocation40_spill] sm:$0xff] }
 0x848   :  { %4691 = vmatpush1.bf16.msra.mxu0 %v5257_v34  ;;  %4723 = vmatpush1.bf16.msra.mxu1 %v5336_v49  ;;  %v7237_v34 = vld [vmem:[#allocation24_spill] sm:$0xff]  ;;  %v7254_v49 = vld [vmem:[#allocation41_spill] sm:$0xff] }
 0x849   :  { %4693 = vmatprep.subr.bf16.mxu0 %v5260_v35  ;;  %4725 = vmatprep.subr.bf16.mxu1 %v5339_v52  ;;  %v7238_v35 = vld [vmem:[#allocation25_spill] sm:$0xff]  ;;  %v7255_v52 = vld [vmem:[#allocation42_spill] sm:$0xff] }
 0x84c   :  { %4695 = vmatpush1.bf16.msra.mxu0 %v5263_v40  ;;  %4727 = vmatpush1.bf16.msra.mxu1 %v5342_v59  ;;  %v7239_v40 = vld [vmem:[#allocation26_spill] sm:$0xff]  ;;  %v7256_v59 = vld [vmem:[#allocation43_spill] sm:$0xff] }
 0x84d   :  { %4697 = vmatprep.subr.bf16.mxu0 %v5266_v41  ;;  %4729 = vmatprep.subr.bf16.mxu1 %v5345_v60  ;;  %v7240_v41 = vld [vmem:[#allocation27_spill] sm:$0xff]  ;;  %v7257_v60 = vld [vmem:[#allocation44_spill] sm:$0xff] }
 0x850   :  { %4699 = vmatpush1.bf16.msra.mxu0 %v5275_v50  ;;  %4731 = vmatpush1.bf16.msra.mxu1 %v5348_v7  ;;  %v7241_v50 = vld [vmem:[#allocation28_spill] sm:$0xff]  ;;  %v7258_v7 = vld [vmem:[#allocation45_spill] sm:$0xff] }
 0x851   :  { %4701 = vmatprep.subr.bf16.mxu0 %v5280_v54  ;;  %4733 = vmatprep.subr.bf16.mxu1 %v5351_v8  ;;  %v7243_v54 = vld [vmem:[#allocation30_spill] sm:$0xff] }
 0x852   :  { %v7259_v8 = vld [vmem:[#allocation46_spill] sm:$0xff] }
 0x854   :  { %4703 = vmatpush1.bf16.msra.mxu0 %v5292_v3  ;;  %4735 = vmatpush1.bf16.msra.mxu1 %v5354_v20  ;;  %v7245_v3 = vld [vmem:[#allocation32_spill] sm:$0xff]  ;;  %v7260_v20 = vld [vmem:[#allocation47_spill] sm:$0xff] }
 0x855   :  { %4737 = vmatprep.subr.bf16.mxu0 %v5277_v51  ;;  %4801 = vmatprep.subr.bf16.mxu1 %v5357_v21  ;;  %v7242_v51 = vld [vmem:[#allocation29_spill] sm:$0xff]  ;;  %v7261_v21 = vld [vmem:[#allocation48_spill] sm:$0xff] }
 0x857   :  { %2772 = vmatmul.mubr.f32.vlgmr.msra.gmra.mrb[26].mxu0 %v6354_v19  ;;  %2843 = vmatmul.mubr.f32.vlgmr.msra.gmra.mrb[30].mxu1 %v6354_v19 }
 0x858   :  { %4739 = vmatpush1.bf16.msra.mxu0 %v5282_v57  ;;  %4803 = vmatpush1.bf16.msra.mxu1 %v5360_v32  ;;  %v7244_v57 = vld [vmem:[#allocation31_spill] sm:$0xff]  ;;  %v7262_v32 = vld [vmem:[#allocation49_spill] sm:$0xff] }
 0x859   :  { %4741 = vmatprep.subr.bf16.mxu0 %v7229_v10  ;;  %4805 = vmatprep.subr.bf16.mxu1 %v7230_v11  ;;  %v7283_v10 = vld [vmem:[#allocation70_spill] sm:$0xff]  ;;  %v7284_v11 = vld [vmem:[#allocation71_spill] sm:$0xff] }
 0x85c   :  { %4743 = vmatpush1.bf16.msra.mxu0 %v7231_v16  ;;  %4807 = vmatpush1.bf16.msra.mxu1 %v7232_v17  ;;  %v7285_v16 = vld [vmem:[#allocation72_spill] sm:$0xff]  ;;  %v7286_v17 = vld [vmem:[#allocation73_spill] sm:$0xff] }
 0x85d   :  { %4745 = vmatprep.subr.bf16.mxu0 %v7233_v22  ;;  %4809 = vmatprep.subr.bf16.mxu1 %v7234_v23  ;;  %v7287_v22 = vld [vmem:[#allocation74_spill] sm:$0xff]  ;;  %v7288_v23 = vld [vmem:[#allocation76_spill] sm:$0xff] }
 0x860   :  { %4747 = vmatpush1.bf16.msra.mxu0 %v7235_v28  ;;  %4811 = vmatpush1.bf16.msra.mxu1 %v7236_v29  ;;  %v3054_v28 = vld [vmem:[%s6589_s7] sm:$0xff]  ;;  %v3055_v29 = vld [vmem:[%s6589_s7 + $0x8] sm:$0xff] }
 0x861   :  { %4749 = vmatprep.subr.bf16.mxu0 %v7237_v34  ;;  %4813 = vmatprep.subr.bf16.mxu1 %v7238_v35  ;;  %v6462_v34 = vpack.c.bf16 %v3055_v29, %v3054_v28 }
 0x864   :  { %4751 = vmatpush1.bf16.msra.mxu0 %v7239_v40  ;;  %4815 = vmatpush1.bf16.msra.mxu1 %v7240_v41  ;;  %v7289_v41 = vld [vmem:[#allocation77_spill] sm:$0xff] }
 0x865   :  { %4753 = vmatprep.subr.bf16.mxu0 %v7241_v50  ;;  %4817 = vmatprep.subr.bf16.mxu1 %v7242_v51 }
 0x868   :  { %4755 = vmatpush1.bf16.msra.mxu0 %v7243_v54  ;;  %4819 = vmatpush1.bf16.msra.mxu1 %v7244_v57 }
 0x869   :  { %4757 = vmatprep.subr.bf16.mxu0 %v7245_v3  ;;  %4821 = vmatprep.subr.bf16.mxu1 %v7246_v15 }
 0x86c   :  { %4759 = vmatpush1.bf16.msra.mxu0 %v7247_v18  ;;  %4823 = vmatpush1.bf16.msra.mxu1 %v7248_v25 }
 0x86d   :  { %4761 = vmatprep.subr.bf16.mxu0 %v7249_v26  ;;  %4825 = vmatprep.subr.bf16.mxu1 %v7250_v33 }
 0x870   :  { %4763 = vmatpush1.bf16.msra.mxu0 %v7251_v36  ;;  %4827 = vmatpush1.bf16.msra.mxu1 %v7252_v43 }
 0x871   :  { %4765 = vmatprep.subr.bf16.mxu0 %v7253_v44  ;;  %4829 = vmatprep.subr.bf16.mxu1 %v7254_v49  ;;  %v7290_v44 = vld [vmem:[#allocation84_spill] sm:$0xff] }
 0x874   :  { %4767 = vmatpush1.bf16.msra.mxu0 %v7255_v52  ;;  %4831 = vmatpush1.bf16.msra.mxu1 %v7256_v59  ;;  %v2852_v59 = vpop.permute.xlu1 %2851 }
 0x875   :  { %4769 = vmatprep.subr.bf16.mxu0 %v7257_v60  ;;  %4833 = vmatprep.subr.bf16.mxu1 %v7258_v7 }
 0x878   :  { %4771 = vmatpush1.bf16.msra.mxu0 %v7259_v8  ;;  %4835 = vmatpush1.bf16.msra.mxu1 %v7260_v20  ;;  %v7291_v20 = vld [vmem:[#allocation78_spill] sm:$0xff] }
 0x879   :  { %4773 = vmatprep.subr.bf16.mxu0 %v7261_v21  ;;  %4837 = vmatprep.subr.bf16.mxu1 %v7262_v32  ;;  %v2854_v21 = vmul.f32 %v2852_v59, %v7291_v20  ;;  %v7294_v20 = vld [vmem:[#allocation81_spill] sm:$0xff] }
 0x87c   :  { %4775 = vmatpush1.bf16.msra.mxu0 %v7263_v6  ;;  %4839 = vmatpush1.bf16.msra.mxu1 %v7264_v31 }
 0x87d   :  { %4777 = vmatprep.subr.bf16.mxu0 %v7265_v27  ;;  %4841 = vmatprep.subr.bf16.mxu1 %v7266_v63 }
 0x880   :  { %4779 = vmatpush1.bf16.msra.mxu0 %v7267_v61  ;;  %4843 = vmatpush1.bf16.msra.mxu1 %v7268_v55  ;;  %v2855_v61 = vmul.f32 %v2852_v59, %v6892_v13 }
 0x881   :  { %4781 = vmatprep.subr.bf16.mxu0 %v7269_v56  ;;  %4845 = vmatprep.subr.bf16.mxu1 %v7270_v48 }
 0x884   :  { %4783 = vmatpush1.bf16.msra.mxu0 %v7271_v46  ;;  %4847 = vmatpush1.bf16.msra.mxu1 %v7272_v5 }
 0x885   :  { %4785 = vmatprep.subr.bf16.mxu0 %v7273_v30  ;;  %4849 = vmatprep.subr.bf16.mxu1 %v7274_v4 }
 0x888   :  { %4787 = vmatpush1.bf16.msra.mxu0 %v7275_v12  ;;  %4851 = vmatpush1.bf16.msra.mxu1 %v7276_v37 }
 0x889   :  { %4789 = vmatprep.subr.bf16.mxu0 %v7277_v47  ;;  %4853 = vmatprep.subr.bf16.mxu1 %v7278_v9  ;;  %v7292_v47 = vld [vmem:[#allocation85_spill] sm:$0xff] }
 0x88c   :  { %4791 = vmatpush1.bf16.msra.mxu0 %v7279_v39  ;;  %4855 = vmatpush1.bf16.msra.mxu1 %v7280_v45  ;;  %v2857_v39 = vmul.f32 %v2852_v59, %v5579_v0  ;;  %v3057_v0 = vld [vmem:[%s6589_s7 + $0x18] sm:$0xff] }
 0x88d   :  { %4793 = vmatprep.subr.bf16.mxu0 %v7281_v58  ;;  %4857 = vmatprep.subr.bf16.mxu1 %v7282_v14  ;;  %v2856_v14 = vmul.f32 %v2852_v59, %v5588_v53 }
 0x890   :  { %4795 = vmatpush1.bf16.msra.mxu0 %v7283_v10  ;;  %4859 = vmatpush1.bf16.msra.mxu1 %v7284_v11 }
 0x891   :  { %4797 = vmatprep.subr.bf16.mxu0 %v7285_v16  ;;  %4861 = vmatprep.subr.bf16.mxu1 %v7286_v17 }
 0x894   :  { %4799 = vmatpush1.bf16.msra.mxu0 %v7287_v22  ;;  %4863 = vmatpush1.bf16.msra.mxu1 %v7288_v23 }
 0x895   :  { %4865 = vmatprep.subr.bf16.mxu0 %v6462_v34 }
 0x90a   :  { %v2608_v35 = vpop.f32.mrb[24].mxu0  ;;  %v2679_v40 = vpop.f32.mrb[28].mxu1 }
 0x90b   :  { %v2609_v50 = vadd.f32 %v2608_v35, %v7289_v41  ;;  %v2610_v51 = vpop.f32.mrb[25].mxu0  ;;  %v2681_v54 = vpop.f32.mrb[29].mxu1  ;;  %v2680_v49 = vadd.f32 %v2679_v40, %v7290_v44  ;;  %v3056_v35 = vld [vmem:[%s6589_s7 + $0x10] sm:$0xff] }
 0x90c   :  { %v2611_v3 = vadd.f32 %v2610_v51, %v6957_v38  ;;  %v2682_v36 = vadd.f32 %v2681_v54, %v7092_v1  ;;  %v3058_v51 = vld [vmem:[%s6589_s7 + $0x20] sm:$0xff]  ;;  %v3059_v54 = vld [vmem:[%s6589_s7 + $0x28] sm:$0xff] }
 0x90d   :  { %v3252_v57 = vmul.f32 -1.442695, %v2609_v50  ;;  %v4868_v50 = vpack.c.bf16 %v3057_v0, %v3056_v35 }
 0x90e   :  { %v3253_v15 = vmul.f32 -1.442695, %v2611_v3  ;;  %v4872_v3 = vpack.c.bf16 %v3059_v54, %v3058_v51 }
 0x90f   :  { %5037 = vpow2.f32 %v3252_v57  ;;  %v7293_v57 = vld [vmem:[#allocation79_spill] sm:$0xff] }
 0x910   :  { %5039 = vpow2.f32 %v3253_v15  ;;  %v3061_v15 = vld [vmem:[%s6589_s7 + $0x38] sm:$0xff] }
 0x919   :  { %v5038_v18 = vpop.eup %5037 }
 0x91a   :  { %v2687_v25 = vadd.f32 1.0, %v5038_v18  ;;  %v5040_v26 = vpop.eup %5039 }
 0x91b   :  { %v2693_v33 = vadd.f32 1.0, %v5040_v26 }
 0x91c   :  { %5041 = vrcp.f32 %v2687_v25  ;;  %v3062_v25 = vld [vmem:[%s6589_s7 + $0x40] sm:$0xff] }
 0x91d   :  { %5043 = vrcp.f32 %v2693_v33  ;;  %v3064_v33 = vld [vmem:[%s6589_s7 + $0x50] sm:$0xff] }
 0x926   :  { %v5042_v43 = vpop.eup %5041 }
 0x927   :  { %v2696_v52 = vmul.f32 %v5042_v43, %v2682_v36  ;;  %v5044_v48 = vpop.eup %5043  ;;  %v3065_v36 = vld [vmem:[%s6589_s7 + $0x58] sm:$0xff] }
 0x928   :  { %v2699_v5 = vsub.f32 1.0, %v5044_v48  ;;  %v2701_v12 = vmul.f32 %v5044_v48, %v6345_v42  ;;  %v4884_v43 = vpack.c.bf16 %v3065_v36, %v3064_v33 }
 0x929   :  { %v2697_v60 = vadd.f32 %v2696_v52, %v2680_v49  ;;  %v3066_v49 = vld [vmem:[%s6589_s7 + $0x60] sm:$0xff]  ;;  %v3067_v52 = vld [vmem:[%s6589_s7 + $0x68] sm:$0xff] }
 0x92a   :  { %v2773_v7 = vpop.f32.mrb[26].mxu0  ;;  %v2844_v8 = vpop.f32.mrb[30].mxu1  ;;  %v4888_v59 = vpack.c.bf16 %v3067_v52, %v3066_v49 }
 0x92b   :  { %5045 = vtanh.f32 %v2697_v60  ;;  %v2774_v32 = vadd.f32 %v2773_v7, %v6889_v2  ;;  %v2775_v6 = vpop.f32.mrb[27].mxu0  ;;  %v2846_v31 = vpop.f32.mrb[31].mxu1  ;;  %v2845_v45 = vadd.f32 %v2844_v8, %v5582_v62  ;;  %v3068_v60 = vld [vmem:[%s6589_s7 + $0x70] sm:$0xff]  ;;  %v3069_v7 = vld [vmem:[%s6589_s7 + $0x78] sm:$0xff] }
 0x92c   :  { %v2776_v27 = vadd.f32 %v2775_v6, %v6891_v24  ;;  %v2847_v9 = vadd.f32 %v2846_v31, %v7292_v47  ;;  %v4892_v8 = vpack.c.bf16 %v3069_v7, %v3068_v60  ;;  %v7297_v6 = vld [vmem:[#allocation80_spill] sm:$0xff] }
 0x92d   :  { %v2858_v63 = vadd.f32 %v2854_v21, %v2774_v32  ;;  %v2860_v16 = vadd.f32 %v2856_v14, %v2845_v45  ;;  %v7295_v21 = vld [vmem:[#allocation82_spill] sm:$0xff]  ;;  %v7296_v32 = vld [vmem:[#allocation75_spill] sm:$0xff] }
 0x92e   :  { %v2859_v56 = vadd.f32 %v2855_v61, %v2776_v27  ;;  %v2861_v10 = vadd.f32 %v2857_v39, %v2847_v9 }
 0x92f   :  { %v3255_v55 = vmul.f32 -1.442695, %v2858_v63 }
 0x930   :  { %v3256_v46 = vmul.f32 -1.442695, %v2859_v56 }
 0x931   :  { %5047 = vpow2.f32 %v3255_v55 }
 0x932   :  { %5049 = vpow2.f32 %v3256_v46 }
 0x935   :  { %v5046_v30 = vpop.eup %5045 }
 0x936   :  { %v2700_v4 = vmul.f32 %v5046_v30, %v2699_v5 }
 0x938   :  { %v6474_v37 = vadd.f32 %v2701_v12, %v2700_v4 }
 0x93a   :  { %2945 = vmatprep.mubr.f32.mxu0 %v6474_v37  ;;  %3016 = vmatprep.mubr.f32.mxu1 %v6474_v37 }
 0x93b   :  { %v5048_v2 = vpop.eup %5047 }
 0x93c   :  { %v2865_v24 = vadd.f32 1.0, %v5048_v2  ;;  %v5050_v13 = vpop.eup %5049 }
 0x93d   :  { %v2871_v58 = vadd.f32 1.0, %v5050_v13  ;;  %v3259_v13 = vld [vmem:[#allocation4] ss:$0 sm:$0xff] }
 0x93e   :  { %5051 = vrcp.f32 %v2865_v24 }
 0x93f   :  { %5053 = vrcp.f32 %v2871_v58 }
 0x948   :  { %v5052_v11 = vpop.eup %5051 }
 0x949   :  { %v2874_v17 = vmul.f32 %v5052_v11, %v2861_v10  ;;  %v5054_v23 = vpop.eup %5053 }
 0x94a   :  { %v2877_v28 = vsub.f32 1.0, %v5054_v23  ;;  %v2879_v53 = vmul.f32 %v5054_v23, %v6354_v19  ;;  %v3060_v19 = vld [vmem:[%s6589_s7 + $0x30] sm:$0xff] }
 0x94b   :  { %v2875_v22 = vadd.f32 %v2874_v17, %v2860_v16  ;;  %v4876_v18 = vpack.c.bf16 %v3061_v15, %v3060_v19 }
 0x94d   :  { %5055 = vtanh.f32 %v2875_v22 }
 0x957   :  { %v5056_v29 = vpop.eup %5055 }
 0x958   :  { %v2878_v62 = vmul.f32 %v5056_v29, %v2877_v28 }
 0x95a   :  { %v2880_v40 = vadd.f32 %v2879_v53, %v2878_v62 }
 0x95c   :  { %2946 = vmatmul.mubr.f32.vlgmr.msra.gmra.mrb[28].mxu0 %v2880_v40  ;;  %3196 = vst [vmem:[#allocation10] sm:$0xff] %v2880_v40  ;;  %3017 = vmatmul.mubr.f32.vlgmr.msra.gmra.mrb[32].mxu1 %v2880_v40 }
 0x95d   :  { %4867 = vmatpush3.bf16.msra.mxu0 %v6462_v34  ;;  %3316 = vmatprep.mubr.f32.mxu0 %v7293_v57  ;;  %v3063_v34 = vld [vmem:[%s6589_s7 + $0x48] sm:$0xff] }
 0x95e   :  { %4869 = vmatprep.subr.bf16.mxu0 %v4868_v50  ;;  %v4880_v26 = vpack.c.bf16 %v3063_v34, %v3062_v25 }
 0x961   :  { %4871 = vmatpush3.bf16.msra.mxu0 %v4868_v50 }
 0x962   :  { %4873 = vmatprep.subr.bf16.mxu0 %v4872_v3 }
 0x965   :  { %4875 = vmatpush3.bf16.msra.mxu0 %v4872_v3 }
 0x966   :  { %4877 = vmatprep.subr.bf16.mxu0 %v4876_v18 }
 0x969   :  { %4879 = vmatpush3.bf16.msra.mxu0 %v4876_v18 }
 0x96a   :  { %4881 = vmatprep.subr.bf16.mxu0 %v4880_v26 }
 0x96d   :  { %4883 = vmatpush3.bf16.msra.mxu0 %v4880_v26 }
 0x96e   :  { %4885 = vmatprep.subr.bf16.mxu0 %v4884_v43 }
 0x971   :  { %4887 = vmatpush3.bf16.msra.mxu0 %v4884_v43 }
 0x972   :  { %4889 = vmatprep.subr.bf16.mxu0 %v4888_v59 }
 0x975   :  { %4891 = vmatpush3.bf16.msra.mxu0 %v4888_v59 }
 0x976   :  { %4893 = vmatprep.subr.bf16.mxu0 %v4892_v8 }
 0x979   :  { %4895 = vmatpush3.bf16.msra.mxu0 %v4892_v8 }
 0x97c   :  { %3317 = vmatmul.mubr.f32.vlgmr.msra.gmra.mrb[30].mxu0 %v7294_v20 }
 0x97d   :  { %3319 = vmatprep.mubr.f32.mxu0 %v7295_v21 }
 0x980   :  { %3320 = vmatmul.mubr.f32.gmra.mrb[32].mxu0 %v7296_v32 }
 0x981   :  { %3322 = vmatprep.mubr.f32.mxu0 %v7297_v6 }
 0x984   :  { %3323 = vmatmul.mubr.f32.gmra.mrb[34].mxu0 %v6345_v42 }
 0x985   :  { %3325 = vmatprep.mubr.f32.mxu0 %v6474_v37 }
 0xa2f   :  { %v2947_v31 = vpop.f32.mrb[28].mxu0  ;;  %v3018_v27 = vpop.f32.mrb[32].mxu1 }
 0xa30   :  { %v2948_v63 = vadd.f32 %v2947_v31, %v7289_v41  ;;  %v2949_v61 = vpop.f32.mrb[29].mxu0  ;;  %v3020_v55 = vpop.f32.mrb[33].mxu1  ;;  %v3019_v24 = vadd.f32 %v3018_v27, %v7290_v44 }
 0xa31   :  { %v2950_v48 = vadd.f32 %v2949_v61, %v6957_v38  ;;  %v3021_v42 = vadd.f32 %v3020_v55, %v7092_v1 }
 0xa32   :  { %v3257_v56 = vmul.f32 -1.442695, %v2948_v63 }
 0xa33   :  { %v3258_v46 = vmul.f32 -1.442695, %v2950_v48 }
 0xa34   :  { %5057 = vpow2.f32 %v3257_v56 }
 0xa35   :  { %5059 = vpow2.f32 %v3258_v46 }
 0xa3e   :  { %v5058_v5 = vpop.eup %5057 }
 0xa3f   :  { %v3026_v30 = vadd.f32 1.0, %v5058_v5  ;;  %v5060_v4 = vpop.eup %5059 }
 0xa40   :  { %v3032_v12 = vadd.f32 1.0, %v5060_v4 }
 0xa41   :  { %5061 = vrcp.f32 %v3026_v30 }
 0xa42   :  { %5063 = vrcp.f32 %v3032_v12 }
 0xa4b   :  { %v5062_v2 = vpop.eup %5061 }
 0xa4c   :  { %v3035_v41 = vmul.f32 %v5062_v2, %v3021_v42  ;;  %v5064_v10 = vpop.eup %5063 }
 0xa4d   :  { %v3038_v23 = vsub.f32 1.0, %v5064_v10  ;;  %v3040_v35 = vmul.f32 %v5064_v10, %v6474_v37 }
 0xa4e   :  { %v3036_v47 = vadd.f32 %v3035_v41, %v3019_v24 }
 0xa4f   :  { %v3318_v9 = vpop.f32.mrb[30].mxu0 }
 0xa50   :  { %5065 = vtanh.f32 %v3036_v47  ;;  %v3149_v38 = vadd.f32 %v3318_v9, %v3259_v13  ;;  %v3143_v39 = vpop.f32.mrb[31].mxu0 }
 0xa51   :  { %v3144_v45 = vadd.f32 %v3259_v13, %v3143_v39 }
 0xa52   :  { %3184 = vst.msk [vmem:[%s6591_s9 + $0x8] sm:$0xff] %vm3182_vm0, %v3149_v38 }
 0xa53   :  { %3183 = vst.msk [vmem:[%s6591_s9] sm:$0xff] %vm3182_vm0, %v3144_v45  ;;  %v3321_v1 = vpop.f32.mrb[32].mxu0 }
 0xa54   :  { %v3159_v44 = vadd.f32 %v3321_v1, %v3259_v13  ;;  %v3153_v58 = vpop.f32.mrb[33].mxu0 }
 0xa55   :  { %v3154_v14 = vadd.f32 %v3259_v13, %v3153_v58 }
 0xa56   :  { %3186 = vst.msk [vmem:[%s6591_s9 + $0x18] sm:$0xff] %vm3182_vm0, %v3159_v44 }
 0xa57   :  { %3185 = vst.msk [vmem:[%s6591_s9 + $0x10] sm:$0xff] %vm3182_vm0, %v3154_v14  ;;  %v3324_v11 = vpop.f32.mrb[34].mxu0 }
 0xa58   :  { %v3169_v16 = vadd.f32 %v3324_v11, %v3259_v13  ;;  %v3163_v17 = vpop.f32.mrb[35].mxu0 }
 0xa59   :  { %v3164_v22 = vadd.f32 %v3259_v13, %v3163_v17 }
 0xa5a   :  { %v5066_v28 = vpop.eup %5065  ;;  %3188 = vst.msk [vmem:[%s6591_s9 + $0x28] sm:$0xff] %vm3182_vm0, %v3169_v16 }
 0xa5b   :  { %3187 = vst.msk [vmem:[%s6591_s9 + $0x20] sm:$0xff] %vm3182_vm0, %v3164_v22  ;;  %v3039_v29 = vmul.f32 %v5066_v28, %v3038_v23 }
 0xa5d   :  { %v3041_v0 = vadd.f32 %v3040_v35, %v3039_v29 }
 0xa5f   :  { %3326 = vmatmul.mubr.f32.gmra.mrb[36].mxu0 %v3041_v0  ;;  %3197 = vst [vmem:[#allocation10 + $0x8] sm:$0xff] %v3041_v0 }
 0xa60   :  { %5122 = shalt.err (!%p5119_p6)
}
 0xa61   :  { %s5123_s12 = scalar_lea.hbm %s6592_s10, 256 }
 0xa62   :  { %p5124_p7 = scmp.ne.s32.totalorder %s6592_s10, %s5123_s12  ;;  %p5127_p8 = scmp.lt.u32.totalorder %s5123_s12, %s6592_s10 }
 0xa64   :  { %p5129_p9 = pnand %p5127_p8, %p5124_p7 }
 0xa66   :  { %5132 = shalt.err (!%p5129_p9)
}
 0xa67   :  { %s5146_s18 = smov 128   ;;  %s5147_s3 = smov 8  }
 0xa68   :  { %3211 = dma.vmem_to_hbm [thread:$0]  %s3206_s30, 256, %s6592_s10, [#allocation7], %s5146_s18, %s5146_s18, %s5147_s3  }
 0xb32   :  { %v3327_v37 = vpop.f32.mrb[36].mxu0 }
 0xb33   :  { %v3179_v62 = vadd.f32 %v3327_v37, %v3259_v13  ;;  %v3173_v53 = vpop.f32.mrb[37].mxu0 }
 0xb34   :  { %v3174_v40 = vadd.f32 %v3259_v13, %v3173_v53 }
 0xb35   :  { %3190 = vst.msk [vmem:[%s6591_s9 + $0x38] sm:$0xff] %vm3182_vm0, %v3179_v62 }
 0xb36   :  { %3189 = vst.msk [vmem:[%s6591_s9 + $0x30] sm:$0xff] %vm3182_vm0, %v3174_v40 }
 0xb37   :  { %5137 = dma.done.wait [#allocation7], 256  }
 0xb38   :  { %5138 = vsyncadd [#allocation7], 4294967040 }
 0xb39   :  { %3217 = vsyncpa [#allocation6], 1 }
 0xb3a   :  { %3218 = vsyncpa [#allocation9], 1 }
 0xb3b   :  { %3219 = vsyncpa [#allocation7], 1 }

</bundles_post_ra>
